<compile_context>
chip_gen: v7x
topology: tpu7x:2x2x1
jax: 0.10.0
libtpu: 0.0.40
codegen_flags: <defaults>
</compile_context>

<pallas_src>
import functools
import math

import jax
import jax.numpy as jnp
from jax.experimental import pallas as pl
from jax.experimental.pallas import tpu as pltpu


# -----------------------------------------------------------------------------
# Generation-aware VMEM budgets (v5e/v6e: 128 MiB physical, v7x: 64 MiB per TC)
# -----------------------------------------------------------------------------
def _physical_vmem_bytes():
    try:
        return int(pltpu.get_tpu_info().vmem_capacity_bytes)
    except Exception:
        pass
    try:
        kind = jax.devices()[0].device_kind.lower()
        if ("v5 lite" in kind or "v5e" in kind or "v5litepod" in kind
                or "v6" in kind):
            return 128 * 1024 * 1024
    except Exception:
        pass
    return 64 * 1024 * 1024          # conservative: v7x per-TC VMEM


_PHYS_VMEM = _physical_vmem_bytes()
_BIG_VMEM = _PHYS_VMEM >= 100 * 1024 * 1024
if _BIG_VMEM:                         # v5e / v6e (128 MiB VMEM)
    _VMEM_LIMIT = 96 * 1024 * 1024
    _MM_TM, _MM_TN, _MM_TK = 1024, 1024, 512
    _TILE_BUDGET = 32 * 1024 * 1024
    _ATTN_SEQ_TILE = 512
else:                                 # v7x (64 MiB per TC) or unknown
    _VMEM_LIMIT = 40 * 1024 * 1024
    _MM_TM, _MM_TN, _MM_TK = 512, 512, 512
    _TILE_BUDGET = 12 * 1024 * 1024
    _ATTN_SEQ_TILE = 256


def _round_up(x, m):
    return ((x + m - 1) // m) * m


def _sublane(dtype):
    # f32 -> 8 rows per vreg, bf16 -> 16, int8/fp8 -> 32
    return max(8, 32 // jnp.dtype(dtype).itemsize)


def _pick_block(dim, target, align):
    """Return (block, padded_dim).

    A block equal to the full dim is always layout-legal, so small dims are
    taken whole; large dims get an `align`-aligned block and the wrapper pads
    the array up to a multiple of it.
    """
    if dim <= target:
        return dim, dim
    blk = max(align, (target // align) * align)
    return blk, _round_up(dim, blk)


# -----------------------------------------------------------------------------
# LayerNorm
# -----------------------------------------------------------------------------
def _layernorm_kernel(x_ref, g_ref, b_ref, o_ref, *, eps):
    x = x_ref[...].astype(jnp.float32)                     # (rows, H)
    mean = jnp.mean(x, axis=-1, keepdims=True)
    xc = x - mean
    var = jnp.mean(xc * xc, axis=-1, keepdims=True)
    inv = jax.lax.rsqrt(var + eps)
    y = xc * inv * g_ref[...].astype(jnp.float32) + b_ref[...].astype(jnp.float32)
    o_ref[...] = y.astype(o_ref.dtype)                     # single cast at store


def layernorm(x, gamma, beta, eps=1e-6):
    orig_shape = x.shape
    H = orig_shape[-1]
    x2d = x.reshape(-1, H)
    rows = x2d.shape[0]

    sub = _sublane(x.dtype)
    itemsize = jnp.dtype(x.dtype).itemsize
    # ~4 live row buffers (double-buffered in + out) under the tile budget.
    cap = max(sub, _TILE_BUDGET // (4 * H * itemsize))
    blk = max(sub, min(2048, (cap // sub) * sub))
    if rows <= blk:
        blk = _round_up(rows, sub)
    padded = _round_up(rows, blk)
    if padded != rows:
        x2d = jnp.pad(x2d, ((0, padded - rows), (0, 0)))

    out = pl.pallas_call(
        functools.partial(_layernorm_kernel, eps=eps),
        out_shape=jax.ShapeDtypeStruct((padded, H), x.dtype),
        grid_spec=pltpu.PrefetchScalarGridSpec(
            num_scalar_prefetch=0,
            grid=(padded // blk,),
            in_specs=[
                pl.BlockSpec((blk, H), lambda i: (i, 0)),
                # constant index_map -> gamma/beta stay resident in VMEM
                pl.BlockSpec((1, H), lambda i: (0, 0)),
                pl.BlockSpec((1, H), lambda i: (0, 0)),
            ],
            out_specs=pl.BlockSpec((blk, H), lambda i: (i, 0)),
        ),
        compiler_params=pltpu.CompilerParams(
            dimension_semantics=("parallel",),
            vmem_limit_bytes=_VMEM_LIMIT,
        ),
    )(x2d, gamma.reshape(1, H).astype(x.dtype), beta.reshape(1, H).astype(x.dtype))
    if padded != rows:
        out = out[:rows]
    return out.reshape(orig_shape)


# -----------------------------------------------------------------------------
# Linear (+ bias, + exact GELU, + fused residual)
# -----------------------------------------------------------------------------
def _gelu_exact(x):
    # Exact GELU: 0.5*x*(1+erf(x/sqrt(2))). erf via Abramowitz & Stegun 7.1.26
    # (|err| <= 1.5e-7), built only from exp/mul/add/div so it lowers cleanly.
    a1, a2, a3, a4, a5 = (0.254829592, -0.284496736, 1.421413741,
                          -1.453152027, 1.061405429)
    p = 0.3275911
    z = x * 0.7071067811865476
    az = jnp.abs(z)
    t = 1.0 / (1.0 + p * az)
    poly = ((((a5 * t + a4) * t + a3) * t + a2) * t + a1) * t
    erf_abs = 1.0 - poly * jnp.exp(-az * az)
    erf = jnp.where(z >= 0, erf_abs, -erf_abs)
    return 0.5 * x * (1.0 + erf)


def _linear_kernel(x_ref, w_ref, b_ref, *rest, activation, has_residual):
    if has_residual:
        res_ref, o_ref, acc_ref = rest
    else:
        res_ref = None
        o_ref, acc_ref = rest

    @pl.when(pl.program_id(2) == 0)
    def _():
        acc_ref[...] = jnp.zeros_like(acc_ref)

    acc_ref[...] += jnp.dot(x_ref[...], w_ref[...],
                            preferred_element_type=jnp.float32)

    @pl.when(pl.program_id(2) == pl.num_programs(2) - 1)
    def _():
        acc = acc_ref[...] + b_ref[...].astype(jnp.float32)
        if activation == "gelu":
            acc = _gelu_exact(acc)
        if has_residual:
            acc = acc + res_ref[...].astype(jnp.float32)
        o_ref[...] = acc.astype(o_ref.dtype)


def linear(x, w, b=None, residual=None, activation=None):
    """out = act(x @ w + b) (+ residual).  x: (M, K), w: (K, N), b: (N,)."""
    M, K = x.shape
    Kw, N = w.shape
    assert K == Kw
    sub = _sublane(x.dtype)
    tm, Mp = _pick_block(M, _MM_TM, sub)
    tn, Np = _pick_block(N, _MM_TN, 256)   # 256-aligned fallback for v6e/v7x MXU
    tk, Kp = _pick_block(K, _MM_TK, 256)

    # small dims are taken whole above, so for typical aligned shapes these
    # pads are no-ops (no extra HBM copies).
    if (Mp, Kp) != (M, K):
        x = jnp.pad(x, ((0, Mp - M), (0, Kp - K)))
    if (Kp, Np) != (K, N):
        w = jnp.pad(w, ((0, Kp - K), (0, Np - N)))
    if b is None:
        bias = jnp.zeros((1, Np), dtype=x.dtype)
    else:
        bias = jnp.pad(b.astype(x.dtype).reshape(1, N), ((0, 0), (0, Np - N)))

    inputs = [x, w, bias]
    in_specs = [
        pl.BlockSpec((tm, tk), lambda i, j, k: (i, k)),
        pl.BlockSpec((tk, tn), lambda i, j, k: (k, j)),
        pl.BlockSpec((1, tn), lambda i, j, k: (0, j)),
    ]
    has_residual = residual is not None
    if has_residual:
        r = residual
        if (Mp, Np) != r.shape:
            r = jnp.pad(r, ((0, Mp - M), (0, Np - N)))
        inputs.append(r)
        in_specs.append(pl.BlockSpec((tm, tn), lambda i, j, k: (i, j)))

    out = pl.pallas_call(
        functools.partial(_linear_kernel, activation=activation,
                          has_residual=has_residual),
        out_shape=jax.ShapeDtypeStruct((Mp, Np), x.dtype),
        grid_spec=pltpu.PrefetchScalarGridSpec(
            num_scalar_prefetch=0,
            grid=(Mp // tm, Np // tn, Kp // tk),
            in_specs=in_specs,
            out_specs=pl.BlockSpec((tm, tn), lambda i, j, k: (i, j)),
            scratch_shapes=[pltpu.VMEM((tm, tn), jnp.float32)],
        ),
        compiler_params=pltpu.CompilerParams(
            dimension_semantics=("parallel", "parallel", "arbitrary"),
            vmem_limit_bytes=_VMEM_LIMIT,
        ),
    )(*inputs)
    if (Mp, Np) != (M, N):
        out = out[:M, :N]
    return out


# -----------------------------------------------------------------------------
# Multi-head attention (flash-style online softmax over the key axis)
# -----------------------------------------------------------------------------
def _mha_kernel(q_ref, k_ref, v_ref, o_ref, m_sc, l_sc, acc_sc, *,
                scale, kv_len, block_k, need_mask):
    ki = pl.program_id(2)

    @pl.when(ki == 0)
    def _():
        m_sc[...] = jnp.full_like(m_sc, -jnp.inf)
        l_sc[...] = jnp.zeros_like(l_sc)
        acc_sc[...] = jnp.zeros_like(acc_sc)

    # Native-dtype MXU feeds (bf16 runs at full MXU rate); f32 accumulation via
    # preferred_element_type.  Scale is folded into the small q tile.
    q = q_ref[...] * scale                                  # (tb, tq, d)
    s = jnp.einsum("bqd,bkd->bqk", q, k_ref[...],
                   preferred_element_type=jnp.float32)      # (tb, tq, tk) f32
    if need_mask:   # static python flag: mask zero-padded keys at the tail
        pos = ki * block_k + jax.lax.broadcasted_iota(jnp.int32, s.shape, 2)
        s = jnp.where(pos < kv_len, s, -jnp.inf)

    m_prev = m_sc[...]                                      # (tb, tq, 128)
    m_next = jnp.maximum(m_prev, jnp.max(s, axis=-1, keepdims=True))
    alpha = jnp.exp(m_prev - m_next)                        # (tb, tq, 128)
    p = jnp.exp(s - m_next[..., 0:1])                       # (tb, tq, tk) f32
    l_sc[...] = alpha * l_sc[...] + jnp.sum(p, axis=-1, keepdims=True)
    acc_sc[...] = alpha[..., 0:1] * acc_sc[...] + jnp.einsum(
        "bqk,bkd->bqd", p.astype(v_ref.dtype), v_ref[...],
        preferred_element_type=jnp.float32)
    m_sc[...] = m_next

    @pl.when(ki == pl.num_programs(2) - 1)
    def _():
        inv_l = pl.reciprocal(l_sc[..., 0:1], approx=True)  # divide -> EUP slot
        o_ref[...] = (acc_sc[...] * inv_l).astype(o_ref.dtype)


def attention_qkv(qkvh, scale):
    """qkvh: (3, BH, L, d) packed [q, k, v]; returns softmax(q k^T * scale) v
    per leading (group*head) index, attending over L."""
    _, BH, L, d = qkvh.shape
    isz = jnp.dtype(qkvh.dtype).itemsize
    sub = _sublane(qkvh.dtype)

    ts, Lp = _pick_block(L, _ATTN_SEQ_TILE, sub)
    tq = tk = ts
    # corrected per-head VMEM model: q tile (ki-resident, single-counted),
    # double-buffered k/v/out tiles, f32 s & p temporaries, lane-dense m/l
    # scratch and the f32 accumulator.
    bytes_per_b = (tq * d * isz                 # q tile
                   + 2 * 2 * tk * d * isz       # k, v (double-buffered)
                   + 2 * tq * d * isz           # out (double-buffered)
                   + 2 * tq * tk * 4            # s and p intermediates
                   + 2 * tq * 128 * 4           # m / l scratch
                   + tq * d * 4)                # accumulator
    target_b = max(1, _TILE_BUDGET // max(bytes_per_b, 1))
    tb, BHp = _pick_block(BH, target_b, 1)

    if (BHp, Lp) != (BH, L):
        qkvh = jnp.pad(qkvh, ((0, 0), (0, BHp - BH), (0, Lp - L), (0, 0)))

    out = pl.pallas_call(
        functools.partial(_mha_kernel, scale=scale, kv_len=L, block_k=tk,
                          need_mask=(Lp != L)),
        out_shape=jax.ShapeDtypeStruct((BHp, Lp, d), qkvh.dtype),
        grid_spec=pltpu.PrefetchScalarGridSpec(
            num_scalar_prefetch=0,
            grid=(BHp // tb, Lp // tq, Lp // tk),
            in_specs=[
                # q / k / v are slices 0 / 1 / 2 of the same packed array; no
                # separate q/k/v HBM copies are ever materialized.
                pl.BlockSpec((None, tb, tq, d), lambda b, qi, ki: (0, b, qi, 0)),
                pl.BlockSpec((None, tb, tk, d), lambda b, qi, ki: (1, b, ki, 0)),
                pl.BlockSpec((None, tb, tk, d), lambda b, qi, ki: (2, b, ki, 0)),
            ],
            out_specs=pl.BlockSpec((tb, tq, d), lambda b, qi, ki: (b, qi, 0)),
            scratch_shapes=[
                pltpu.VMEM((tb, tq, 128), jnp.float32),   # m (lane-dense)
                pltpu.VMEM((tb, tq, 128), jnp.float32),   # l (lane-dense)
                pltpu.VMEM((tb, tq, d), jnp.float32),     # acc
            ],
        ),
        compiler_params=pltpu.CompilerParams(
            dimension_semantics=("parallel", "parallel", "arbitrary"),
            vmem_limit_bytes=_VMEM_LIMIT,
        ),
    )(qkvh, qkvh, qkvh)
    if (BHp, Lp) != (BH, L):
        out = out[:BH, :L]
    return out


# -----------------------------------------------------------------------------
# Full XMoEDecoderLayer forward
# -----------------------------------------------------------------------------
def prepare_params(params):
    """One-time parameter prep (outside jit): fuse q and kv projection weights."""
    p = dict(params)
    if "wqkv" not in p:
        p["wqkv"] = jnp.concatenate([p["wq"], p["wkv"]], axis=1)
    return p


def xmoe_decoder_layer(dec_inp, params, n_head, attn_mask=None):
    """Forward of XMoEDecoderLayer (inference: dropout layers are identity).

    dec_inp: (S, B, H).  The torch module transposes to (B, S, H) before LN /
    attention and back afterwards; LN and the row-wise linears are order
    agnostic so we work directly on dec_inp.reshape(S*B, H), and attention
    groups rows per (s, head) attending over B (= dim 0 of the transposed
    hidden_states), which matches the torch einsums exactly.
    """
    # TODO(synk): 2-D / 3-D attention-mask masked_fill path not implemented;
    # this covers the attn_mask=None path (the module's default).
    assert attn_mask is None
    S, B, H = dec_inp.shape
    x2d = dec_inp.reshape(S * B, H)

    # input_layernorm
    ln1 = layernorm(x2d, params["ln1_g"], params["ln1_b"], eps=1e-6)

    # fused q + kv projection (no bias):  qkv = ln1 @ [wq | wkv]
    if "wqkv" in params:
        wqkv = params["wqkv"]
    else:
        wqkv = jnp.concatenate([params["wq"], params["wkv"]], axis=1)
    nd = wqkv.shape[1] // 3
    d_head = nd // n_head
    qkv = linear(ln1, wqkv)                                  # (S*B, 3*nd)

    # single packed head-split: (3, S*n_head, B, d_head); columns [q | k | v]
    # match torch.chunk(kv_net(c), 2, -1) ordering.
    qkvh = (qkv.reshape(S, B, 3, n_head, d_head)
               .transpose(2, 0, 3, 1, 4)
               .reshape(3, S * n_head, B, d_head))

    # einsum('ibnd,jbnd->ijbn') * scale -> softmax(dim=1) -> einsum('ijbn,jbnd->ibnd')
    ah = attention_qkv(qkvh, scale=1.0 / math.sqrt(d_head))  # (S*n_head, B, d)
    attn_vec = (ah.reshape(S, n_head, B, d_head)
                  .transpose(0, 2, 1, 3)
                  .reshape(S * B, nd))

    # o-projection with the residual (pre-layernorm hidden_states) fused in
    y = linear(attn_vec, params["wo"], residual=x2d)

    # post-attention layernorm + MLP (Linear + exact GELU + Linear)
    ln2 = layernorm(y, params["ln2_g"], params["ln2_b"], eps=1e-6)
    h1 = linear(ln2, params["w1"], b=params["b1"], activation="gelu")
    out = linear(h1, params["w2"], b=params["b2"])
    return out.reshape(S, B, H)


# -----------------------------------------------------------------------------
# Pure-JAX reference (same math as the PyTorch forward, inference mode)
# -----------------------------------------------------------------------------
def reference_forward(dec_inp, params, n_head):
    def ln(t, g, b, eps=1e-6):
        mu = t.mean(-1, keepdims=True)
        var = ((t - mu) ** 2).mean(-1, keepdims=True)
        return (t - mu) / jnp.sqrt(var + eps) * g + b

    h = jnp.swapaxes(dec_inp, 0, 1)                 # hidden_states (B, S, H)
    L0, L1, H = h.shape
    ln1 = ln(h, params["ln1_g"], params["ln1_b"])
    q = ln1 @ params["wq"]
    kv = ln1 @ params["wkv"]
    nd = params["wq"].shape[1]
    d = nd // n_head
    k_, v_ = kv[..., :nd], kv[..., nd:]
    q4 = q.reshape(L0, L1, n_head, d)
    k4 = k_.reshape(L0, L1, n_head, d)
    v4 = v_.reshape(L0, L1, n_head, d)
    score = jnp.einsum("ibnd,jbnd->ijbn", q4, k4) * (1.0 / math.sqrt(d))
    prob = jax.nn.softmax(score, axis=1)
    vec = jnp.einsum("ijbn,jbnd->ibnd", prob, v4).reshape(L0, L1, nd)
    attn_out = vec @ params["wo"]
    y = h + attn_out
    y = jnp.swapaxes(y, 0, 1)                       # back to (S, B, H)
    ln2 = ln(y, params["ln2_g"], params["ln2_b"])
    h1 = jax.nn.gelu(ln2 @ params["w1"] + params["b1"], approximate=False)
    return h1 @ params["w2"] + params["b2"]


if __name__ == "__main__":
    key = jax.random.PRNGKey(0)
    S, B, H = 8, 2, 32          # dec_inp is [s, b, h] (module docstring)
    n_head = 4                  # config.attn_n_experts
    d_head = H // n_head
    d_inner = 64                # config.transformer_hidden_dim

    ks = jax.random.split(key, 8)
    dec_inp = jax.random.normal(ks[0], (S, B, H), dtype=jnp.float32)
    params = {
        "ln1_g": jnp.ones((H,), jnp.float32), "ln1_b": jnp.zeros((H,), jnp.float32),
        "ln2_g": jnp.ones((H,), jnp.float32), "ln2_b": jnp.zeros((H,), jnp.float32),
        "wq":  0.05 * jax.random.normal(ks[1], (H, n_head * d_head), jnp.float32),
        "wkv": 0.05 * jax.random.normal(ks[2], (H, 2 * n_head * d_head), jnp.float32),
        "wo":  0.05 * jax.random.normal(ks[3], (n_head * d_head, H), jnp.float32),
        "w1":  0.05 * jax.random.normal(ks[4], (H, d_inner), jnp.float32),
        "b1":  0.02 * jax.random.normal(ks[5], (d_inner,), jnp.float32),
        "w2":  0.05 * jax.random.normal(ks[6], (d_inner, H), jnp.float32),
        "b2":  0.02 * jax.random.normal(ks[7], (H,), jnp.float32),
    }

    run_params = prepare_params(params)   # one-time weight fusion outside jit
    fwd = jax.jit(functools.partial(xmoe_decoder_layer, n_head=n_head))
    out = fwd(dec_inp, run_params)
    jax.block_until_ready(out)

    ref = reference_forward(dec_inp, params, n_head)
    assert out.shape == dec_inp.shape, (out.shape, dec_inp.shape)
    max_err = float(jnp.max(jnp.abs(out - ref)))
    assert jnp.allclose(out, ref, atol=1e-4, rtol=1e-4), f"max abs err {max_err}"

    print("KERNEL_OK")
</pallas_src>

<mosaic_0001>
module attributes {stable_mosaic.version = 11 : i64} {
  func.func @_layernorm_kernel(%arg0: i32, %arg1: memref<16x32xf32, #tpu.memory_space<vmem>>, %arg2: memref<1x32xf32, #tpu.memory_space<vmem>>, %arg3: memref<1x32xf32, #tpu.memory_space<vmem>>, %arg4: memref<16x32xf32, #tpu.memory_space<vmem>>) attributes {dimension_semantics = [#tpu.dimension_semantics<parallel>], iteration_bounds = array<i64: 1>, scalar_prefetch = 0 : i64, scratch_operands = 0 : i64, tpu.core_type = #tpu.core_type<tc>, window_params = [{transform_indices = @transform_0, window_bounds = array<i64: 16, 32>}, {pipeline_mode = #tpu.pipeline_mode<synchronous>, transform_indices = @transform_1, window_bounds = array<i64: 1, 32>}, {pipeline_mode = #tpu.pipeline_mode<synchronous>, transform_indices = @transform_2, window_bounds = array<i64: 1, 32>}, {transform_indices = @transform_3, window_bounds = array<i64: 16, 32>}]} {
    %c0 = arith.constant 0 : index
    %c0_0 = arith.constant 0 : index
    %0 = vector.load %arg1[%c0, %c0_0] : memref<16x32xf32, #tpu.memory_space<vmem>>, vector<16x32xf32>
    %cst = arith.constant dense<0.000000e+00> : vector<16xf32>
    %1 = vector.multi_reduction <add>, %0, %cst [1] : vector<16x32xf32> to vector<16xf32>
    %2 = vector.shape_cast %1 : vector<16xf32> to vector<16x1xf32>
    %cst_1 = arith.constant 3.200000e+01 : f32
    %3 = vector.broadcast %cst_1 : f32 to vector<16x1xf32>
    %4 = arith.divf %2, %3 : vector<16x1xf32>
    %5 = vector.broadcast %4 : vector<16x1xf32> to vector<16x32xf32>
    %6 = arith.subf %0, %5 : vector<16x32xf32>
    %7 = arith.mulf %6, %6 : vector<16x32xf32>
    %cst_2 = arith.constant dense<0.000000e+00> : vector<16xf32>
    %8 = vector.multi_reduction <add>, %7, %cst_2 [1] : vector<16x32xf32> to vector<16xf32>
    %9 = vector.shape_cast %8 : vector<16xf32> to vector<16x1xf32>
    %cst_3 = arith.constant 3.200000e+01 : f32
    %10 = vector.broadcast %cst_3 : f32 to vector<16x1xf32>
    %11 = arith.divf %9, %10 : vector<16x1xf32>
    %cst_4 = arith.constant 9.99999997E-7 : f32
    %12 = vector.broadcast %cst_4 : f32 to vector<16x1xf32>
    %13 = arith.addf %11, %12 : vector<16x1xf32>
    %14 = math.rsqrt %13 : vector<16x1xf32>
    %15 = vector.broadcast %14 : vector<16x1xf32> to vector<16x32xf32>
    %16 = arith.mulf %6, %15 : vector<16x32xf32>
    %c0_5 = arith.constant 0 : index
    %c0_6 = arith.constant 0 : index
    %17 = vector.load %arg2[%c0_5, %c0_6] : memref<1x32xf32, #tpu.memory_space<vmem>>, vector<1x32xf32>
    %18 = vector.broadcast %17 : vector<1x32xf32> to vector<16x32xf32>
    %19 = arith.mulf %16, %18 : vector<16x32xf32>
    %c0_7 = arith.constant 0 : index
    %c0_8 = arith.constant 0 : index
    %20 = vector.load %arg3[%c0_7, %c0_8] : memref<1x32xf32, #tpu.memory_space<vmem>>, vector<1x32xf32>
    %21 = vector.broadcast %20 : vector<1x32xf32> to vector<16x32xf32>
    %22 = arith.addf %19, %21 : vector<16x32xf32>
    %c0_9 = arith.constant 0 : index
    %c0_10 = arith.constant 0 : index
    %23 = vector.load %arg4[%c0_9, %c0_10] : memref<16x32xf32, #tpu.memory_space<vmem>>, vector<16x32xf32>
    tpu.vector_store %arg4[%c0_9, %c0_10], %22 {strides = array<i32>} : memref<16x32xf32, #tpu.memory_space<vmem>>, vector<16x32xf32>,
    return
  }
  func.func @transform_0(%arg0: i32) -> (i32, i32) {
    %c0_i32 = arith.constant 0 : i32
    %c0_i32_0 = arith.constant 0 : i32
    return %arg0, %c0_i32 : i32, i32
  }
  func.func @transform_1(%arg0: i32) -> (i32, i32) {
    %c0_i32 = arith.constant 0 : i32
    %c0_i32_0 = arith.constant 0 : i32
    %c0_i32_1 = arith.constant 0 : i32
    return %c0_i32, %c0_i32_0 : i32, i32
  }
  func.func @transform_2(%arg0: i32) -> (i32, i32) {
    %c0_i32 = arith.constant 0 : i32
    %c0_i32_0 = arith.constant 0 : i32
    %c0_i32_1 = arith.constant 0 : i32
    return %c0_i32, %c0_i32_0 : i32, i32
  }
  func.func @transform_3(%arg0: i32) -> (i32, i32) {
    %c0_i32 = arith.constant 0 : i32
    %c0_i32_0 = arith.constant 0 : i32
    return %arg0, %c0_i32 : i32, i32
  }
}

module attributes {stable_mosaic.version = 11 : i64} {
  func.func @_linear_kernel(%arg0: i32, %arg1: i32, %arg2: i32, %arg3: memref<16x32xf32, #tpu.memory_space<vmem>>, %arg4: memref<32x96xf32, #tpu.memory_space<vmem>>, %arg5: memref<1x96xf32, #tpu.memory_space<vmem>>, %arg6: memref<16x96xf32, #tpu.memory_space<vmem>>, %arg7: memref<16x96xf32, #tpu.memory_space<vmem>>) attributes {dimension_semantics = [#tpu.dimension_semantics<parallel>, #tpu.dimension_semantics<parallel>, #tpu.dimension_semantics<arbitrary>], iteration_bounds = array<i64: 1, 1, 1>, scalar_prefetch = 0 : i64, scratch_operands = 1 : i64, tpu.core_type = #tpu.core_type<tc>, window_params = [{transform_indices = @transform_0, window_bounds = array<i64: 16, 32>}, {transform_indices = @transform_1, window_bounds = array<i64: 32, 96>}, {transform_indices = @transform_2, window_bounds = array<i64: 1, 96>}, {transform_indices = @transform_3, window_bounds = array<i64: 16, 96>}]} {
    %c0_i32 = arith.constant 0 : i32
    %0 = arith.cmpi eq, %arg2, %c0_i32 : i32
    %1 = arith.extui %0 : i1 to i32
    %c0_i32_0 = arith.constant 0 : i32
    %2 = arith.cmpi ne, %1, %c0_i32_0 : i32
    scf.if %2 {
      %cst_10 = arith.constant 0.000000e+00 : f32
      %12 = vector.broadcast %cst_10 : f32 to vector<16x96xf32>
      %c0_11 = arith.constant 0 : index
      %c0_12 = arith.constant 0 : index
      %13 = vector.load %arg7[%c0_11, %c0_12] : memref<16x96xf32, #tpu.memory_space<vmem>>, vector<16x96xf32>
      tpu.vector_store %arg7[%c0_11, %c0_12], %12 {strides = array<i32>} : memref<16x96xf32, #tpu.memory_space<vmem>>, vector<16x96xf32>,
    } else {
    }
    %c0 = arith.constant 0 : index
    %c0_1 = arith.constant 0 : index
    %3 = vector.load %arg7[%c0, %c0_1] : memref<16x96xf32, #tpu.memory_space<vmem>>, vector<16x96xf32>
    %c0_2 = arith.constant 0 : index
    %c0_3 = arith.constant 0 : index
    %4 = vector.load %arg3[%c0_2, %c0_3] : memref<16x32xf32, #tpu.memory_space<vmem>>, vector<16x32xf32>
    %c0_4 = arith.constant 0 : index
    %c0_5 = arith.constant 0 : index
    %5 = vector.load %arg4[%c0_4, %c0_5] : memref<32x96xf32, #tpu.memory_space<vmem>>, vector<32x96xf32>
    %cst = arith.constant dense<0.000000e+00> : vector<16x96xf32>
    %6 = tpu.matmul %4, %5, %cst {dimension_numbers = #tpu.dot_dimension_numbers<[1], [0], [0], [1], [0, 0, 1, 1], [], []>} : vector<16x32xf32>, vector<32x96xf32>, vector<16x96xf32> -> vector<16x96xf32>
    %7 = arith.addf %3, %6 : vector<16x96xf32>
    %c0_6 = arith.constant 0 : index
    %c0_7 = arith.constant 0 : index
    %8 = vector.load %arg7[%c0_6, %c0_7] : memref<16x96xf32, #tpu.memory_space<vmem>>, vector<16x96xf32>
    tpu.vector_store %arg7[%c0_6, %c0_7], %7 {strides = array<i32>} : memref<16x96xf32, #tpu.memory_space<vmem>>, vector<16x96xf32>,
    %c0_i32_8 = arith.constant 0 : i32
    %9 = arith.cmpi eq, %arg2, %c0_i32_8 : i32
    %10 = arith.extui %9 : i1 to i32
    %c0_i32_9 = arith.constant 0 : i32
    %11 = arith.cmpi ne, %10, %c0_i32_9 : i32
    scf.if %11 {
      %c0_10 = arith.constant 0 : index
      %c0_11 = arith.constant 0 : index
      %12 = vector.load %arg7[%c0_10, %c0_11] : memref<16x96xf32, #tpu.memory_space<vmem>>, vector<16x96xf32>
      %c0_12 = arith.constant 0 : index
      %c0_13 = arith.constant 0 : index
      %13 = vector.load %arg5[%c0_12, %c0_13] : memref<1x96xf32, #tpu.memory_space<vmem>>, vector<1x96xf32>
      %14 = vector.broadcast %13 : vector<1x96xf32> to vector<16x96xf32>
      %15 = arith.addf %12, %14 : vector<16x96xf32>
      %c0_14 = arith.constant 0 : index
      %c0_15 = arith.constant 0 : index
      %16 = vector.load %arg6[%c0_14, %c0_15] : memref<16x96xf32, #tpu.memory_space<vmem>>, vector<16x96xf32>
      tpu.vector_store %arg6[%c0_14, %c0_15], %15 {strides = array<i32>} : memref<16x96xf32, #tpu.memory_space<vmem>>, vector<16x96xf32>,
    } else {
    }
    return
  }
  func.func @transform_0(%arg0: i32, %arg1: i32, %arg2: i32) -> (i32, i32) {
    %c0_i32 = arith.constant 0 : i32
    return %arg0, %arg2 : i32, i32
  }
  func.func @transform_1(%arg0: i32, %arg1: i32, %arg2: i32) -> (i32, i32) {
    %c0_i32 = arith.constant 0 : i32
    return %arg2, %arg1 : i32, i32
  }
  func.func @transform_2(%arg0: i32, %arg1: i32, %arg2: i32) -> (i32, i32) {
    %c0_i32 = arith.constant 0 : i32
    %c0_i32_0 = arith.constant 0 : i32
    return %c0_i32, %arg1 : i32, i32
  }
  func.func @transform_3(%arg0: i32, %arg1: i32, %arg2: i32) -> (i32, i32) {
    %c0_i32 = arith.constant 0 : i32
    return %arg0, %arg1 : i32, i32
  }
}

module attributes {stable_mosaic.version = 11 : i64} {
  func.func @_mha_kernel(%arg0: i32, %arg1: i32, %arg2: i32, %arg3: memref<1x32x2x8xf32, #tpu.memory_space<vmem>>, %arg4: memref<1x32x2x8xf32, #tpu.memory_space<vmem>>, %arg5: memref<1x32x2x8xf32, #tpu.memory_space<vmem>>, %arg6: memref<32x2x8xf32, #tpu.memory_space<vmem>>, %arg7: memref<32x2x128xf32, #tpu.memory_space<vmem>>, %arg8: memref<32x2x128xf32, #tpu.memory_space<vmem>>, %arg9: memref<32x2x8xf32, #tpu.memory_space<vmem>>) attributes {dimension_semantics = [#tpu.dimension_semantics<parallel>, #tpu.dimension_semantics<parallel>, #tpu.dimension_semantics<arbitrary>], iteration_bounds = array<i64: 1, 1, 1>, scalar_prefetch = 0 : i64, scratch_operands = 3 : i64, tpu.core_type = #tpu.core_type<tc>, window_params = [{transform_indices = @transform_0, window_bounds = array<i64: 1, 32, 2, 8>}, {transform_indices = @transform_1, window_bounds = array<i64: 1, 32, 2, 8>}, {transform_indices = @transform_2, window_bounds = array<i64: 1, 32, 2, 8>}, {transform_indices = @transform_3, window_bounds = array<i64: 32, 2, 8>}]} {
    %c0_i32 = arith.constant 0 : i32
    %0 = arith.cmpi eq, %arg2, %c0_i32 : i32
    %1 = arith.extui %0 : i1 to i32
    %c0_i32_0 = arith.constant 0 : i32
    %2 = arith.cmpi ne, %1, %c0_i32_0 : i32
    scf.if %2 {
      %cst_36 = arith.constant 0xFF800000 : f32
      %41 = vector.broadcast %cst_36 : f32 to vector<32x2x128xf32>
      %c0_37 = arith.constant 0 : index
      %c0_38 = arith.constant 0 : index
      %c0_39 = arith.constant 0 : index
      %42 = vector.load %arg7[%c0_37, %c0_38, %c0_39] : memref<32x2x128xf32, #tpu.memory_space<vmem>>, vector<32x2x128xf32>
      tpu.vector_store %arg7[%c0_37, %c0_38, %c0_39], %41 {strides = array<i32>} : memref<32x2x128xf32, #tpu.memory_space<vmem>>, vector<32x2x128xf32>,
      %cst_40 = arith.constant 0.000000e+00 : f32
      %43 = vector.broadcast %cst_40 : f32 to vector<32x2x128xf32>
      %c0_41 = arith.constant 0 : index
      %c0_42 = arith.constant 0 : index
      %c0_43 = arith.constant 0 : index
      %44 = vector.load %arg8[%c0_41, %c0_42, %c0_43] : memref<32x2x128xf32, #tpu.memory_space<vmem>>, vector<32x2x128xf32>
      tpu.vector_store %arg8[%c0_41, %c0_42, %c0_43], %43 {strides = array<i32>} : memref<32x2x128xf32, #tpu.memory_space<vmem>>, vector<32x2x128xf32>,
      %cst_44 = arith.constant 0.000000e+00 : f32
      %45 = vector.broadcast %cst_44 : f32 to vector<32x2x8xf32>
      %c0_45 = arith.constant 0 : index
      %c0_46 = arith.constant 0 : index
      %c0_47 = arith.constant 0 : index
      %46 = vector.load %arg9[%c0_45, %c0_46, %c0_47] : memref<32x2x8xf32, #tpu.memory_space<vmem>>, vector<32x2x8xf32>
      tpu.vector_store %arg9[%c0_45, %c0_46, %c0_47], %45 {strides = array<i32>} : memref<32x2x8xf32, #tpu.memory_space<vmem>>, vector<32x2x8xf32>,
    } else {
    }
    %c0 = arith.constant 0 : index
    %c0_1 = arith.constant 0 : index
    %c0_2 = arith.constant 0 : index
    %c0_3 = arith.constant 0 : index
    %3 = vector.load %arg3[%c0, %c0_1, %c0_2, %c0_3] : memref<1x32x2x8xf32, #tpu.memory_space<vmem>>, vector<1x32x2x8xf32>
    %4 = vector.shape_cast %3 : vector<1x32x2x8xf32> to vector<32x2x8xf32>
    %cst = arith.constant 0.353553385 : f32
    %5 = vector.broadcast %cst : f32 to vector<32x2x8xf32>
    %6 = arith.mulf %4, %5 : vector<32x2x8xf32>
    %c0_4 = arith.constant 0 : index
    %c0_5 = arith.constant 0 : index
    %c0_6 = arith.constant 0 : index
    %c0_7 = arith.constant 0 : index
    %7 = vector.load %arg4[%c0_4, %c0_5, %c0_6, %c0_7] : memref<1x32x2x8xf32, #tpu.memory_space<vmem>>, vector<1x32x2x8xf32>
    %8 = vector.shape_cast %7 : vector<1x32x2x8xf32> to vector<32x2x8xf32>
    "tpu.trace_start"() <{level = 10 : i32, message = "bqd,bkd->bqk"}> : () -> ()
    %cst_8 = arith.constant dense<0.000000e+00> : vector<32x2x2xf32>
    %9 = tpu.matmul %6, %8, %cst_8 {dimension_numbers = #tpu.dot_dimension_numbers<[2], [2], [1], [1], [0, 0, 0, 1, 1, 1], [0], [0]>} : vector<32x2x8xf32>, vector<32x2x8xf32>, vector<32x2x2xf32> -> vector<32x2x2xf32>
    "tpu.trace_stop"() : () -> ()
    %c0_9 = arith.constant 0 : index
    %c0_10 = arith.constant 0 : index
    %c0_11 = arith.constant 0 : index
    %10 = vector.load %arg7[%c0_9, %c0_10, %c0_11] : memref<32x2x128xf32, #tpu.memory_space<vmem>>, vector<32x2x128xf32>
    %cst_12 = arith.constant dense<0xFF800000> : vector<32x2xf32>
    %11 = vector.multi_reduction <maximumf>, %9, %cst_12 [2] : vector<32x2x2xf32> to vector<32x2xf32>
    %12 = vector.shape_cast %11 : vector<32x2xf32> to vector<32x2x1xf32>
    %13 = vector.broadcast %12 : vector<32x2x1xf32> to vector<32x2x128xf32>
    %14 = arith.maximumf %10, %13 : vector<32x2x128xf32>
    %15 = arith.subf %10, %14 : vector<32x2x128xf32>
    %16 = math.exp %15 : vector<32x2x128xf32>
    %17 = vector.extract_strided_slice %14 {offsets = [0, 0, 0], sizes = [32, 2, 1], strides = [1, 1, 1]} : vector<32x2x128xf32> to vector<32x2x1xf32>
    %18 = vector.broadcast %17 : vector<32x2x1xf32> to vector<32x2x2xf32>
    %19 = arith.subf %9, %18 : vector<32x2x2xf32>
    %20 = math.exp %19 : vector<32x2x2xf32>
    %c0_13 = arith.constant 0 : index
    %c0_14 = arith.constant 0 : index
    %c0_15 = arith.constant 0 : index
    %21 = vector.load %arg8[%c0_13, %c0_14, %c0_15] : memref<32x2x128xf32, #tpu.memory_space<vmem>>, vector<32x2x128xf32>
    %22 = arith.mulf %16, %21 : vector<32x2x128xf32>
    %cst_16 = arith.constant dense<0.000000e+00> : vector<32x2xf32>
    %23 = vector.multi_reduction <add>, %20, %cst_16 [2] : vector<32x2x2xf32> to vector<32x2xf32>
    %24 = vector.shape_cast %23 : vector<32x2xf32> to vector<32x2x1xf32>
    %25 = vector.broadcast %24 : vector<32x2x1xf32> to vector<32x2x128xf32>
    %26 = arith.addf %22, %25 : vector<32x2x128xf32>
    %c0_17 = arith.constant 0 : index
    %c0_18 = arith.constant 0 : index
    %c0_19 = arith.constant 0 : index
    %27 = vector.load %arg8[%c0_17, %c0_18, %c0_19] : memref<32x2x128xf32, #tpu.memory_space<vmem>>, vector<32x2x128xf32>
    tpu.vector_store %arg8[%c0_17, %c0_18, %c0_19], %26 {strides = array<i32>} : memref<32x2x128xf32, #tpu.memory_space<vmem>>, vector<32x2x128xf32>,
    %28 = vector.extract_strided_slice %16 {offsets = [0, 0, 0], sizes = [32, 2, 1], strides = [1, 1, 1]} : vector<32x2x128xf32> to vector<32x2x1xf32>
    %c0_20 = arith.constant 0 : index
    %c0_21 = arith.constant 0 : index
    %c0_22 = arith.constant 0 : index
    %29 = vector.load %arg9[%c0_20, %c0_21, %c0_22] : memref<32x2x8xf32, #tpu.memory_space<vmem>>, vector<32x2x8xf32>
    %30 = vector.broadcast %28 : vector<32x2x1xf32> to vector<32x2x8xf32>
    %31 = arith.mulf %30, %29 : vector<32x2x8xf32>
    %c0_23 = arith.constant 0 : index
    %c0_24 = arith.constant 0 : index
    %c0_25 = arith.constant 0 : index
    %c0_26 = arith.constant 0 : index
    %32 = vector.load %arg5[%c0_23, %c0_24, %c0_25, %c0_26] : memref<1x32x2x8xf32, #tpu.memory_space<vmem>>, vector<1x32x2x8xf32>
    %33 = vector.shape_cast %32 : vector<1x32x2x8xf32> to vector<32x2x8xf32>
    "tpu.trace_start"() <{level = 10 : i32, message = "bqk,bkd->bqd"}> : () -> ()
    %cst_27 = arith.constant dense<0.000000e+00> : vector<32x2x8xf32>
    %34 = tpu.matmul %20, %33, %cst_27 {dimension_numbers = #tpu.dot_dimension_numbers<[2], [1], [1], [2], [0, 0, 0, 1, 1, 2], [0], [0]>} : vector<32x2x2xf32>, vector<32x2x8xf32>, vector<32x2x8xf32> -> vector<32x2x8xf32>
    "tpu.trace_stop"() : () -> ()
    %35 = arith.addf %31, %34 : vector<32x2x8xf32>
    %c0_28 = arith.constant 0 : index
    %c0_29 = arith.constant 0 : index
    %c0_30 = arith.constant 0 : index
    %36 = vector.load %arg9[%c0_28, %c0_29, %c0_30] : memref<32x2x8xf32, #tpu.memory_space<vmem>>, vector<32x2x8xf32>
    tpu.vector_store %arg9[%c0_28, %c0_29, %c0_30], %35 {strides = array<i32>} : memref<32x2x8xf32, #tpu.memory_space<vmem>>, vector<32x2x8xf32>,
    %c0_31 = arith.constant 0 : index
    %c0_32 = arith.constant 0 : index
    %c0_33 = arith.constant 0 : index
    %37 = vector.load %arg7[%c0_31, %c0_32, %c0_33] : memref<32x2x128xf32, #tpu.memory_space<vmem>>, vector<32x2x128xf32>
    tpu.vector_store %arg7[%c0_31, %c0_32, %c0_33], %14 {strides = array<i32>} : memref<32x2x128xf32, #tpu.memory_space<vmem>>, vector<32x2x128xf32>,
    %c0_i32_34 = arith.constant 0 : i32
    %38 = arith.cmpi eq, %arg2, %c0_i32_34 : i32
    %39 = arith.extui %38 : i1 to i32
    %c0_i32_35 = arith.constant 0 : i32
    %40 = arith.cmpi ne, %39, %c0_i32_35 : i32
    scf.if %40 {
      %c0_36 = arith.constant 0 : index
      %c0_37 = arith.constant 0 : index
      %c0_38 = arith.constant 0 : index
      %41 = vector.load %arg8[%c0_36, %c0_37, %c0_38] : memref<32x2x128xf32, #tpu.memory_space<vmem>>, vector<32x2x1xf32>
      %42 = tpu.reciprocal %41 {approx = true} : vector<32x2x1xf32> -> vector<32x2x1xf32>
      %c0_39 = arith.constant 0 : index
      %c0_40 = arith.constant 0 : index
      %c0_41 = arith.constant 0 : index
      %43 = vector.load %arg9[%c0_39, %c0_40, %c0_41] : memref<32x2x8xf32, #tpu.memory_space<vmem>>, vector<32x2x8xf32>
      %44 = vector.broadcast %42 : vector<32x2x1xf32> to vector<32x2x8xf32>
      %45 = arith.mulf %43, %44 : vector<32x2x8xf32>
      %c0_42 = arith.constant 0 : index
      %c0_43 = arith.constant 0 : index
      %c0_44 = arith.constant 0 : index
      %46 = vector.load %arg6[%c0_42, %c0_43, %c0_44] : memref<32x2x8xf32, #tpu.memory_space<vmem>>, vector<32x2x8xf32>
      tpu.vector_store %arg6[%c0_42, %c0_43, %c0_44], %45 {strides = array<i32>} : memref<32x2x8xf32, #tpu.memory_space<vmem>>, vector<32x2x8xf32>,
    } else {
    }
    return
  }
  func.func @transform_0(%arg0: i32, %arg1: i32, %arg2: i32) -> (i32, i32, i32, i32) {
    %c0_i32 = arith.constant 0 : i32
    %c0_i32_0 = arith.constant 0 : i32
    %c0_i32_1 = arith.constant 0 : i32
    return %c0_i32, %arg0, %arg1, %c0_i32_0 : i32, i32, i32, i32
  }
  func.func @transform_1(%arg0: i32, %arg1: i32, %arg2: i32) -> (i32, i32, i32, i32) {
    %c1_i32 = arith.constant 1 : i32
    %c0_i32 = arith.constant 0 : i32
    %c0_i32_0 = arith.constant 0 : i32
    return %c1_i32, %arg0, %arg2, %c0_i32 : i32, i32, i32, i32
  }
  func.func @transform_2(%arg0: i32, %arg1: i32, %arg2: i32) -> (i32, i32, i32, i32) {
    %c2_i32 = arith.constant 2 : i32
    %c0_i32 = arith.constant 0 : i32
    %c0_i32_0 = arith.constant 0 : i32
    return %c2_i32, %arg0, %arg2, %c0_i32 : i32, i32, i32, i32
  }
  func.func @transform_3(%arg0: i32, %arg1: i32, %arg2: i32) -> (i32, i32, i32) {
    %c0_i32 = arith.constant 0 : i32
    %c0_i32_0 = arith.constant 0 : i32
    return %arg0, %arg1, %c0_i32 : i32, i32, i32
  }
}

module attributes {stable_mosaic.version = 11 : i64} {
  func.func @_linear_kernel(%arg0: i32, %arg1: i32, %arg2: i32, %arg3: memref<16x32xf32, #tpu.memory_space<vmem>>, %arg4: memref<32x32xf32, #tpu.memory_space<vmem>>, %arg5: memref<1x32xf32, #tpu.memory_space<vmem>>, %arg6: memref<16x32xf32, #tpu.memory_space<vmem>>, %arg7: memref<16x32xf32, #tpu.memory_space<vmem>>, %arg8: memref<16x32xf32, #tpu.memory_space<vmem>>) attributes {dimension_semantics = [#tpu.dimension_semantics<parallel>, #tpu.dimension_semantics<parallel>, #tpu.dimension_semantics<arbitrary>], iteration_bounds = array<i64: 1, 1, 1>, scalar_prefetch = 0 : i64, scratch_operands = 1 : i64, tpu.core_type = #tpu.core_type<tc>, window_params = [{transform_indices = @transform_0, window_bounds = array<i64: 16, 32>}, {transform_indices = @transform_1, window_bounds = array<i64: 32, 32>}, {transform_indices = @transform_2, window_bounds = array<i64: 1, 32>}, {transform_indices = @transform_3, window_bounds = array<i64: 16, 32>}, {transform_indices = @transform_4, window_bounds = array<i64: 16, 32>}]} {
    %c0_i32 = arith.constant 0 : i32
    %0 = arith.cmpi eq, %arg2, %c0_i32 : i32
    %1 = arith.extui %0 : i1 to i32
    %c0_i32_0 = arith.constant 0 : i32
    %2 = arith.cmpi ne, %1, %c0_i32_0 : i32
    scf.if %2 {
      %cst_10 = arith.constant 0.000000e+00 : f32
      %12 = vector.broadcast %cst_10 : f32 to vector<16x32xf32>
      %c0_11 = arith.constant 0 : index
      %c0_12 = arith.constant 0 : index
      %13 = vector.load %arg8[%c0_11, %c0_12] : memref<16x32xf32, #tpu.memory_space<vmem>>, vector<16x32xf32>
      tpu.vector_store %arg8[%c0_11, %c0_12], %12 {strides = array<i32>} : memref<16x32xf32, #tpu.memory_space<vmem>>, vector<16x32xf32>,
    } else {
    }
    %c0 = arith.constant 0 : index
    %c0_1 = arith.constant 0 : index
    %3 = vector.load %arg8[%c0, %c0_1] : memref<16x32xf32, #tpu.memory_space<vmem>>, vector<16x32xf32>
    %c0_2 = arith.constant 0 : index
    %c0_3 = arith.constant 0 : index
    %4 = vector.load %arg3[%c0_2, %c0_3] : memref<16x32xf32, #tpu.memory_space<vmem>>, vector<16x32xf32>
    %c0_4 = arith.constant 0 : index
    %c0_5 = arith.constant 0 : index
    %5 = vector.load %arg4[%c0_4, %c0_5] : memref<32x32xf32, #tpu.memory_space<vmem>>, vector<32x32xf32>
    %cst = arith.constant dense<0.000000e+00> : vector<16x32xf32>
    %6 = tpu.matmul %4, %5, %cst {dimension_numbers = #tpu.dot_dimension_numbers<[1], [0], [0], [1], [0, 0, 1, 1], [], []>} : vector<16x32xf32>, vector<32x32xf32>, vector<16x32xf32> -> vector<16x32xf32>
    %7 = arith.addf %3, %6 : vector<16x32xf32>
    %c0_6 = arith.constant 0 : index
    %c0_7 = arith.constant 0 : index
    %8 = vector.load %arg8[%c0_6, %c0_7] : memref<16x32xf32, #tpu.memory_space<vmem>>, vector<16x32xf32>
    tpu.vector_store %arg8[%c0_6, %c0_7], %7 {strides = array<i32>} : memref<16x32xf32, #tpu.memory_space<vmem>>, vector<16x32xf32>,
    %c0_i32_8 = arith.constant 0 : i32
    %9 = arith.cmpi eq, %arg2, %c0_i32_8 : i32
    %10 = arith.extui %9 : i1 to i32
    %c0_i32_9 = arith.constant 0 : i32
    %11 = arith.cmpi ne, %10, %c0_i32_9 : i32
    scf.if %11 {
      %c0_10 = arith.constant 0 : index
      %c0_11 = arith.constant 0 : index
      %12 = vector.load %arg8[%c0_10, %c0_11] : memref<16x32xf32, #tpu.memory_space<vmem>>, vector<16x32xf32>
      %c0_12 = arith.constant 0 : index
      %c0_13 = arith.constant 0 : index
      %13 = vector.load %arg5[%c0_12, %c0_13] : memref<1x32xf32, #tpu.memory_space<vmem>>, vector<1x32xf32>
      %14 = vector.broadcast %13 : vector<1x32xf32> to vector<16x32xf32>
      %15 = arith.addf %12, %14 : vector<16x32xf32>
      %c0_14 = arith.constant 0 : index
      %c0_15 = arith.constant 0 : index
      %16 = vector.load %arg6[%c0_14, %c0_15] : memref<16x32xf32, #tpu.memory_space<vmem>>, vector<16x32xf32>
      %17 = arith.addf %15, %16 : vector<16x32xf32>
      %c0_16 = arith.constant 0 : index
      %c0_17 = arith.constant 0 : index
      %18 = vector.load %arg7[%c0_16, %c0_17] : memref<16x32xf32, #tpu.memory_space<vmem>>, vector<16x32xf32>
      tpu.vector_store %arg7[%c0_16, %c0_17], %17 {strides = array<i32>} : memref<16x32xf32, #tpu.memory_space<vmem>>, vector<16x32xf32>,
    } else {
    }
    return
  }
  func.func @transform_0(%arg0: i32, %arg1: i32, %arg2: i32) -> (i32, i32) {
    %c0_i32 = arith.constant 0 : i32
    return %arg0, %arg2 : i32, i32
  }
  func.func @transform_1(%arg0: i32, %arg1: i32, %arg2: i32) -> (i32, i32) {
    %c0_i32 = arith.constant 0 : i32
    return %arg2, %arg1 : i32, i32
  }
  func.func @transform_2(%arg0: i32, %arg1: i32, %arg2: i32) -> (i32, i32) {
    %c0_i32 = arith.constant 0 : i32
    %c0_i32_0 = arith.constant 0 : i32
    return %c0_i32, %arg1 : i32, i32
  }
  func.func @transform_3(%arg0: i32, %arg1: i32, %arg2: i32) -> (i32, i32) {
    %c0_i32 = arith.constant 0 : i32
    return %arg0, %arg1 : i32, i32
  }
  func.func @transform_4(%arg0: i32, %arg1: i32, %arg2: i32) -> (i32, i32) {
    %c0_i32 = arith.constant 0 : i32
    return %arg0, %arg1 : i32, i32
  }
}

module attributes {stable_mosaic.version = 11 : i64} {
  func.func @_linear_kernel(%arg0: i32, %arg1: i32, %arg2: i32, %arg3: memref<16x64xf32, #tpu.memory_space<vmem>>, %arg4: memref<64x32xf32, #tpu.memory_space<vmem>>, %arg5: memref<1x32xf32, #tpu.memory_space<vmem>>, %arg6: memref<16x32xf32, #tpu.memory_space<vmem>>, %arg7: memref<16x32xf32, #tpu.memory_space<vmem>>) attributes {dimension_semantics = [#tpu.dimension_semantics<parallel>, #tpu.dimension_semantics<parallel>, #tpu.dimension_semantics<arbitrary>], iteration_bounds = array<i64: 1, 1, 1>, scalar_prefetch = 0 : i64, scratch_operands = 1 : i64, tpu.core_type = #tpu.core_type<tc>, window_params = [{transform_indices = @transform_0, window_bounds = array<i64: 16, 64>}, {transform_indices = @transform_1, window_bounds = array<i64: 64, 32>}, {transform_indices = @transform_2, window_bounds = array<i64: 1, 32>}, {transform_indices = @transform_3, window_bounds = array<i64: 16, 32>}]} {
    %c0_i32 = arith.constant 0 : i32
    %0 = arith.cmpi eq, %arg2, %c0_i32 : i32
    %1 = arith.extui %0 : i1 to i32
    %c0_i32_0 = arith.constant 0 : i32
    %2 = arith.cmpi ne, %1, %c0_i32_0 : i32
    scf.if %2 {
      %cst_10 = arith.constant 0.000000e+00 : f32
      %12 = vector.broadcast %cst_10 : f32 to vector<16x32xf32>
      %c0_11 = arith.constant 0 : index
      %c0_12 = arith.constant 0 : index
      %13 = vector.load %arg7[%c0_11, %c0_12] : memref<16x32xf32, #tpu.memory_space<vmem>>, vector<16x32xf32>
      tpu.vector_store %arg7[%c0_11, %c0_12], %12 {strides = array<i32>} : memref<16x32xf32, #tpu.memory_space<vmem>>, vector<16x32xf32>,
    } else {
    }
    %c0 = arith.constant 0 : index
    %c0_1 = arith.constant 0 : index
    %3 = vector.load %arg7[%c0, %c0_1] : memref<16x32xf32, #tpu.memory_space<vmem>>, vector<16x32xf32>
    %c0_2 = arith.constant 0 : index
    %c0_3 = arith.constant 0 : index
    %4 = vector.load %arg3[%c0_2, %c0_3] : memref<16x64xf32, #tpu.memory_space<vmem>>, vector<16x64xf32>
    %c0_4 = arith.constant 0 : index
    %c0_5 = arith.constant 0 : index
    %5 = vector.load %arg4[%c0_4, %c0_5] : memref<64x32xf32, #tpu.memory_space<vmem>>, vector<64x32xf32>
    %cst = arith.constant dense<0.000000e+00> : vector<16x32xf32>
    %6 = tpu.matmul %4, %5, %cst {dimension_numbers = #tpu.dot_dimension_numbers<[1], [0], [0], [1], [0, 0, 1, 1], [], []>} : vector<16x64xf32>, vector<64x32xf32>, vector<16x32xf32> -> vector<16x32xf32>
    %7 = arith.addf %3, %6 : vector<16x32xf32>
    %c0_6 = arith.constant 0 : index
    %c0_7 = arith.constant 0 : index
    %8 = vector.load %arg7[%c0_6, %c0_7] : memref<16x32xf32, #tpu.memory_space<vmem>>, vector<16x32xf32>
    tpu.vector_store %arg7[%c0_6, %c0_7], %7 {strides = array<i32>} : memref<16x32xf32, #tpu.memory_space<vmem>>, vector<16x32xf32>,
    %c0_i32_8 = arith.constant 0 : i32
    %9 = arith.cmpi eq, %arg2, %c0_i32_8 : i32
    %10 = arith.extui %9 : i1 to i32
    %c0_i32_9 = arith.constant 0 : i32
    %11 = arith.cmpi ne, %10, %c0_i32_9 : i32
    scf.if %11 {
      %c0_10 = arith.constant 0 : index
      %c0_11 = arith.constant 0 : index
      %12 = vector.load %arg7[%c0_10, %c0_11] : memref<16x32xf32, #tpu.memory_space<vmem>>, vector<16x32xf32>
      %c0_12 = arith.constant 0 : index
      %c0_13 = arith.constant 0 : index
      %13 = vector.load %arg5[%c0_12, %c0_13] : memref<1x32xf32, #tpu.memory_space<vmem>>, vector<1x32xf32>
      %14 = vector.broadcast %13 : vector<1x32xf32> to vector<16x32xf32>
      %15 = arith.addf %12, %14 : vector<16x32xf32>
      %c0_14 = arith.constant 0 : index
      %c0_15 = arith.constant 0 : index
      %16 = vector.load %arg6[%c0_14, %c0_15] : memref<16x32xf32, #tpu.memory_space<vmem>>, vector<16x32xf32>
      tpu.vector_store %arg6[%c0_14, %c0_15], %15 {strides = array<i32>} : memref<16x32xf32, #tpu.memory_space<vmem>>, vector<16x32xf32>,
    } else {
    }
    return
  }
  func.func @transform_0(%arg0: i32, %arg1: i32, %arg2: i32) -> (i32, i32) {
    %c0_i32 = arith.constant 0 : i32
    return %arg0, %arg2 : i32, i32
  }
  func.func @transform_1(%arg0: i32, %arg1: i32, %arg2: i32) -> (i32, i32) {
    %c0_i32 = arith.constant 0 : i32
    return %arg2, %arg1 : i32, i32
  }
  func.func @transform_2(%arg0: i32, %arg1: i32, %arg2: i32) -> (i32, i32) {
    %c0_i32 = arith.constant 0 : i32
    %c0_i32_0 = arith.constant 0 : i32
    return %c0_i32, %arg1 : i32, i32
  }
  func.func @transform_3(%arg0: i32, %arg1: i32, %arg2: i32) -> (i32, i32) {
    %c0_i32 = arith.constant 0 : i32
    return %arg0, %arg1 : i32, i32
  }
}

module attributes {stable_mosaic.version = 11 : i64} {
  func.func @_linear_kernel(%arg0: i32, %arg1: i32, %arg2: i32, %arg3: memref<16x32xf32, #tpu.memory_space<vmem>>, %arg4: memref<32x64xf32, #tpu.memory_space<vmem>>, %arg5: memref<1x64xf32, #tpu.memory_space<vmem>>, %arg6: memref<16x64xf32, #tpu.memory_space<vmem>>, %arg7: memref<16x64xf32, #tpu.memory_space<vmem>>) attributes {dimension_semantics = [#tpu.dimension_semantics<parallel>, #tpu.dimension_semantics<parallel>, #tpu.dimension_semantics<arbitrary>], iteration_bounds = array<i64: 1, 1, 1>, scalar_prefetch = 0 : i64, scratch_operands = 1 : i64, tpu.core_type = #tpu.core_type<tc>, window_params = [{transform_indices = @transform_0, window_bounds = array<i64: 16, 32>}, {transform_indices = @transform_1, window_bounds = array<i64: 32, 64>}, {transform_indices = @transform_2, window_bounds = array<i64: 1, 64>}, {transform_indices = @transform_3, window_bounds = array<i64: 16, 64>}]} {
    %c0_i32 = arith.constant 0 : i32
    %0 = arith.cmpi eq, %arg2, %c0_i32 : i32
    %1 = arith.extui %0 : i1 to i32
    %c0_i32_0 = arith.constant 0 : i32
    %2 = arith.cmpi ne, %1, %c0_i32_0 : i32
    scf.if %2 {
      %cst_10 = arith.constant 0.000000e+00 : f32
      %12 = vector.broadcast %cst_10 : f32 to vector<16x64xf32>
      %c0_11 = arith.constant 0 : index
      %c0_12 = arith.constant 0 : index
      %13 = vector.load %arg7[%c0_11, %c0_12] : memref<16x64xf32, #tpu.memory_space<vmem>>, vector<16x64xf32>
      tpu.vector_store %arg7[%c0_11, %c0_12], %12 {strides = array<i32>} : memref<16x64xf32, #tpu.memory_space<vmem>>, vector<16x64xf32>,
    } else {
    }
    %c0 = arith.constant 0 : index
    %c0_1 = arith.constant 0 : index
    %3 = vector.load %arg7[%c0, %c0_1] : memref<16x64xf32, #tpu.memory_space<vmem>>, vector<16x64xf32>
    %c0_2 = arith.constant 0 : index
    %c0_3 = arith.constant 0 : index
    %4 = vector.load %arg3[%c0_2, %c0_3] : memref<16x32xf32, #tpu.memory_space<vmem>>, vector<16x32xf32>
    %c0_4 = arith.constant 0 : index
    %c0_5 = arith.constant 0 : index
    %5 = vector.load %arg4[%c0_4, %c0_5] : memref<32x64xf32, #tpu.memory_space<vmem>>, vector<32x64xf32>
    %cst = arith.constant dense<0.000000e+00> : vector<16x64xf32>
    %6 = tpu.matmul %4, %5, %cst {dimension_numbers = #tpu.dot_dimension_numbers<[1], [0], [0], [1], [0, 0, 1, 1], [], []>} : vector<16x32xf32>, vector<32x64xf32>, vector<16x64xf32> -> vector<16x64xf32>
    %7 = arith.addf %3, %6 : vector<16x64xf32>
    %c0_6 = arith.constant 0 : index
    %c0_7 = arith.constant 0 : index
    %8 = vector.load %arg7[%c0_6, %c0_7] : memref<16x64xf32, #tpu.memory_space<vmem>>, vector<16x64xf32>
    tpu.vector_store %arg7[%c0_6, %c0_7], %7 {strides = array<i32>} : memref<16x64xf32, #tpu.memory_space<vmem>>, vector<16x64xf32>,
    %c0_i32_8 = arith.constant 0 : i32
    %9 = arith.cmpi eq, %arg2, %c0_i32_8 : i32
    %10 = arith.extui %9 : i1 to i32
    %c0_i32_9 = arith.constant 0 : i32
    %11 = arith.cmpi ne, %10, %c0_i32_9 : i32
    scf.if %11 {
      %c0_10 = arith.constant 0 : index
      %c0_11 = arith.constant 0 : index
      %12 = vector.load %arg7[%c0_10, %c0_11] : memref<16x64xf32, #tpu.memory_space<vmem>>, vector<16x64xf32>
      %c0_12 = arith.constant 0 : index
      %c0_13 = arith.constant 0 : index
      %13 = vector.load %arg5[%c0_12, %c0_13] : memref<1x64xf32, #tpu.memory_space<vmem>>, vector<1x64xf32>
      %14 = vector.broadcast %13 : vector<1x64xf32> to vector<16x64xf32>
      %15 = arith.addf %12, %14 : vector<16x64xf32>
      %cst_14 = arith.constant 0.707106769 : f32
      %16 = vector.broadcast %cst_14 : f32 to vector<16x64xf32>
      %17 = arith.mulf %15, %16 : vector<16x64xf32>
      %18 = math.absf %17 : vector<16x64xf32>
      %cst_15 = arith.constant 0.327591091 : f32
      %19 = vector.broadcast %cst_15 : f32 to vector<16x64xf32>
      %20 = arith.mulf %19, %18 : vector<16x64xf32>
      %cst_16 = arith.constant 1.000000e+00 : f32
      %21 = vector.broadcast %cst_16 : f32 to vector<16x64xf32>
      %22 = arith.addf %21, %20 : vector<16x64xf32>
      %cst_17 = arith.constant 1.000000e+00 : f32
      %23 = vector.broadcast %cst_17 : f32 to vector<16x64xf32>
      %24 = arith.divf %23, %22 : vector<16x64xf32>
      %cst_18 = arith.constant 1.06140542 : f32
      %25 = vector.broadcast %cst_18 : f32 to vector<16x64xf32>
      %26 = arith.mulf %25, %24 : vector<16x64xf32>
      %cst_19 = arith.constant -1.45315206 : f32
      %27 = vector.broadcast %cst_19 : f32 to vector<16x64xf32>
      %28 = arith.addf %26, %27 : vector<16x64xf32>
      %29 = arith.mulf %28, %24 : vector<16x64xf32>
      %cst_20 = arith.constant 1.42141378 : f32
      %30 = vector.broadcast %cst_20 : f32 to vector<16x64xf32>
      %31 = arith.addf %29, %30 : vector<16x64xf32>
      %32 = arith.mulf %31, %24 : vector<16x64xf32>
      %cst_21 = arith.constant -0.284496725 : f32
      %33 = vector.broadcast %cst_21 : f32 to vector<16x64xf32>
      %34 = arith.addf %32, %33 : vector<16x64xf32>
      %35 = arith.mulf %34, %24 : vector<16x64xf32>
      %cst_22 = arith.constant 0.254829586 : f32
      %36 = vector.broadcast %cst_22 : f32 to vector<16x64xf32>
      %37 = arith.addf %35, %36 : vector<16x64xf32>
      %38 = arith.mulf %37, %24 : vector<16x64xf32>
      %cst_23 = arith.constant 0.000000e+00 : f32
      %39 = vector.broadcast %cst_23 : f32 to vector<16x64xf32>
      %40 = arith.subf %39, %18 : vector<16x64xf32>
      %41 = arith.mulf %40, %18 : vector<16x64xf32>
      %42 = math.exp %41 : vector<16x64xf32>
      %43 = arith.mulf %38, %42 : vector<16x64xf32>
      %cst_24 = arith.constant 1.000000e+00 : f32
      %44 = vector.broadcast %cst_24 : f32 to vector<16x64xf32>
      %45 = arith.subf %44, %43 : vector<16x64xf32>
      %cst_25 = arith.constant 0.000000e+00 : f32
      %46 = vector.broadcast %cst_25 : f32 to vector<16x64xf32>
      %47 = arith.cmpf oge, %17, %46 : vector<16x64xf32>
      %cst_26 = arith.constant 0.000000e+00 : f32
      %48 = vector.broadcast %cst_26 : f32 to vector<16x64xf32>
      %49 = arith.subf %48, %45 : vector<16x64xf32>
      %50 = arith.select %47, %45, %49 : vector<16x64xi1>, vector<16x64xf32>
      %cst_27 = arith.constant 5.000000e-01 : f32
      %51 = vector.broadcast %cst_27 : f32 to vector<16x64xf32>
      %52 = arith.mulf %51, %15 : vector<16x64xf32>
      %cst_28 = arith.constant 1.000000e+00 : f32
      %53 = vector.broadcast %cst_28 : f32 to vector<16x64xf32>
      %54 = arith.addf %53, %50 : vector<16x64xf32>
      %55 = arith.mulf %52, %54 : vector<16x64xf32>
      %c0_29 = arith.constant 0 : index
      %c0_30 = arith.constant 0 : index
      %56 = vector.load %arg6[%c0_29, %c0_30] : memref<16x64xf32, #tpu.memory_space<vmem>>, vector<16x64xf32>
      tpu.vector_store %arg6[%c0_29, %c0_30], %55 {strides = array<i32>} : memref<16x64xf32, #tpu.memory_space<vmem>>, vector<16x64xf32>,
    } else {
    }
    return
  }
  func.func @transform_0(%arg0: i32, %arg1: i32, %arg2: i32) -> (i32, i32) {
    %c0_i32 = arith.constant 0 : i32
    return %arg0, %arg2 : i32, i32
  }
  func.func @transform_1(%arg0: i32, %arg1: i32, %arg2: i32) -> (i32, i32) {
    %c0_i32 = arith.constant 0 : i32
    return %arg2, %arg1 : i32, i32
  }
  func.func @transform_2(%arg0: i32, %arg1: i32, %arg2: i32) -> (i32, i32) {
    %c0_i32 = arith.constant 0 : i32
    %c0_i32_0 = arith.constant 0 : i32
    return %c0_i32, %arg1 : i32, i32
  }
  func.func @transform_3(%arg0: i32, %arg1: i32, %arg2: i32) -> (i32, i32) {
    %c0_i32 = arith.constant 0 : i32
    return %arg0, %arg1 : i32, i32
  }
}

</mosaic_0001>

<bundles_post_ra>
// kernel: xmoe_decoder_layer.7
= control target key start
LH: loop header
LB: loop body
LE: loop exit
PB: predicated region body
PF: predicated region fallthrough
CT: control target
= control target key end

     0   :  { %vm16_vm0 = vcmask 261120   ;;  %s118_s0 = inlined_call_operand.vmem [shape: f32[16,32], index: 0, kind: input, shape index: {}]   ;;  %s119_s1 = inlined_call_operand.vmem [shape: f32[1,32], index: 1, kind: input, shape index: {}]   ;;  %s120_s2 = inlined_call_operand.vmem [shape: f32[1,32], index: 2, kind: input, shape index: {}]   ;;  %s121_s3 = inlined_call_operand.vmem [shape: f32[16,32], index: 3, kind: output, shape index: {}]  }
   0x1   :  { %v14_v0 = vld [vmem:[%s118_s0] sm:$0xff]  ;;  %v15_v1 = vld [vmem:[%s118_s0 + $0x8] sm:$0xff] }
   0x2   :  { %v17_v2 = vsel %vm16_vm0, %v14_v0, 0.0  ;;  %v20_v3 = vsel %vm16_vm0, %v15_v1, 0.0  ;;  %v68_v21 = vld [vmem:[%s119_s1] ss:$0 sm:$0xff] }
   0x3   :  { %18 = vadd.xlane.f32.xlu0 %v17_v2  ;;  %v69_v23 = vld [vmem:[%s120_s2] ss:$0 sm:$0xff] }
   0x7   :  { %21 = vadd.xlane.f32.xlu0 %v20_v3 }
  0x90   :  { %v19_v4 = vpop.xlane.xlu0 %18 }
  0x91   :  { %v24_v5 = vmul.f32 0.03125, %v19_v4 }
  0x93   :  { %v26_v6 = vsub.f32 %v14_v0, %v24_v5 }
  0x94   :  { %v22_v7 = vpop.xlane.xlu0 %21 }
  0x95   :  { %v25_v8 = vmul.f32 0.03125, %v22_v7  ;;  %v28_v9 = vmul.f32 %v26_v6, %v26_v6 }
  0x97   :  { %v27_v10 = vsub.f32 %v15_v1, %v25_v8  ;;  %v30_v11 = vsel %vm16_vm0, %v28_v9, 0.0 }
  0x98   :  { %31 = vadd.xlane.f32.xlu1 %v30_v11 }
  0x99   :  { %v29_v12 = vmul.f32 %v27_v10, %v27_v10 }
  0x9b   :  { %v33_v13 = vsel %vm16_vm0, %v29_v12, 0.0 }
  0x9c   :  { %34 = vadd.xlane.f32.xlu1 %v33_v13 }
 0x125   :  { %v32_v14 = vpop.xlane.xlu1 %31 }
 0x126   :  { %v36_v15 = vmul.f32 0.03125, %v32_v14 }
 0x128   :  { %v38_v16 = vadd.f32 1e-06, %v36_v15 }
 0x129   :  { %v35_v17 = vpop.xlane.xlu1 %34 }
 0x12a   :  { %70 = vrsqrt.f32 %v38_v16  ;;  %v37_v18 = vmul.f32 0.03125, %v35_v17 }
 0x12c   :  { %v39_v19 = vadd.f32 1e-06, %v37_v18 }
 0x12e   :  { %72 = vrsqrt.f32 %v39_v19 }
 0x134   :  { %v71_v20 = vpop.eup %70 }
 0x135   :  { %v42_v22 = vmul.f32 %v71_v20, %v26_v6 }
 0x137   :  { %v51_v24 = vmul.f32 %v68_v21, %v42_v22 }
 0x138   :  { %v73_v25 = vpop.eup %72 }
 0x139   :  { %v60_v26 = vadd.f32 %v69_v23, %v51_v24  ;;  %v43_v27 = vmul.f32 %v73_v25, %v27_v10 }
 0x13b   :  { %62 = vst.msk [vmem:[%s121_s3] sm:$0xff] %vm16_vm0, %v60_v26  ;;  %v52_v28 = vmul.f32 %v68_v21, %v43_v27 }
 0x13d   :  { %v61_v29 = vadd.f32 %v69_v23, %v52_v28 }
 0x13f   :  { %63 = vst.msk [vmem:[%s121_s3 + $0x8] sm:$0xff] %vm16_vm0, %v61_v29 }

// kernel: xmoe_decoder_layer.8
= control target key start
LH: loop header
LB: loop body
LE: loop exit
PB: predicated region body
PF: predicated region fallthrough
CT: control target
= control target key end

     0   :  { %vm29_vm0 = vcmask 261120   ;;  %vm18_vm1 = vcmask 785408   ;;  %v165_v3 = vmov 0.0   ;;  %s221_s1 = inlined_call_operand.vmem [shape: f32[32,96], index: 1, kind: input, shape index: {}]   ;;  %s222_s0 = inlined_call_operand.vmem [shape: f32[16,32], index: 0, kind: input, shape index: {}]   ;;  %s223_s2 = inlined_call_operand.vmem [shape: f32[1,96], index: 2, kind: input, shape index: {}]   ;;  %s224_s3 = inlined_call_operand.vmem [shape: f32[16,96], index: 3, kind: output, shape index: {}]  }
   0x1   :  { %v25_v0 = vld [vmem:[%s221_s1] sm:$0xff]  ;;  %v26_v1 = vld [vmem:[%s221_s1 + $0x8] sm:$0xff]  ;;  %v27_v2 = vld [vmem:[%s221_s1 + $0x10] sm:$0xff]  ;;  %20 = vst.msk [vmem:[#allocation2 + $0x8] sm:$0xff] %vm18_vm1, %v165_v3 }
   0x2   :  { %19 = vst.msk [vmem:[#allocation2] sm:$0xff] %vm18_vm1, %v165_v3  ;;  %v156_v4 = vpack.c.bf16 %v26_v1, %v25_v0  ;;  %v28_v5 = vld [vmem:[%s221_s1 + $0x18] sm:$0xff]  ;;  %v23_v6 = vld [vmem:[%s222_s0] sm:$0xff]  ;;  %v24_v8 = vld [vmem:[%s222_s0 + $0x8] sm:$0xff] }
   0x3   :  { %v160_v7 = vpack.c.bf16 %v28_v5, %v27_v2  ;;  %153 = vmatprep.mubr.msk.f32.mxu0 %vm29_vm0, %v23_v6  ;;  %v138_v15 = vld [vmem:[%s223_s2] ss:$0 sm:$0xff] }
   0x4   :  { %157 = vmatprep.subr.bf16.mxu0 %v156_v4 }
   0x5   :  { %159 = vmatpush3.bf16.msra.mxu0 %v156_v4 }
   0x6   :  { %161 = vmatprep.subr.bf16.mxu0 %v160_v7 }
   0x8   :  { %v22_v9 = vld [vmem:[#allocation2 + $0x8] sm:$0xff] }
   0x9   :  { %163 = vmatpush3.bf16.msra.mxu0 %v160_v7  ;;  %v21_v10 = vld [vmem:[#allocation2] sm:$0xff] }
   0xc   :  { %154 = vmatmul.mubr.msk.f32.vlgmr.msra.gmra.mrb[0].mxu0 %vm29_vm0, %v24_v8 }
  0xdf   :  { %v155_v11 = vpop.f32.mrb[0].mxu0 }
  0xe0   :  { %v112_v12 = vadd.f32 %v155_v11, %v22_v9  ;;  %v102_v13 = vpop.f32.mrb[1].mxu0 }
  0xe1   :  { %v111_v14 = vadd.f32 %v102_v13, %v21_v10 }
  0xe2   :  { %115 = vst.msk [vmem:[#allocation2 + $0x8] sm:$0xff] %vm18_vm1, %v112_v12 }
  0xe3   :  { %114 = vst.msk [vmem:[#allocation2] sm:$0xff] %vm18_vm1, %v111_v14 }
  0xe9   :  { %v120_v16 = vld [vmem:[#allocation2 + $0x8] sm:$0xff] }
  0xea   :  { %v129_v17 = vadd.f32 %v138_v15, %v120_v16  ;;  %v119_v18 = vld [vmem:[#allocation2] sm:$0xff] }
  0xeb   :  { %v128_v19 = vadd.f32 %v138_v15, %v119_v18 }
  0xec   :  { %131 = vst.msk [vmem:[%s224_s3 + $0x8] sm:$0xff] %vm18_vm1, %v129_v17 }
  0xed   :  { %130 = vst.msk [vmem:[%s224_s3] sm:$0xff] %vm18_vm1, %v128_v19 }

// kernel: xmoe_decoder_layer.10
= control target key start
LH: loop header
LB: loop body
LE: loop exit
PB: predicated region body
PF: predicated region fallthrough
CT: control target
= control target key end

     0   :  { %vm21_vm0 = vcmask 261120   ;;  %v171_v3 = vmov 0.0   ;;  %s238_s1 = inlined_call_operand.vmem [shape: f32[32,32], index: 1, kind: input, shape index: {}]   ;;  %s239_s0 = inlined_call_operand.vmem [shape: f32[16,32], index: 0, kind: input, shape index: {}]   ;;  %s240_s2 = inlined_call_operand.vmem [shape: f32[1,32], index: 2, kind: input, shape index: {}]   ;;  %s241_s3 = inlined_call_operand.vmem [shape: f32[16,32], index: 3, kind: input, shape index: {}]   ;;  %s242_s4 = inlined_call_operand.vmem [shape: f32[16,32], index: 4, kind: output, shape index: {}]  }
   0x1   :  { %v28_v0 = vld [vmem:[%s238_s1] sm:$0xff]  ;;  %v29_v1 = vld [vmem:[%s238_s1 + $0x8] sm:$0xff]  ;;  %v30_v2 = vld [vmem:[%s238_s1 + $0x10] sm:$0xff]  ;;  %23 = vst.msk [vmem:[#allocation2 + $0x8] sm:$0xff] %vm21_vm0, %v171_v3 }
   0x2   :  { %22 = vst.msk [vmem:[#allocation2] sm:$0xff] %vm21_vm0, %v171_v3  ;;  %v162_v4 = vpack.c.bf16 %v29_v1, %v28_v0  ;;  %v31_v5 = vld [vmem:[%s238_s1 + $0x18] sm:$0xff]  ;;  %v26_v6 = vld [vmem:[%s239_s0] sm:$0xff]  ;;  %v27_v8 = vld [vmem:[%s239_s0 + $0x8] sm:$0xff] }
   0x3   :  { %v166_v7 = vpack.c.bf16 %v31_v5, %v30_v2  ;;  %159 = vmatprep.mubr.msk.f32.mxu0 %vm21_vm0, %v26_v6  ;;  %v144_v15 = vld [vmem:[%s240_s2] ss:$0 sm:$0xff]  ;;  %v133_v17 = vld [vmem:[%s241_s3 + $0x8] sm:$0xff] }
   0x4   :  { %163 = vmatprep.subr.bf16.mxu0 %v162_v4  ;;  %v132_v20 = vld [vmem:[%s241_s3] sm:$0xff] }
   0x5   :  { %165 = vmatpush3.bf16.msra.mxu0 %v162_v4 }
   0x6   :  { %167 = vmatprep.subr.bf16.mxu0 %v166_v7 }
   0x8   :  { %v25_v9 = vld [vmem:[#allocation2 + $0x8] sm:$0xff] }
   0x9   :  { %169 = vmatpush3.bf16.msra.mxu0 %v166_v7  ;;  %v24_v10 = vld [vmem:[#allocation2] sm:$0xff] }
   0xc   :  { %160 = vmatmul.mubr.msk.f32.vlgmr.msra.gmra.mrb[0].mxu0 %vm21_vm0, %v27_v8 }
  0xdf   :  { %v161_v11 = vpop.f32.mrb[0].mxu0 }
  0xe0   :  { %v115_v12 = vadd.f32 %v161_v11, %v25_v9  ;;  %v105_v13 = vpop.f32.mrb[1].mxu0 }
  0xe1   :  { %v114_v14 = vadd.f32 %v105_v13, %v24_v10 }
  0xe2   :  { %117 = vst.msk [vmem:[#allocation2 + $0x8] sm:$0xff] %vm21_vm0, %v115_v12 }
  0xe3   :  { %116 = vst.msk [vmem:[#allocation2] sm:$0xff] %vm21_vm0, %v114_v14 }
  0xe9   :  { %v122_v16 = vld [vmem:[#allocation2 + $0x8] sm:$0xff] }
  0xea   :  { %v131_v18 = vadd.f32 %v144_v15, %v122_v16  ;;  %v121_v19 = vld [vmem:[#allocation2] sm:$0xff] }
  0xeb   :  { %v130_v21 = vadd.f32 %v144_v15, %v121_v19 }
  0xec   :  { %v135_v22 = vadd.f32 %v133_v17, %v131_v18 }
  0xed   :  { %v134_v23 = vadd.f32 %v132_v20, %v130_v21 }
  0xee   :  { %137 = vst.msk [vmem:[%s242_s4 + $0x8] sm:$0xff] %vm21_vm0, %v135_v22 }
  0xef   :  { %136 = vst.msk [vmem:[%s242_s4] sm:$0xff] %vm21_vm0, %v134_v23 }

// kernel: xmoe_decoder_layer.13
= control target key start
LH: loop header
LB: loop body
LE: loop exit
PB: predicated region body
PF: predicated region fallthrough
CT: control target
= control target key end

     0   :  { %vm34_vm0 = vcmask 523264   ;;  %vm19_vm1 = vcmask 261120   ;;  %v229_v5 = vmov 0.0   ;;  %s306_s0 = inlined_call_operand.vmem [shape: f32[16,64], index: 0, kind: input, shape index: {}]   ;;  %s307_s1 = inlined_call_operand.vmem [shape: f32[64,32], index: 1, kind: input, shape index: {}]   ;;  %s308_s2 = inlined_call_operand.vmem [shape: f32[1,32], index: 2, kind: input, shape index: {}]   ;;  %s309_s3 = inlined_call_operand.hbm [shape: f32[16,32], index: 3, kind: output, shape index: {}]  }
   0x1   :  { %v26_v0 = vld [vmem:[%s307_s1] sm:$0xff]  ;;  %v27_v1 = vld [vmem:[%s307_s1 + $0x8] sm:$0xff]  ;;  %v28_v2 = vld [vmem:[%s307_s1 + $0x10] sm:$0xff]  ;;  %21 = vst.msk [vmem:[#allocation2 + $0x8] sm:$0xff] %vm19_vm1, %v229_v5 }
   0x2   :  { %v185_v3 = vpack.c.bf16 %v27_v1, %v26_v0  ;;  %v29_v4 = vld [vmem:[%s307_s1 + $0x18] sm:$0xff]  ;;  %20 = vst.msk [vmem:[#allocation2] sm:$0xff] %vm19_vm1, %v229_v5  ;;  %v30_v7 = vld [vmem:[%s307_s1 + $0x20] sm:$0xff]  ;;  %v31_v8 = vld [vmem:[%s307_s1 + $0x28] sm:$0xff] }
   0x3   :  { %v189_v6 = vpack.c.bf16 %v29_v4, %v28_v2  ;;  %v24_v9 = vld [vmem:[%s306_s0] sm:$0xff] }
   0x4   :  { %186 = vmatprep.subr.bf16.mxu0 %v185_v3  ;;  %182 = vmatprep.mubr.msk.f32.mxu0 %vm34_vm0, %v24_v9 }
   0x5   :  { %8 = vsyncpa [#allocation4], 0  ;;  %188 = vmatpush3.bf16.msra.mxu0 %v185_v3  ;;  %v193_v10 = vpack.c.bf16 %v31_v8, %v30_v7  ;;  %v32_v11 = vld [vmem:[%s307_s1 + $0x30] sm:$0xff]  ;;  %v33_v12 = vld [vmem:[%s307_s1 + $0x38] sm:$0xff]  ;;  %s230_s6 = smov [#allocation3]  }
   0x6   :  { %190 = vmatprep.subr.bf16.mxu0 %v189_v6  ;;  %v197_v13 = vpack.c.bf16 %v33_v12, %v32_v11  ;;  %v25_v14 = vld [vmem:[%s306_s0 + $0x8] sm:$0xff]  ;;  %v155_v21 = vld [vmem:[%s308_s2] ss:$0 sm:$0xff]  ;;  %s142_s7 = sshll.u32 %s230_s6, 4  ;;  %s143_s7 = int_to_ptr.vmem [resolvable:$true] %s142_s7 }
   0x7   :  { %s205_s0 = scalar_lea.vmem %s143_s7, 256  ;;  %p210_p1 = scmp.lt.s32.totalorder %s143_s7, %s143_s7 }
   0x8   :  { %v23_v15 = vld [vmem:[#allocation2 + $0x8] sm:$0xff]  ;;  %p206_p0 = scmp.ne.s32.totalorder %s143_s7, %s205_s0  ;;  %p211_p2 = scmp.lt.s32.totalorder %s205_s0, %s205_s0 }
   0x9   :  { %192 = vmatpush3.bf16.msra.mxu0 %v189_v6  ;;  %v22_v16 = vld [vmem:[#allocation2] sm:$0xff] }
   0xa   :  { %194 = vmatprep.subr.bf16.mxu0 %v193_v10  ;;  %p212_p3 = por %p211_p2, %p210_p1 }
   0xc   :  { %p213_p4 = pnand %p212_p3, %p206_p0 }
   0xd   :  { %196 = vmatpush3.bf16.msra.mxu0 %v193_v10 }
   0xe   :  { %198 = vmatprep.subr.bf16.mxu0 %v197_v13 }
  0x11   :  { %200 = vmatpush3.bf16.msra.mxu0 %v197_v13 }
  0x14   :  { %183 = vmatmul.mubr.msk.f32.vlgmr.msra.gmra.mrb[0].mxu0 %vm34_vm0, %v25_v14 }
  0xe7   :  { %v184_v17 = vpop.f32.mrb[0].mxu0 }
  0xe8   :  { %v117_v18 = vadd.f32 %v184_v17, %v23_v15  ;;  %v107_v19 = vpop.f32.mrb[1].mxu0 }
  0xe9   :  { %v116_v20 = vadd.f32 %v107_v19, %v22_v16 }
  0xea   :  { %120 = vst.msk [vmem:[#allocation2 + $0x8] sm:$0xff] %vm19_vm1, %v117_v18 }
  0xeb   :  { %119 = vst.msk [vmem:[#allocation2] sm:$0xff] %vm19_vm1, %v116_v20 }
  0xf1   :  { %v125_v22 = vld [vmem:[#allocation2 + $0x8] sm:$0xff] }
  0xf2   :  { %v124_v23 = vld [vmem:[#allocation2] sm:$0xff]  ;;  %v134_v24 = vadd.f32 %v155_v21, %v125_v22 }
  0xf3   :  { %v133_v25 = vadd.f32 %v155_v21, %v124_v23 }
  0xf4   :  { %136 = vst.msk [vmem:[#allocation3 + $0x8] sm:$0xff] %vm19_vm1, %v134_v24 }
  0xf5   :  { %135 = vst.msk [vmem:[#allocation3] sm:$0xff] %vm19_vm1, %v133_v25 }
  0xf6   :  { %216 = shalt.err (!%p213_p4)
}
  0xf7   :  { %s217_s9 = scalar_lea.hbm %s309_s3, 256 }
  0xf8   :  { %p218_p5 = scmp.ne.s32.totalorder %s309_s3, %s217_s9  ;;  %p221_p6 = scmp.lt.u32.totalorder %s217_s9, %s309_s3 }
  0xfa   :  { %p223_p7 = pnand %p221_p6, %p218_p5 }
  0xfc   :  { %226 = shalt.err (!%p223_p7)
}
  0xfd   :  { %s231_s14 = smov 128   ;;  %s232_s15 = smov 8  }
  0xfe   :  { %148 = dma.vmem_to_hbm [thread:$0]  %s143_s7, 256, %s309_s3, [#allocation4], %s231_s14, %s231_s14, %s232_s15  }
  0xff   :  { %227 = dma.done.wait [#allocation4], 256  }
 0x100   :  { %228 = vsyncadd [#allocation4], 4294967040 }
 0x101   :  { %152 = vsyncpa [#allocation4], 1 }

// kernel: xmoe_decoder_layer.12
= control target key start
LH: loop header
LB: loop body
LE: loop exit
PB: predicated region body
PF: predicated region fallthrough
CT: control target
= control target key end

     0   :  { %vm29_vm0 = vcmask 261120   ;;  %vm18_vm1 = vcmask 523264   ;;  %v227_v3 = vmov 0.0   ;;  %s283_s1 = inlined_call_operand.vmem [shape: f32[32,64], index: 1, kind: input, shape index: {}]   ;;  %s284_s0 = inlined_call_operand.vmem [shape: f32[16,32], index: 0, kind: input, shape index: {}]   ;;  %s285_s2 = inlined_call_operand.vmem [shape: f32[1,64], index: 2, kind: input, shape index: {}]   ;;  %s286_s3 = inlined_call_operand.vmem [shape: f32[16,64], index: 3, kind: output, shape index: {}]  }
   0x1   :  { %v25_v0 = vld [vmem:[%s283_s1] sm:$0xff]  ;;  %v26_v1 = vld [vmem:[%s283_s1 + $0x8] sm:$0xff]  ;;  %v27_v2 = vld [vmem:[%s283_s1 + $0x10] sm:$0xff]  ;;  %20 = vst.msk [vmem:[#allocation2 + $0x8] sm:$0xff] %vm18_vm1, %v227_v3 }
   0x2   :  { %19 = vst.msk [vmem:[#allocation2] sm:$0xff] %vm18_vm1, %v227_v3  ;;  %v210_v4 = vpack.c.bf16 %v26_v1, %v25_v0  ;;  %v28_v5 = vld [vmem:[%s283_s1 + $0x18] sm:$0xff]  ;;  %v23_v6 = vld [vmem:[%s284_s0] sm:$0xff]  ;;  %v24_v8 = vld [vmem:[%s284_s0 + $0x8] sm:$0xff] }
   0x3   :  { %v214_v7 = vpack.c.bf16 %v28_v5, %v27_v2  ;;  %207 = vmatprep.mubr.msk.f32.mxu0 %vm29_vm0, %v23_v6  ;;  %v192_v15 = vld [vmem:[%s285_s2] ss:$0 sm:$0xff] }
   0x4   :  { %211 = vmatprep.subr.bf16.mxu0 %v210_v4 }
   0x5   :  { %213 = vmatpush3.bf16.msra.mxu0 %v210_v4 }
   0x6   :  { %215 = vmatprep.subr.bf16.mxu0 %v214_v7 }
   0x8   :  { %v22_v9 = vld [vmem:[#allocation2 + $0x8] sm:$0xff] }
   0x9   :  { %217 = vmatpush3.bf16.msra.mxu0 %v214_v7  ;;  %v21_v10 = vld [vmem:[#allocation2] sm:$0xff] }
   0xc   :  { %208 = vmatmul.mubr.msk.f32.vlgmr.msra.gmra.mrb[0].mxu0 %vm29_vm0, %v24_v8 }
  0xdf   :  { %v209_v11 = vpop.f32.mrb[0].mxu0 }
  0xe0   :  { %v112_v12 = vadd.f32 %v209_v11, %v22_v9  ;;  %v102_v13 = vpop.f32.mrb[1].mxu0 }
  0xe1   :  { %v111_v14 = vadd.f32 %v102_v13, %v21_v10 }
  0xe2   :  { %115 = vst.msk [vmem:[#allocation2 + $0x8] sm:$0xff] %vm18_vm1, %v112_v12 }
  0xe3   :  { %114 = vst.msk [vmem:[#allocation2] sm:$0xff] %vm18_vm1, %v111_v14 }
  0xe9   :  { %v120_v16 = vld [vmem:[#allocation2 + $0x8] sm:$0xff] }
  0xea   :  { %v129_v17 = vadd.f32 %v192_v15, %v120_v16  ;;  %v119_v18 = vld [vmem:[#allocation2] sm:$0xff] }
  0xeb   :  { %v128_v19 = vadd.f32 %v192_v15, %v119_v18 }
  0xec   :  { %v131_v20 = vmul.f32 0.70710677, %v129_v17  ;;  %v179_v63 = vmul.f32 0.5, %v129_v17 }
  0xed   :  { %v130_v21 = vmul.f32 0.70710677, %v128_v19  ;;  %v178_v2 = vmul.f32 0.5, %v128_v19 }
  0xee   :  { %v133_v22 = vand.u32 2147483647, %v131_v20  ;;  %vm173_vm2 = vcmp.ge.f32.partialorder %v131_v20, 0.0 }
  0xef   :  { %v132_v23 = vand.u32 2147483647, %v130_v21  ;;  %vm172_vm3 = vcmp.ge.f32.partialorder %v130_v21, 0.0 }
  0xf0   :  { %v135_v24 = vmul.f32 0.3275911, %v133_v22  ;;  %v161_v28 = vsub.f32 0.0, %v133_v22 }
  0xf1   :  { %v134_v25 = vmul.f32 0.3275911, %v132_v23  ;;  %v160_v29 = vsub.f32 0.0, %v132_v23 }
  0xf2   :  { %v137_v26 = vadd.f32 1.0, %v135_v24  ;;  %v163_v31 = vmul.f32 %v161_v28, %v133_v22 }
  0xf3   :  { %v136_v27 = vadd.f32 1.0, %v134_v25  ;;  %v162_v34 = vmul.f32 %v160_v29, %v132_v23 }
  0xf4   :  { %219 = vrcp.f32 %v137_v26  ;;  %v166_v37 = vmul.f32 1.442695, %v163_v31 }
  0xf5   :  { %221 = vrcp.f32 %v136_v27  ;;  %v164_v40 = vmul.f32 1.442695, %v162_v34 }
  0xf6   :  { %223 = vpow2.f32 %v166_v37 }
  0xf7   :  { %225 = vpow2.f32 %v164_v40 }
  0xfe   :  { %v220_v30 = vpop.eup %219 }
  0xff   :  { %v222_v32 = vpop.eup %221  ;;  %v143_v33 = vmul.f32 1.0614054, %v220_v30 }
 0x100   :  { %v142_v35 = vmul.f32 1.0614054, %v222_v32  ;;  %v224_v53 = vpop.eup %223 }
 0x101   :  { %v145_v36 = vadd.f32 -1.4531521, %v143_v33  ;;  %v226_v55 = vpop.eup %225 }
 0x102   :  { %v144_v38 = vadd.f32 -1.4531521, %v142_v35 }
 0x103   :  { %v147_v39 = vmul.f32 %v220_v30, %v145_v36 }
 0x104   :  { %v146_v41 = vmul.f32 %v222_v32, %v144_v38 }
 0x105   :  { %v149_v42 = vadd.f32 1.4214138, %v147_v39 }
 0x106   :  { %v148_v43 = vadd.f32 1.4214138, %v146_v41 }
 0x107   :  { %v151_v44 = vmul.f32 %v220_v30, %v149_v42 }
 0x108   :  { %v150_v45 = vmul.f32 %v222_v32, %v148_v43 }
 0x109   :  { %v153_v46 = vadd.f32 -0.28449672, %v151_v44 }
 0x10a   :  { %v152_v47 = vadd.f32 -0.28449672, %v150_v45 }
 0x10b   :  { %v155_v48 = vmul.f32 %v220_v30, %v153_v46 }
 0x10c   :  { %v154_v49 = vmul.f32 %v222_v32, %v152_v47 }
 0x10d   :  { %v157_v50 = vadd.f32 0.2548296, %v155_v48 }
 0x10e   :  { %v156_v51 = vadd.f32 0.2548296, %v154_v49 }
 0x10f   :  { %v159_v52 = vmul.f32 %v220_v30, %v157_v50 }
 0x110   :  { %v158_v54 = vmul.f32 %v222_v32, %v156_v51 }
 0x111   :  { %v169_v56 = vmul.f32 %v224_v53, %v159_v52 }
 0x112   :  { %v168_v57 = vmul.f32 %v226_v55, %v158_v54 }
 0x113   :  { %v171_v58 = vsub.f32 1.0, %v169_v56 }
 0x114   :  { %v170_v59 = vsub.f32 1.0, %v168_v57 }
 0x115   :  { %v175_v60 = vsub.f32 0.0, %v171_v58 }
 0x116   :  { %v174_v61 = vsub.f32 0.0, %v170_v59 }
 0x117   :  { %v177_v62 = vsel %vm173_vm2, %v171_v58, %v175_v60 }
 0x118   :  { %v181_v0 = vadd.f32 1.0, %v177_v62  ;;  %v176_v1 = vsel %vm172_vm3, %v170_v59, %v174_v61 }
 0x119   :  { %v180_v3 = vadd.f32 1.0, %v176_v1 }
 0x11a   :  { %v183_v4 = vmul.f32 %v181_v0, %v179_v63 }
 0x11b   :  { %v182_v5 = vmul.f32 %v180_v3, %v178_v2 }
 0x11c   :  { %185 = vst.msk [vmem:[%s286_s3 + $0x8] sm:$0xff] %vm18_vm1, %v183_v4 }
 0x11d   :  { %184 = vst.msk [vmem:[%s286_s3] sm:$0xff] %vm18_vm1, %v182_v5 }

// kernel: xmoe_decoder_layer.9
= control target key start
LH: loop header
LB: loop body
LE: loop exit
PB: predicated region body
PF: predicated region fallthrough
CT: control target
= control target key end

     0   :  { %vm217_vm0 = vcmask 64512   ;;  %v9047_v0 = vmov 0.0   ;;  %vm7340_vm1 = vmmov 0   ;;  %vm2682_vm2 = vcmask 9216   ;;  %s9043_s1 = inlined_call_operand.vmem [shape: f32[3,32,2,8], index: 1, kind: input, shape index: {}, may-alias: {0,1,2}]   ;;  %s9044_s0 = inlined_call_operand.vmem [shape: f32[3,32,2,8], index: 0, kind: input, shape index: {}, may-alias: {0,1,2}]   ;;  %s9045_s2 = inlined_call_operand.vmem [shape: f32[3,32,2,8], index: 2, kind: input, shape index: {}, may-alias: {0,1,2}]   ;;  %s9046_s3 = inlined_call_operand.vmem [shape: f32[32,2,8], index: 3, kind: output, shape index: {}]  }
   0x1   :  { %6821 = vmatprep.subr.mxu0 %v9047_v0  ;;  %56 = vst [vmem:[#allocation3] sm:$0x3] %v9047_v0  ;;  %57 = vst [vmem:[#allocation3 + $0x2] sm:$0x3] %v9047_v0  ;;  %v6501_v1 = vld [vmem:[%s9043_s1 + $0x40] sm:$0x3]  ;;  %6823 = vmatprep.mubr.msk.f32.mxu0 %vm7340_vm1, %v9047_v0 }
   0x2   :  { %58 = vst [vmem:[#allocation3 + $0x4] sm:$0x3] %v9047_v0  ;;  %59 = vst [vmem:[#allocation3 + $0x6] sm:$0x3] %v9047_v0  ;;  %v121_v2 = vld [vmem:[%s9044_s0] sm:$0x3]  ;;  %6822 = vmatpush3.xpose.msk.msra.mxu0 %vm217_vm0, %v6501_v1  ;;  %6826 = vmatprep.subr.mxu1 %v9047_v0 }
   0x3   :  { %60 = vst [vmem:[#allocation3 + $0x8] sm:$0x3] %v9047_v0  ;;  %61 = vst [vmem:[#allocation3 + $0xa] sm:$0x3] %v9047_v0  ;;  %v6502_v3 = vld [vmem:[%s9043_s1 + $0x42] sm:$0x3]  ;;  %6831 = vmatprep.subr.mxu0 %v9047_v0  ;;  %6828 = vmatprep.mubr.msk.f32.mxu1 %vm7340_vm1, %v9047_v0 }
   0x4   :  { %62 = vst [vmem:[#allocation3 + $0xc] sm:$0x3] %v9047_v0  ;;  %63 = vst [vmem:[#allocation3 + $0xe] sm:$0x3] %v9047_v0  ;;  %v153_v4 = vmul.f32 0.35355338, %v121_v2  ;;  %6827 = vmatpush3.xpose.msk.msra.mxu1 %vm217_vm0, %v6502_v3 }
   0x5   :  { %64 = vst [vmem:[#allocation3 + $0x10] sm:$0x3] %v9047_v0  ;;  %65 = vst [vmem:[#allocation3 + $0x12] sm:$0x3] %v9047_v0  ;;  %v122_v5 = vld [vmem:[%s9044_s0 + $0x2] sm:$0x3]  ;;  %6836 = vmatprep.subr.mxu1 %v9047_v0 }
   0x6   :  { %66 = vst [vmem:[#allocation3 + $0x14] sm:$0x3] %v9047_v0  ;;  %67 = vst [vmem:[#allocation3 + $0x16] sm:$0x3] %v9047_v0  ;;  %v6503_v6 = vld [vmem:[%s9043_s1 + $0x44] sm:$0x3]  ;;  %6824 = vmatmul.mubr.msk.f32.vlgmr.msra.gmra.mrb[0].mxu0 %vm217_vm0, %v153_v4 }
   0x7   :  { %68 = vst [vmem:[#allocation3 + $0x18] sm:$0x3] %v9047_v0  ;;  %69 = vst [vmem:[#allocation3 + $0x1a] sm:$0x3] %v9047_v0  ;;  %v154_v7 = vmul.f32 0.35355338, %v122_v5  ;;  %6832 = vmatpush3.xpose.msk.msra.mxu0 %vm217_vm0, %v6503_v6  ;;  %6833 = vmatprep.mubr.msk.f32.mxu0 %vm7340_vm1, %v9047_v0 }
   0x8   :  { %70 = vst [vmem:[#allocation3 + $0x1c] sm:$0x3] %v9047_v0  ;;  %71 = vst [vmem:[#allocation3 + $0x1e] sm:$0x3] %v9047_v0  ;;  %v123_v8 = vld [vmem:[%s9044_s0 + $0x4] sm:$0x3]  ;;  %6841 = vmatprep.subr.mxu0 %v9047_v0 }
   0x9   :  { %72 = vst [vmem:[#allocation3 + $0x20] sm:$0x3] %v9047_v0  ;;  %73 = vst [vmem:[#allocation3 + $0x22] sm:$0x3] %v9047_v0  ;;  %v6504_v9 = vld [vmem:[%s9043_s1 + $0x46] sm:$0x3]  ;;  %6829 = vmatmul.mubr.msk.f32.vlgmr.msra.gmra.mrb[0].mxu1 %vm217_vm0, %v154_v7 }
   0xa   :  { %74 = vst [vmem:[#allocation3 + $0x24] sm:$0x3] %v9047_v0  ;;  %75 = vst [vmem:[#allocation3 + $0x26] sm:$0x3] %v9047_v0  ;;  %v124_v10 = vld [vmem:[%s9044_s0 + $0x6] sm:$0x3]  ;;  %6837 = vmatpush3.xpose.msk.msra.mxu1 %vm217_vm0, %v6504_v9  ;;  %6838 = vmatprep.mubr.msk.f32.mxu1 %vm7340_vm1, %v9047_v0 }
   0xb   :  { %76 = vst [vmem:[#allocation3 + $0x28] sm:$0x3] %v9047_v0  ;;  %77 = vst [vmem:[#allocation3 + $0x2a] sm:$0x3] %v9047_v0  ;;  %v155_v11 = vmul.f32 0.35355338, %v123_v8  ;;  %6846 = vmatprep.subr.mxu1 %v9047_v0 }
   0xc   :  { %78 = vst [vmem:[#allocation3 + $0x2c] sm:$0x3] %v9047_v0  ;;  %79 = vst [vmem:[#allocation3 + $0x2e] sm:$0x3] %v9047_v0  ;;  %v156_v12 = vmul.f32 0.35355338, %v124_v10 }
   0xd   :  { %80 = vst [vmem:[#allocation3 + $0x30] sm:$0x3] %v9047_v0  ;;  %81 = vst [vmem:[#allocation3 + $0x32] sm:$0x3] %v9047_v0  ;;  %v125_v13 = vld [vmem:[%s9044_s0 + $0x8] sm:$0x3]  ;;  %6834 = vmatmul.mubr.msk.f32.vlgmr.msra.gmra.mrb[2].mxu0 %vm217_vm0, %v155_v11 }
   0xe   :  { %82 = vst [vmem:[#allocation3 + $0x34] sm:$0x3] %v9047_v0  ;;  %83 = vst [vmem:[#allocation3 + $0x36] sm:$0x3] %v9047_v0  ;;  %v6505_v14 = vld [vmem:[%s9043_s1 + $0x48] sm:$0x3]  ;;  %6839 = vmatmul.mubr.msk.f32.vlgmr.msra.gmra.mrb[2].mxu1 %vm217_vm0, %v156_v12  ;;  %6843 = vmatprep.mubr.msk.f32.mxu0 %vm7340_vm1, %v9047_v0 }
   0xf   :  { %84 = vst [vmem:[#allocation3 + $0x38] sm:$0x3] %v9047_v0  ;;  %85 = vst [vmem:[#allocation3 + $0x3a] sm:$0x3] %v9047_v0  ;;  %v126_v15 = vld [vmem:[%s9044_s0 + $0xa] sm:$0x3]  ;;  %6842 = vmatpush3.xpose.msk.msra.mxu0 %vm217_vm0, %v6505_v14  ;;  %6848 = vmatprep.mubr.msk.f32.mxu1 %vm7340_vm1, %v9047_v0 }
  0x10   :  { %86 = vst [vmem:[#allocation3 + $0x3c] sm:$0x3] %v9047_v0  ;;  %87 = vst [vmem:[#allocation3 + $0x3e] sm:$0x3] %v9047_v0  ;;  %v6506_v16 = vld [vmem:[%s9043_s1 + $0x4a] sm:$0x3]  ;;  %6851 = vmatprep.subr.mxu0 %v9047_v0 }
  0x11   :  { %v157_v17 = vmul.f32 0.35355338, %v125_v13  ;;  %v158_v18 = vmul.f32 0.35355338, %v126_v15  ;;  %v127_v19 = vld [vmem:[%s9044_s0 + $0xc] sm:$0x3]  ;;  %6847 = vmatpush3.xpose.msk.msra.mxu1 %vm217_vm0, %v6506_v16 }
  0x12   :  { %v128_v20 = vld [vmem:[%s9044_s0 + $0xe] sm:$0x3]  ;;  %v6507_v21 = vld [vmem:[%s9043_s1 + $0x4c] sm:$0x3]  ;;  %6856 = vmatprep.subr.mxu1 %v9047_v0  ;;  %v159_v23 = vmul.f32 0.35355338, %v127_v19 }
  0x13   :  { %v6508_v22 = vld [vmem:[%s9043_s1 + $0x4e] sm:$0x3]  ;;  %6844 = vmatmul.mubr.msk.f32.vlgmr.msra.gmra.mrb[4].mxu0 %vm217_vm0, %v157_v17  ;;  %v160_v24 = vmul.f32 0.35355338, %v128_v20  ;;  %v129_v25 = vld [vmem:[%s9044_s0 + $0x10] sm:$0x3] }
  0x14   :  { %6849 = vmatmul.mubr.msk.f32.vlgmr.msra.gmra.mrb[4].mxu1 %vm217_vm0, %v158_v18  ;;  %6852 = vmatpush3.xpose.msk.msra.mxu0 %vm217_vm0, %v6507_v21  ;;  %v130_v26 = vld [vmem:[%s9044_s0 + $0x12] sm:$0x3]  ;;  %v6509_v27 = vld [vmem:[%s9043_s1 + $0x50] sm:$0x3]  ;;  %v161_v29 = vmul.f32 0.35355338, %v129_v25 }
  0x15   :  { %6857 = vmatpush3.xpose.msk.msra.mxu1 %vm217_vm0, %v6508_v22  ;;  %6858 = vmatprep.mubr.msk.f32.mxu1 %vm7340_vm1, %v9047_v0  ;;  %v6510_v28 = vld [vmem:[%s9043_s1 + $0x52] sm:$0x3]  ;;  %v162_v30 = vmul.f32 0.35355338, %v130_v26  ;;  %v131_v31 = vld [vmem:[%s9044_s0 + $0x14] sm:$0x3] }
  0x16   :  { %6866 = vmatprep.subr.mxu1 %v9047_v0  ;;  %6853 = vmatprep.mubr.msk.f32.mxu0 %vm7340_vm1, %v9047_v0  ;;  %v132_v32 = vld [vmem:[%s9044_s0 + $0x16] sm:$0x3]  ;;  %v6511_v33 = vld [vmem:[%s9043_s1 + $0x54] sm:$0x3]  ;;  %v163_v35 = vmul.f32 0.35355338, %v131_v31 }
  0x17   :  { %6854 = vmatmul.mubr.msk.f32.vlgmr.msra.gmra.mrb[6].mxu0 %vm217_vm0, %v159_v23  ;;  %6861 = vmatprep.subr.mxu0 %v9047_v0  ;;  %v6512_v34 = vld [vmem:[%s9043_s1 + $0x56] sm:$0x3]  ;;  %v164_v36 = vmul.f32 0.35355338, %v132_v32  ;;  %v133_v37 = vld [vmem:[%s9044_s0 + $0x18] sm:$0x3] }
  0x18   :  { %6859 = vmatmul.mubr.msk.f32.vlgmr.msra.gmra.mrb[6].mxu1 %vm217_vm0, %v160_v24  ;;  %6862 = vmatpush3.xpose.msk.msra.mxu0 %vm217_vm0, %v6509_v27  ;;  %v134_v38 = vld [vmem:[%s9044_s0 + $0x1a] sm:$0x3]  ;;  %v6513_v39 = vld [vmem:[%s9043_s1 + $0x58] sm:$0x3]  ;;  %v165_v41 = vmul.f32 0.35355338, %v133_v37 }
  0x19   :  { %6867 = vmatpush3.xpose.msk.msra.mxu1 %vm217_vm0, %v6510_v28  ;;  %6868 = vmatprep.mubr.msk.f32.mxu1 %vm7340_vm1, %v9047_v0  ;;  %v6514_v40 = vld [vmem:[%s9043_s1 + $0x5a] sm:$0x3]  ;;  %v166_v42 = vmul.f32 0.35355338, %v134_v38  ;;  %v135_v43 = vld [vmem:[%s9044_s0 + $0x1c] sm:$0x3] }
  0x1a   :  { %6876 = vmatprep.subr.mxu1 %v9047_v0  ;;  %6863 = vmatprep.mubr.msk.f32.mxu0 %vm7340_vm1, %v9047_v0  ;;  %v136_v44 = vld [vmem:[%s9044_s0 + $0x1e] sm:$0x3]  ;;  %v6515_v45 = vld [vmem:[%s9043_s1 + $0x5c] sm:$0x3]  ;;  %v167_v47 = vmul.f32 0.35355338, %v135_v43 }
  0x1b   :  { %6864 = vmatmul.mubr.msk.f32.vlgmr.msra.gmra.mrb[8].mxu0 %vm217_vm0, %v161_v29  ;;  %6871 = vmatprep.subr.mxu0 %v9047_v0  ;;  %v6516_v46 = vld [vmem:[%s9043_s1 + $0x5e] sm:$0x3]  ;;  %v168_v48 = vmul.f32 0.35355338, %v136_v44  ;;  %v137_v49 = vld [vmem:[%s9044_s0 + $0x20] sm:$0x3] }
  0x1c   :  { %6869 = vmatmul.mubr.msk.f32.vlgmr.msra.gmra.mrb[8].mxu1 %vm217_vm0, %v162_v30  ;;  %6872 = vmatpush3.xpose.msk.msra.mxu0 %vm217_vm0, %v6511_v33  ;;  %v138_v50 = vld [vmem:[%s9044_s0 + $0x22] sm:$0x3]  ;;  %v6517_v51 = vld [vmem:[%s9043_s1 + $0x60] sm:$0x3]  ;;  %v169_v53 = vmul.f32 0.35355338, %v137_v49 }
  0x1d   :  { %6877 = vmatpush3.xpose.msk.msra.mxu1 %vm217_vm0, %v6512_v34  ;;  %6878 = vmatprep.mubr.msk.f32.mxu1 %vm7340_vm1, %v9047_v0  ;;  %v6518_v52 = vld [vmem:[%s9043_s1 + $0x62] sm:$0x3]  ;;  %v170_v54 = vmul.f32 0.35355338, %v138_v50  ;;  %v139_v55 = vld [vmem:[%s9044_s0 + $0x24] sm:$0x3] }
  0x1e   :  { %6886 = vmatprep.subr.mxu1 %v9047_v0  ;;  %6873 = vmatprep.mubr.msk.f32.mxu0 %vm7340_vm1, %v9047_v0  ;;  %v140_v56 = vld [vmem:[%s9044_s0 + $0x26] sm:$0x3]  ;;  %v6519_v57 = vld [vmem:[%s9043_s1 + $0x64] sm:$0x3]  ;;  %v171_v59 = vmul.f32 0.35355338, %v139_v55 }
  0x1f   :  { %6874 = vmatmul.mubr.msk.f32.vlgmr.msra.gmra.mrb[10].mxu0 %vm217_vm0, %v163_v35  ;;  %6881 = vmatprep.subr.mxu0 %v9047_v0  ;;  %v6520_v58 = vld [vmem:[%s9043_s1 + $0x66] sm:$0x3]  ;;  %v172_v60 = vmul.f32 0.35355338, %v140_v56  ;;  %v141_v61 = vld [vmem:[%s9044_s0 + $0x28] sm:$0x3] }
  0x20   :  { %6879 = vmatmul.mubr.msk.f32.vlgmr.msra.gmra.mrb[10].mxu1 %vm217_vm0, %v164_v36  ;;  %6882 = vmatpush3.xpose.msk.msra.mxu0 %vm217_vm0, %v6513_v39  ;;  %v142_v62 = vld [vmem:[%s9044_s0 + $0x2a] sm:$0x3]  ;;  %v6521_v63 = vld [vmem:[%s9043_s1 + $0x68] sm:$0x3]  ;;  %v173_v2 = vmul.f32 0.35355338, %v141_v61 }
  0x21   :  { %6887 = vmatpush3.xpose.msk.msra.mxu1 %vm217_vm0, %v6514_v40  ;;  %6888 = vmatprep.mubr.msk.f32.mxu1 %vm7340_vm1, %v9047_v0  ;;  %v6522_v1 = vld [vmem:[%s9043_s1 + $0x6a] sm:$0x3]  ;;  %v174_v3 = vmul.f32 0.35355338, %v142_v62  ;;  %v143_v4 = vld [vmem:[%s9044_s0 + $0x2c] sm:$0x3] }
  0x22   :  { %6896 = vmatprep.subr.mxu1 %v9047_v0  ;;  %6883 = vmatprep.mubr.msk.f32.mxu0 %vm7340_vm1, %v9047_v0  ;;  %v144_v5 = vld [vmem:[%s9044_s0 + $0x2e] sm:$0x3]  ;;  %v6523_v6 = vld [vmem:[%s9043_s1 + $0x6c] sm:$0x3]  ;;  %v175_v8 = vmul.f32 0.35355338, %v143_v4 }
  0x23   :  { %6884 = vmatmul.mubr.msk.f32.vlgmr.msra.gmra.mrb[12].mxu0 %vm217_vm0, %v165_v41  ;;  %6891 = vmatprep.subr.mxu0 %v9047_v0  ;;  %v6524_v7 = vld [vmem:[%s9043_s1 + $0x6e] sm:$0x3]  ;;  %v176_v9 = vmul.f32 0.35355338, %v144_v5  ;;  %v145_v10 = vld [vmem:[%s9044_s0 + $0x30] sm:$0x3] }
  0x24   :  { %6889 = vmatmul.mubr.msk.f32.vlgmr.msra.gmra.mrb[12].mxu1 %vm217_vm0, %v166_v42  ;;  %6892 = vmatpush3.xpose.msk.msra.mxu0 %vm217_vm0, %v6515_v45  ;;  %v146_v11 = vld [vmem:[%s9044_s0 + $0x32] sm:$0x3]  ;;  %v6525_v12 = vld [vmem:[%s9043_s1 + $0x70] sm:$0x3]  ;;  %v177_v14 = vmul.f32 0.35355338, %v145_v10 }
  0x25   :  { %6897 = vmatpush3.xpose.msk.msra.mxu1 %vm217_vm0, %v6516_v46  ;;  %6898 = vmatprep.mubr.msk.f32.mxu1 %vm7340_vm1, %v9047_v0  ;;  %v6526_v13 = vld [vmem:[%s9043_s1 + $0x72] sm:$0x3]  ;;  %v178_v15 = vmul.f32 0.35355338, %v146_v11  ;;  %v147_v16 = vld [vmem:[%s9044_s0 + $0x34] sm:$0x3] }
  0x26   :  { %6906 = vmatprep.subr.mxu1 %v9047_v0  ;;  %6893 = vmatprep.mubr.msk.f32.mxu0 %vm7340_vm1, %v9047_v0  ;;  %v148_v17 = vld [vmem:[%s9044_s0 + $0x36] sm:$0x3]  ;;  %v6527_v18 = vld [vmem:[%s9043_s1 + $0x74] sm:$0x3]  ;;  %v179_v20 = vmul.f32 0.35355338, %v147_v16 }
  0x27   :  { %6894 = vmatmul.mubr.msk.f32.vlgmr.msra.gmra.mrb[14].mxu0 %vm217_vm0, %v167_v47  ;;  %6901 = vmatprep.subr.mxu0 %v9047_v0  ;;  %v6528_v19 = vld [vmem:[%s9043_s1 + $0x76] sm:$0x3]  ;;  %v180_v21 = vmul.f32 0.35355338, %v148_v17  ;;  %v149_v22 = vld [vmem:[%s9044_s0 + $0x38] sm:$0x3] }
  0x28   :  { %6899 = vmatmul.mubr.msk.f32.vlgmr.msra.gmra.mrb[14].mxu1 %vm217_vm0, %v168_v48  ;;  %6902 = vmatpush3.xpose.msk.msra.mxu0 %vm217_vm0, %v6517_v51  ;;  %v150_v23 = vld [vmem:[%s9044_s0 + $0x3a] sm:$0x3]  ;;  %v6529_v24 = vld [vmem:[%s9043_s1 + $0x78] sm:$0x3]  ;;  %v181_v26 = vmul.f32 0.35355338, %v149_v22 }
  0x29   :  { %6907 = vmatpush3.xpose.msk.msra.mxu1 %vm217_vm0, %v6518_v52  ;;  %6908 = vmatprep.mubr.msk.f32.mxu1 %vm7340_vm1, %v9047_v0  ;;  %v6530_v25 = vld [vmem:[%s9043_s1 + $0x7a] sm:$0x3]  ;;  %v182_v27 = vmul.f32 0.35355338, %v150_v23  ;;  %v151_v28 = vld [vmem:[%s9044_s0 + $0x3c] sm:$0x3] }
  0x2a   :  { %6916 = vmatprep.subr.mxu1 %v9047_v0  ;;  %6903 = vmatprep.mubr.msk.f32.mxu0 %vm7340_vm1, %v9047_v0  ;;  %v152_v29 = vld [vmem:[%s9044_s0 + $0x3e] sm:$0x3]  ;;  %v6531_v30 = vld [vmem:[%s9043_s1 + $0x7c] sm:$0x3]  ;;  %v183_v32 = vmul.f32 0.35355338, %v151_v28 }
  0x2b   :  { %6904 = vmatmul.mubr.msk.f32.vlgmr.msra.gmra.mrb[16].mxu0 %vm217_vm0, %v169_v53  ;;  %6911 = vmatprep.subr.mxu0 %v9047_v0  ;;  %v6532_v31 = vld [vmem:[%s9043_s1 + $0x7e] sm:$0x3]  ;;  %v184_v33 = vmul.f32 0.35355338, %v152_v29  ;;  %v7341_v34 = vmov -inf   ;;  %vm3647_vm3 = vcmask 1041408  }
  0x2c   :  { %6909 = vmatmul.mubr.msk.f32.vlgmr.msra.gmra.mrb[16].mxu1 %vm217_vm0, %v170_v54  ;;  %6912 = vmatpush3.xpose.msk.msra.mxu0 %vm217_vm0, %v6519_v57  ;;  %24 = vst [vmem:[#allocation2] sm:$0x3] %v7341_v34  ;;  %25 = vst [vmem:[#allocation2 + $0x2] sm:$0x3] %v7341_v34  ;;  %vm88_vm4 = vcmask 58368   ;;  %vm3643_vm5 = vcmask 15360  }
  0x2d   :  { %6917 = vmatpush3.xpose.msk.msra.mxu1 %vm217_vm0, %v6520_v58  ;;  %6918 = vmatprep.mubr.msk.f32.mxu1 %vm7340_vm1, %v9047_v0  ;;  %26 = vst [vmem:[#allocation2 + $0x4] sm:$0x3] %v7341_v34  ;;  %27 = vst [vmem:[#allocation2 + $0x6] sm:$0x3] %v7341_v34 }
  0x2e   :  { %6926 = vmatprep.subr.mxu1 %v9047_v0  ;;  %6913 = vmatprep.mubr.msk.f32.mxu0 %vm7340_vm1, %v9047_v0  ;;  %28 = vst [vmem:[#allocation2 + $0x8] sm:$0x3] %v7341_v34  ;;  %29 = vst [vmem:[#allocation2 + $0xa] sm:$0x3] %v7341_v34 }
  0x2f   :  { %6914 = vmatmul.mubr.msk.f32.vlgmr.msra.gmra.mrb[18].mxu0 %vm217_vm0, %v171_v59  ;;  %6921 = vmatprep.subr.mxu0 %v9047_v0  ;;  %30 = vst [vmem:[#allocation2 + $0xc] sm:$0x3] %v7341_v34  ;;  %31 = vst [vmem:[#allocation2 + $0xe] sm:$0x3] %v7341_v34 }
  0x30   :  { %6919 = vmatmul.mubr.msk.f32.vlgmr.msra.gmra.mrb[18].mxu1 %vm217_vm0, %v172_v60  ;;  %6922 = vmatpush3.xpose.msk.msra.mxu0 %vm217_vm0, %v6521_v63  ;;  %32 = vst [vmem:[#allocation2 + $0x10] sm:$0x3] %v7341_v34  ;;  %33 = vst [vmem:[#allocation2 + $0x12] sm:$0x3] %v7341_v34  ;;  %v7342_v63 = vmov 0  }
  0x31   :  { %6927 = vmatpush3.xpose.msk.msra.mxu1 %vm217_vm0, %v6522_v1  ;;  %6928 = vmatprep.mubr.msk.f32.mxu1 %vm7340_vm1, %v9047_v0  ;;  %34 = vst [vmem:[#allocation2 + $0x14] sm:$0x3] %v7341_v34  ;;  %35 = vst [vmem:[#allocation2 + $0x16] sm:$0x3] %v7341_v34 }
  0x32   :  { %6936 = vmatprep.subr.mxu1 %v9047_v0  ;;  %6923 = vmatprep.mubr.msk.f32.mxu0 %vm7340_vm1, %v9047_v0  ;;  %36 = vst [vmem:[#allocation2 + $0x18] sm:$0x3] %v7341_v34  ;;  %37 = vst [vmem:[#allocation2 + $0x1a] sm:$0x3] %v7341_v34 }
  0x33   :  { %6924 = vmatmul.mubr.msk.f32.vlgmr.msra.gmra.mrb[20].mxu0 %vm217_vm0, %v173_v2  ;;  %6931 = vmatprep.subr.mxu0 %v9047_v0  ;;  %38 = vst [vmem:[#allocation2 + $0x1c] sm:$0x3] %v7341_v34  ;;  %39 = vst [vmem:[#allocation2 + $0x1e] sm:$0x3] %v7341_v34 }
  0x34   :  { %6929 = vmatmul.mubr.msk.f32.vlgmr.msra.gmra.mrb[20].mxu1 %vm217_vm0, %v174_v3  ;;  %6932 = vmatpush3.xpose.msk.msra.mxu0 %vm217_vm0, %v6523_v6  ;;  %40 = vst [vmem:[#allocation2 + $0x20] sm:$0x3] %v7341_v34  ;;  %41 = vst [vmem:[#allocation2 + $0x22] sm:$0x3] %v7341_v34 }
  0x35   :  { %6937 = vmatpush3.xpose.msk.msra.mxu1 %vm217_vm0, %v6524_v7  ;;  %6938 = vmatprep.mubr.msk.f32.mxu1 %vm7340_vm1, %v9047_v0  ;;  %42 = vst [vmem:[#allocation2 + $0x24] sm:$0x3] %v7341_v34  ;;  %43 = vst [vmem:[#allocation2 + $0x26] sm:$0x3] %v7341_v34 }
  0x36   :  { %6946 = vmatprep.subr.mxu1 %v9047_v0  ;;  %6933 = vmatprep.mubr.msk.f32.mxu0 %vm7340_vm1, %v9047_v0  ;;  %44 = vst [vmem:[#allocation2 + $0x28] sm:$0x3] %v7341_v34  ;;  %45 = vst [vmem:[#allocation2 + $0x2a] sm:$0x3] %v7341_v34 }
  0x37   :  { %6934 = vmatmul.mubr.msk.f32.vlgmr.msra.gmra.mrb[22].mxu0 %vm217_vm0, %v175_v8  ;;  %6941 = vmatprep.subr.mxu0 %v9047_v0  ;;  %46 = vst [vmem:[#allocation2 + $0x2c] sm:$0x3] %v7341_v34  ;;  %47 = vst [vmem:[#allocation2 + $0x2e] sm:$0x3] %v7341_v34 }
  0x38   :  { %6939 = vmatmul.mubr.msk.f32.vlgmr.msra.gmra.mrb[22].mxu1 %vm217_vm0, %v176_v9  ;;  %6942 = vmatpush3.xpose.msk.msra.mxu0 %vm217_vm0, %v6525_v12  ;;  %48 = vst [vmem:[#allocation2 + $0x30] sm:$0x3] %v7341_v34  ;;  %49 = vst [vmem:[#allocation2 + $0x32] sm:$0x3] %v7341_v34 }
  0x39   :  { %6947 = vmatpush3.xpose.msk.msra.mxu1 %vm217_vm0, %v6526_v13  ;;  %6948 = vmatprep.mubr.msk.f32.mxu1 %vm7340_vm1, %v9047_v0  ;;  %50 = vst [vmem:[#allocation2 + $0x34] sm:$0x3] %v7341_v34  ;;  %51 = vst [vmem:[#allocation2 + $0x36] sm:$0x3] %v7341_v34 }
  0x3a   :  { %6956 = vmatprep.subr.mxu1 %v9047_v0  ;;  %6943 = vmatprep.mubr.msk.f32.mxu0 %vm7340_vm1, %v9047_v0  ;;  %52 = vst [vmem:[#allocation2 + $0x38] sm:$0x3] %v7341_v34  ;;  %53 = vst [vmem:[#allocation2 + $0x3a] sm:$0x3] %v7341_v34 }
  0x3b   :  { %6944 = vmatmul.mubr.msk.f32.vlgmr.msra.gmra.mrb[24].mxu0 %vm217_vm0, %v177_v14  ;;  %6951 = vmatprep.subr.mxu0 %v9047_v0  ;;  %54 = vst [vmem:[#allocation2 + $0x3c] sm:$0x3] %v7341_v34  ;;  %55 = vst [vmem:[#allocation2 + $0x3e] sm:$0x3] %v7341_v34 }
  0x3c   :  { %6949 = vmatmul.mubr.msk.f32.vlgmr.msra.gmra.mrb[24].mxu1 %vm217_vm0, %v178_v15  ;;  %6952 = vmatpush3.xpose.msk.msra.mxu0 %vm217_vm0, %v6527_v18 }
  0x3d   :  { %6957 = vmatpush3.xpose.msk.msra.mxu1 %vm217_vm0, %v6528_v19  ;;  %6958 = vmatprep.mubr.msk.f32.mxu1 %vm7340_vm1, %v9047_v0 }
  0x3e   :  { %6966 = vmatprep.subr.mxu1 %v9047_v0  ;;  %6953 = vmatprep.mubr.msk.f32.mxu0 %vm7340_vm1, %v9047_v0 }
  0x3f   :  { %6954 = vmatmul.mubr.msk.f32.vlgmr.msra.gmra.mrb[26].mxu0 %vm217_vm0, %v179_v20  ;;  %6961 = vmatprep.subr.mxu0 %v9047_v0 }
  0x40   :  { %6959 = vmatmul.mubr.msk.f32.vlgmr.msra.gmra.mrb[26].mxu1 %vm217_vm0, %v180_v21  ;;  %6962 = vmatpush3.xpose.msk.msra.mxu0 %vm217_vm0, %v6529_v24 }
  0x41   :  { %6967 = vmatpush3.xpose.msk.msra.mxu1 %vm217_vm0, %v6530_v25  ;;  %6968 = vmatprep.mubr.msk.f32.mxu1 %vm7340_vm1, %v9047_v0 }
  0x42   :  { %6976 = vmatprep.subr.mxu1 %v9047_v0  ;;  %6963 = vmatprep.mubr.msk.f32.mxu0 %vm7340_vm1, %v9047_v0 }
  0x43   :  { %6964 = vmatmul.mubr.msk.f32.vlgmr.msra.gmra.mrb[28].mxu0 %vm217_vm0, %v181_v26  ;;  %6971 = vmatprep.subr.mxu0 %v9047_v0 }
  0x44   :  { %6969 = vmatmul.mubr.msk.f32.vlgmr.msra.gmra.mrb[28].mxu1 %vm217_vm0, %v182_v27  ;;  %6972 = vmatpush3.xpose.msk.msra.mxu0 %vm217_vm0, %v6531_v30 }
  0x45   :  { %6977 = vmatpush3.xpose.msk.msra.mxu1 %vm217_vm0, %v6532_v31  ;;  %6978 = vmatprep.mubr.msk.f32.mxu1 %vm7340_vm1, %v9047_v0 }
  0x46   :  { %6973 = vmatprep.mubr.msk.f32.mxu0 %vm7340_vm1, %v9047_v0  ;;  %6981 = vmatprep.subr.mxu0 %v9047_v0 }
  0x47   :  { %6974 = vmatmul.mubr.msk.f32.vlgmr.msra.gmra.mrb[30].mxu0 %vm217_vm0, %v183_v32  ;;  %6986 = vmatprep.subr.mxu1 %v9047_v0 }
  0x48   :  { %6979 = vmatmul.mubr.msk.f32.vlgmr.msra.gmra.mrb[30].mxu1 %vm217_vm0, %v184_v33  ;;  %6983 = vmatprep.mubr.msk.f32.mxu0 %vm7340_vm1, %v9047_v0 }
  0x49   :  { %6988 = vmatprep.mubr.msk.f32.mxu1 %vm7340_vm1, %v9047_v0  ;;  %7145 = vset.pattern.permute.xlu0 %v7342_v63 }
  0x4a   :  { %7146 = vset.pattern.permute.xlu1 %v7342_v63 }
  0xd9   :  { %v7753_v35 = vpop.f32.mrb[0].mxu0 }
  0xda   :  { %9083 = vst [vmem:[#allocation5_spill] sm:$0xff] %v7753_v35  ;;  %v6825_v36 = vpop.f32.mrb[1].mxu0  ;;  %v2683_v37 = vsel %vm2682_vm2, %v7753_v35, -inf  ;;  %v8118_v35 = vld [vmem:[#allocation2 + $0x3c] sm:$0x3] }
  0xdb   :  { %2684 = vmax.xlane.f32.xlu0 %v2683_v37 }
  0xdc   :  { %v7757_v38 = vpop.f32.mrb[0].mxu1 }
  0xdd   :  { %9084 = vst [vmem:[#allocation6_spill] sm:$0xff] %v7757_v38  ;;  %v6830_v39 = vpop.f32.mrb[1].mxu1  ;;  %v2686_v40 = vsel %vm2682_vm2, %v7757_v38, -inf  ;;  %v8116_v38 = vld [vmem:[#allocation2 + $0x3a] sm:$0x3] }
  0xdf   :  { %2687 = vmax.xlane.f32.xlu0 %v2686_v40 }
  0xe0   :  { %v7761_v41 = vpop.f32.mrb[2].mxu0 }
  0xe1   :  { %9085 = vst [vmem:[#allocation7_spill] sm:$0xff] %v7761_v41  ;;  %v2689_v42 = vsel %vm2682_vm2, %v7761_v41, -inf  ;;  %v6835_v43 = vpop.f32.mrb[3].mxu0  ;;  %v7765_v44 = vpop.f32.mrb[2].mxu1 }
  0xe2   :  { %9086 = vst [vmem:[#allocation8_spill] sm:$0xff] %v7765_v44  ;;  %2690 = vmax.xlane.f32.xlu1 %v2689_v42  ;;  %v6840_v45 = vpop.f32.mrb[3].mxu1  ;;  %v2692_v46 = vsel %vm2682_vm2, %v7765_v44, -inf }
  0xe6   :  { %v7769_v47 = vpop.f32.mrb[4].mxu0  ;;  %2693 = vmax.xlane.f32.xlu1 %v2692_v46 }
  0xe7   :  { %9087 = vst [vmem:[#allocation9_spill] sm:$0xff] %v7769_v47  ;;  %v7771_v48 = vpop.f32.mrb[4].mxu1  ;;  %v6845_v49 = vpop.f32.mrb[5].mxu0  ;;  %v2695_v50 = vsel %vm2682_vm2, %v7769_v47, -inf  ;;  %v8100_v47 = vld [vmem:[#allocation2 + $0x38] sm:$0x3] }
  0xe8   :  { %9088 = vst [vmem:[#allocation10_spill] sm:$0xff] %v7771_v48  ;;  %v6850_v51 = vpop.f32.mrb[5].mxu1  ;;  %2696 = vmax.xlane.f32.xlu0 %v2695_v50  ;;  %v2698_v52 = vsel %vm2682_vm2, %v7771_v48, -inf  ;;  %v8098_v48 = vld [vmem:[#allocation2 + $0x36] sm:$0x3] }
  0xea   :  { %v7777_v53 = vpop.f32.mrb[6].mxu0  ;;  %2699 = vmax.xlane.f32.xlu1 %v2698_v52 }
  0xeb   :  { %9089 = vst [vmem:[#allocation11_spill] sm:$0xff] %v7777_v53  ;;  %v7779_v54 = vpop.f32.mrb[6].mxu1  ;;  %v6855_v55 = vpop.f32.mrb[7].mxu0  ;;  %v2701_v56 = vsel %vm2682_vm2, %v7777_v53, -inf }
  0xec   :  { %9090 = vst [vmem:[#allocation12_spill] sm:$0xff] %v7779_v54  ;;  %v6860_v57 = vpop.f32.mrb[7].mxu1  ;;  %2702 = vmax.xlane.f32.xlu0 %v2701_v56  ;;  %v2704_v58 = vsel %vm2682_vm2, %v7779_v54, -inf }
  0xee   :  { %v7785_v59 = vpop.f32.mrb[8].mxu0  ;;  %2705 = vmax.xlane.f32.xlu1 %v2704_v58 }
  0xef   :  { %9091 = vst [vmem:[#allocation13_spill] sm:$0xff] %v7785_v59  ;;  %v7787_v60 = vpop.f32.mrb[8].mxu1  ;;  %v6865_v61 = vpop.f32.mrb[9].mxu0  ;;  %v2707_v62 = vsel %vm2682_vm2, %v7785_v59, -inf  ;;  %v8080_v59 = vld [vmem:[#allocation2 + $0x32] sm:$0x3] }
  0xf0   :  { %9092 = vst [vmem:[#allocation14_spill] sm:$0xff] %v7787_v60  ;;  %v6870_v1 = vpop.f32.mrb[9].mxu1  ;;  %2708 = vmax.xlane.f32.xlu0 %v2707_v62  ;;  %v2710_v2 = vsel %vm2682_vm2, %v7787_v60, -inf }
  0xf2   :  { %v7793_v3 = vpop.f32.mrb[10].mxu0  ;;  %2711 = vmax.xlane.f32.xlu1 %v2710_v2 }
  0xf3   :  { %9093 = vst [vmem:[#allocation15_spill] sm:$0xff] %v7793_v3  ;;  %v7795_v4 = vpop.f32.mrb[10].mxu1  ;;  %v6875_v5 = vpop.f32.mrb[11].mxu0  ;;  %v2713_v6 = vsel %vm2682_vm2, %v7793_v3, -inf }
  0xf4   :  { %9094 = vst [vmem:[#allocation16_spill] sm:$0xff] %v7795_v4  ;;  %v6880_v7 = vpop.f32.mrb[11].mxu1  ;;  %2714 = vmax.xlane.f32.xlu0 %v2713_v6  ;;  %v2716_v8 = vsel %vm2682_vm2, %v7795_v4, -inf  ;;  %v8082_v4 = vld [vmem:[#allocation2 + $0x34] sm:$0x3] }
  0xf5   :  { %9116 = vst [vmem:[#allocation38_spill] sm:$0xff] %v8082_v4 }
  0xf6   :  { %v7801_v9 = vpop.f32.mrb[12].mxu0  ;;  %2717 = vmax.xlane.f32.xlu1 %v2716_v8 }
  0xf7   :  { %9095 = vst [vmem:[#allocation17_spill] sm:$0xff] %v7801_v9  ;;  %v7803_v10 = vpop.f32.mrb[12].mxu1  ;;  %v6885_v11 = vpop.f32.mrb[13].mxu0  ;;  %v2719_v12 = vsel %vm2682_vm2, %v7801_v9, -inf  ;;  %v8066_v9 = vld [vmem:[#allocation2 + $0x30] sm:$0x3] }
  0xf8   :  { %9096 = vst [vmem:[#allocation18_spill] sm:$0xff] %v7803_v10  ;;  %v6890_v13 = vpop.f32.mrb[13].mxu1  ;;  %2720 = vmax.xlane.f32.xlu0 %v2719_v12  ;;  %v2722_v14 = vsel %vm2682_vm2, %v7803_v10, -inf  ;;  %9115 = vst [vmem:[#allocation37_spill] sm:$0xff] %v8066_v9 }
  0xfa   :  { %v7809_v15 = vpop.f32.mrb[14].mxu0  ;;  %2723 = vmax.xlane.f32.xlu1 %v2722_v14 }
  0xfb   :  { %9097 = vst [vmem:[#allocation19_spill] sm:$0xff] %v7809_v15  ;;  %v7811_v16 = vpop.f32.mrb[14].mxu1  ;;  %v6895_v17 = vpop.f32.mrb[15].mxu0  ;;  %v2725_v18 = vsel %vm2682_vm2, %v7809_v15, -inf }
  0xfc   :  { %9098 = vst [vmem:[#allocation20_spill] sm:$0xff] %v7811_v16  ;;  %v6900_v19 = vpop.f32.mrb[15].mxu1  ;;  %2726 = vmax.xlane.f32.xlu0 %v2725_v18  ;;  %v2728_v20 = vsel %vm2682_vm2, %v7811_v16, -inf  ;;  %v8064_v16 = vld [vmem:[#allocation2 + $0x2e] sm:$0x3] }
  0xfe   :  { %v7817_v21 = vpop.f32.mrb[16].mxu0  ;;  %2729 = vmax.xlane.f32.xlu1 %v2728_v20 }
  0xff   :  { %9099 = vst [vmem:[#allocation21_spill] sm:$0xff] %v7817_v21  ;;  %v7819_v22 = vpop.f32.mrb[16].mxu1  ;;  %v6905_v23 = vpop.f32.mrb[17].mxu0  ;;  %v2731_v24 = vsel %vm2682_vm2, %v7817_v21, -inf  ;;  %v8050_v21 = vld [vmem:[#allocation2 + $0x2c] sm:$0x3] }
 0x100   :  { %9100 = vst [vmem:[#allocation22_spill] sm:$0xff] %v7819_v22  ;;  %v6910_v25 = vpop.f32.mrb[17].mxu1  ;;  %2732 = vmax.xlane.f32.xlu0 %v2731_v24  ;;  %v2734_v26 = vsel %vm2682_vm2, %v7819_v22, -inf  ;;  %v7881_v24 = vld [vmem:[#allocation2] sm:$0x3] }
 0x102   :  { %v7825_v27 = vpop.f32.mrb[18].mxu0  ;;  %2735 = vmax.xlane.f32.xlu1 %v2734_v26 }
 0x103   :  { %9101 = vst [vmem:[#allocation23_spill] sm:$0xff] %v7825_v27  ;;  %v7827_v28 = vpop.f32.mrb[18].mxu1  ;;  %v6915_v29 = vpop.f32.mrb[19].mxu0  ;;  %v2737_v30 = vsel %vm2682_vm2, %v7825_v27, -inf }
 0x104   :  { %9102 = vst [vmem:[#allocation24_spill] sm:$0xff] %v7827_v28  ;;  %v6920_v31 = vpop.f32.mrb[19].mxu1  ;;  %2738 = vmax.xlane.f32.xlu0 %v2737_v30  ;;  %v2740_v32 = vsel %vm2682_vm2, %v7827_v28, -inf  ;;  %v7886_v29 = vld [vmem:[#allocation2 + $0x2] sm:$0x3] }
 0x105   :  { %v7888_v30 = vld [vmem:[#allocation2 + $0x4] sm:$0x3]  ;;  %v8048_v28 = vld [vmem:[#allocation2 + $0x2a] sm:$0x3] }
 0x106   :  { %v7833_v33 = vpop.f32.mrb[20].mxu0  ;;  %2741 = vmax.xlane.f32.xlu1 %v2740_v32 }
 0x107   :  { %9103 = vst [vmem:[#allocation25_spill] sm:$0xff] %v7833_v33  ;;  %v7835_v34 = vpop.f32.mrb[20].mxu1  ;;  %v6925_v36 = vpop.f32.mrb[21].mxu0  ;;  %v2743_v37 = vsel %vm2682_vm2, %v7833_v33, -inf }
 0x108   :  { %9104 = vst [vmem:[#allocation26_spill] sm:$0xff] %v7835_v34  ;;  %v6930_v39 = vpop.f32.mrb[21].mxu1  ;;  %2744 = vmax.xlane.f32.xlu0 %v2743_v37  ;;  %v2746_v40 = vsel %vm2682_vm2, %v7835_v34, -inf  ;;  %v8034_v34 = vld [vmem:[#allocation2 + $0x28] sm:$0x3] }
 0x109   :  { %v7898_v39 = vld [vmem:[#allocation2 + $0x6] sm:$0x3] }
 0x10a   :  { %v7841_v42 = vpop.f32.mrb[22].mxu0  ;;  %2747 = vmax.xlane.f32.xlu1 %v2746_v40  ;;  %v7900_v40 = vld [vmem:[#allocation2 + $0x8] sm:$0x3] }
 0x10b   :  { %9105 = vst [vmem:[#allocation27_spill] sm:$0xff] %v7841_v42  ;;  %v7843_v43 = vpop.f32.mrb[22].mxu1  ;;  %v6935_v45 = vpop.f32.mrb[23].mxu0  ;;  %v2749_v46 = vsel %vm2682_vm2, %v7841_v42, -inf  ;;  %v8032_v42 = vld [vmem:[#allocation2 + $0x26] sm:$0x3] }
 0x10c   :  { %9106 = vst [vmem:[#allocation28_spill] sm:$0xff] %v7843_v43  ;;  %v6940_v49 = vpop.f32.mrb[23].mxu1  ;;  %2750 = vmax.xlane.f32.xlu0 %v2749_v46  ;;  %v2752_v50 = vsel %vm2682_vm2, %v7843_v43, -inf  ;;  %v7986_v45 = vld [vmem:[#allocation2 + $0x1c] sm:$0x3] }
 0x10e   :  { %v7849_v51 = vpop.f32.mrb[24].mxu0  ;;  %2753 = vmax.xlane.f32.xlu1 %v2752_v50 }
 0x10f   :  { %9107 = vst [vmem:[#allocation29_spill] sm:$0xff] %v7849_v51  ;;  %v7851_v52 = vpop.f32.mrb[24].mxu1  ;;  %v6945_v55 = vpop.f32.mrb[25].mxu0  ;;  %v2755_v56 = vsel %vm2682_vm2, %v7849_v51, -inf }
 0x110   :  { %9108 = vst [vmem:[#allocation30_spill] sm:$0xff] %v7851_v52  ;;  %v6950_v57 = vpop.f32.mrb[25].mxu1  ;;  %2756 = vmax.xlane.f32.xlu0 %v2755_v56  ;;  %v2758_v58 = vsel %vm2682_vm2, %v7851_v52, -inf  ;;  %v7913_v56 = vld [vmem:[#allocation2 + $0xa] sm:$0x3] }
 0x111   :  { %v7915_v57 = vld [vmem:[#allocation2 + $0xc] sm:$0x3]  ;;  %v8018_v52 = vld [vmem:[#allocation2 + $0x24] sm:$0x3] }
 0x112   :  { %v7857_v61 = vpop.f32.mrb[26].mxu0  ;;  %2759 = vmax.xlane.f32.xlu1 %v2758_v58  ;;  %v7984_v58 = vld [vmem:[#allocation2 + $0x1a] sm:$0x3] }
 0x113   :  { %9109 = vst [vmem:[#allocation31_spill] sm:$0xff] %v7857_v61  ;;  %v7859_v62 = vpop.f32.mrb[26].mxu1  ;;  %v6955_v63 = vpop.f32.mrb[27].mxu0  ;;  %v2761_v1 = vsel %vm2682_vm2, %v7857_v61, -inf  ;;  %v8016_v61 = vld [vmem:[#allocation2 + $0x22] sm:$0x3] }
 0x114   :  { %9110 = vst [vmem:[#allocation32_spill] sm:$0xff] %v7859_v62  ;;  %v6960_v2 = vpop.f32.mrb[27].mxu1  ;;  %2762 = vmax.xlane.f32.xlu0 %v2761_v1  ;;  %v2764_v5 = vsel %vm2682_vm2, %v7859_v62, -inf }
 0x116   :  { %v7865_v6 = vpop.f32.mrb[28].mxu0  ;;  %2765 = vmax.xlane.f32.xlu1 %v2764_v5 }
 0x117   :  { %9111 = vst [vmem:[#allocation33_spill] sm:$0xff] %v7865_v6  ;;  %v7867_v7 = vpop.f32.mrb[28].mxu1  ;;  %v6965_v8 = vpop.f32.mrb[29].mxu0  ;;  %v2767_v11 = vsel %vm2682_vm2, %v7865_v6, -inf }
 0x118   :  { %9112 = vst [vmem:[#allocation34_spill] sm:$0xff] %v7867_v7  ;;  %v6970_v12 = vpop.f32.mrb[29].mxu1  ;;  %2768 = vmax.xlane.f32.xlu0 %v2767_v11  ;;  %v2770_v13 = vsel %vm2682_vm2, %v7867_v7, -inf  ;;  %v7928_v8 = vld [vmem:[#allocation2 + $0xe] sm:$0x3] }
 0x119   :  { %v7930_v11 = vld [vmem:[#allocation2 + $0x10] sm:$0x3]  ;;  %v8002_v7 = vld [vmem:[#allocation2 + $0x20] sm:$0x3] }
 0x11a   :  { %v7873_v14 = vpop.f32.mrb[30].mxu0  ;;  %2771 = vmax.xlane.f32.xlu1 %v2770_v13 }
 0x11b   :  { %9113 = vst [vmem:[#allocation35_spill] sm:$0xff] %v7873_v14  ;;  %v7875_v17 = vpop.f32.mrb[30].mxu1  ;;  %v6975_v18 = vpop.f32.mrb[31].mxu0  ;;  %v2773_v19 = vsel %vm2682_vm2, %v7873_v14, -inf  ;;  %v8000_v14 = vld [vmem:[#allocation2 + $0x1e] sm:$0x3] }
 0x11c   :  { %9114 = vst [vmem:[#allocation36_spill] sm:$0xff] %v7875_v17  ;;  %2774 = vmax.xlane.f32.xlu0 %v2773_v19  ;;  %v6980_v20 = vpop.f32.mrb[31].mxu1  ;;  %v2776_v23 = vsel %vm2682_vm2, %v7875_v17, -inf  ;;  %v6597_v19 = vld [vmem:[%s9045_s2 + $0x80] sm:$0x3] }
 0x11d   :  { %6982 = vmatpush3.msk.msra.mxu0 %vm3647_vm3, %v6597_v19  ;;  %v7969_v19 = vld [vmem:[#allocation2 + $0x18] sm:$0x3] }
 0x11e   :  { %2777 = vmax.xlane.f32.xlu1 %v2776_v23  ;;  %6991 = vmatprep.subr.mxu0 %v9047_v0 }
 0x168   :  { %v2685_v25 = vpop.xlane.xlu0 %2684 }
 0x169   :  { %v7884_v26 = vmax.f32 %v7881_v24, %v2685_v25  ;;  %v7947_v25 = vld [vmem:[#allocation2 + $0x12] sm:$0x3] }
 0x16b   :  { %6142 = vst [vmem:[#allocation2] sm:$0x3] %v7884_v26  ;;  %2909 = vperm.xlu0 %7145, %v7884_v26  }
 0x16c   :  { %v2688_v31 = vpop.xlane.xlu0 %2687 }
 0x16d   :  { %v7893_v36 = vmax.f32 %v7886_v29, %v2688_v31  ;;  %v7949_v31 = vld [vmem:[#allocation2 + $0x14] sm:$0x3] }
 0x16f   :  { %v2691_v32 = vpop.xlane.xlu1 %2690  ;;  %6143 = vst [vmem:[#allocation2 + $0x2] sm:$0x3] %v7893_v36  ;;  %2914 = vperm.xlu1 %7146, %v7893_v36  }
 0x170   :  { %v7896_v37 = vmax.f32 %v7888_v30, %v2691_v32 }
 0x172   :  { %6144 = vst [vmem:[#allocation2 + $0x4] sm:$0x3] %v7896_v37 }
 0x173   :  { %v2694_v46 = vpop.xlane.xlu1 %2693  ;;  %2919 = vperm.xlu1 %7146, %v7896_v37  }
 0x174   :  { %v7908_v50 = vmax.f32 %v7898_v39, %v2694_v46 }
 0x175   :  { %v2697_v49 = vpop.xlane.xlu0 %2696 }
 0x176   :  { %v7911_v55 = vmax.f32 %v7900_v40, %v2697_v49  ;;  %6145 = vst [vmem:[#allocation2 + $0x6] sm:$0x3] %v7908_v50 }
 0x177   :  { %v2700_v63 = vpop.xlane.xlu1 %2699  ;;  %2924 = vperm.xlu1 %7146, %v7908_v50  }
 0x178   :  { %6146 = vst [vmem:[#allocation2 + $0x8] sm:$0x3] %v7911_v55  ;;  %v7923_v2 = vmax.f32 %v7913_v56, %v2700_v63  ;;  %v6598_v63 = vld [vmem:[%s9045_s2 + $0x82] sm:$0x3] }
 0x179   :  { %v2703_v1 = vpop.xlane.xlu0 %2702  ;;  %6987 = vmatpush3.msk.msra.mxu1 %vm3647_vm3, %v6598_v63 }
 0x17a   :  { %v7926_v5 = vmax.f32 %v7915_v57, %v2703_v1  ;;  %6147 = vst [vmem:[#allocation2 + $0xa] sm:$0x3] %v7923_v2  ;;  %6996 = vmatprep.subr.mxu1 %v9047_v0 }
 0x17b   :  { %v2706_v13 = vpop.xlane.xlu1 %2705  ;;  %2929 = vperm.xlu1 %7146, %v7911_v55  }
 0x17c   :  { %6148 = vst [vmem:[#allocation2 + $0xc] sm:$0x3] %v7926_v5  ;;  %v7941_v20 = vmax.f32 %v7928_v8, %v2706_v13 }
 0x17d   :  { %v2709_v18 = vpop.xlane.xlu0 %2708 }
 0x17e   :  { %v7944_v23 = vmax.f32 %v7930_v11, %v2709_v18  ;;  %6149 = vst [vmem:[#allocation2 + $0xe] sm:$0x3] %v7941_v20  ;;  %v7967_v18 = vld [vmem:[#allocation2 + $0x16] sm:$0x3] }
 0x17f   :  { %v2712_v46 = vpop.xlane.xlu1 %2711  ;;  %2934 = vperm.xlu1 %7146, %v7923_v2  }
 0x180   :  { %6150 = vst [vmem:[#allocation2 + $0x10] sm:$0x3] %v7944_v23  ;;  %v7961_v1 = vmax.f32 %v7947_v25, %v2712_v46 }
 0x181   :  { %v2715_v49 = vpop.xlane.xlu0 %2714 }
 0x182   :  { %v7964_v13 = vmax.f32 %v7949_v31, %v2715_v49  ;;  %6151 = vst [vmem:[#allocation2 + $0x12] sm:$0x3] %v7961_v1  ;;  %2954 = vperm.xlu0 %7145, %v7961_v1  }
 0x183   :  { %v2718_v49 = vpop.xlane.xlu1 %2717  ;;  %2939 = vperm.xlu1 %7146, %v7926_v5  }
 0x184   :  { %6152 = vst [vmem:[#allocation2 + $0x14] sm:$0x3] %v7964_v13  ;;  %v7979_v63 = vmax.f32 %v7967_v18, %v2718_v49 }
 0x185   :  { %v2721_v32 = vpop.xlane.xlu0 %2720 }
 0x186   :  { %v7982_v12 = vmax.f32 %v7969_v19, %v2721_v32  ;;  %6153 = vst [vmem:[#allocation2 + $0x16] sm:$0x3] %v7979_v63  ;;  %2964 = vperm.xlu0 %7145, %v7979_v63  }
 0x187   :  { %v2724_v49 = vpop.xlane.xlu1 %2723  ;;  %2944 = vperm.xlu1 %7146, %v7941_v20  }
 0x188   :  { %6154 = vst [vmem:[#allocation2 + $0x18] sm:$0x3] %v7982_v12  ;;  %v7995_v32 = vmax.f32 %v7984_v58, %v2724_v49 }
 0x189   :  { %v2727_v0 = vpop.xlane.xlu0 %2726 }
 0x18a   :  { %v7998_v17 = vmax.f32 %v7986_v45, %v2727_v0  ;;  %6155 = vst [vmem:[#allocation2 + $0x1a] sm:$0x3] %v7995_v32  ;;  %2974 = vperm.xlu0 %7145, %v7995_v32  }
 0x18b   :  { %v2730_v49 = vpop.xlane.xlu1 %2729  ;;  %2949 = vperm.xlu1 %7146, %v7944_v23  }
 0x18c   :  { %6156 = vst [vmem:[#allocation2 + $0x1c] sm:$0x3] %v7998_v17  ;;  %v8011_v0 = vmax.f32 %v8000_v14, %v2730_v49 }
 0x18d   :  { %v2733_v6 = vpop.xlane.xlu0 %2732 }
 0x18e   :  { %v8014_v62 = vmax.f32 %v8002_v7, %v2733_v6  ;;  %6157 = vst [vmem:[#allocation2 + $0x1e] sm:$0x3] %v8011_v0  ;;  %2984 = vperm.xlu0 %7145, %v8011_v0  }
 0x18f   :  { %v2736_v49 = vpop.xlane.xlu1 %2735  ;;  %2959 = vperm.xlu1 %7146, %v7964_v13  }
 0x190   :  { %6158 = vst [vmem:[#allocation2 + $0x20] sm:$0x3] %v8014_v62  ;;  %v8027_v6 = vmax.f32 %v8016_v61, %v2736_v49 }
 0x191   :  { %v2739_v51 = vpop.xlane.xlu0 %2738 }
 0x192   :  { %v8030_v43 = vmax.f32 %v8018_v52, %v2739_v51  ;;  %6159 = vst [vmem:[#allocation2 + $0x22] sm:$0x3] %v8027_v6  ;;  %2994 = vperm.xlu0 %7145, %v8027_v6  }
 0x193   :  { %v2742_v49 = vpop.xlane.xlu1 %2741  ;;  %2969 = vperm.xlu1 %7146, %v7982_v12  }
 0x194   :  { %6160 = vst [vmem:[#allocation2 + $0x24] sm:$0x3] %v8030_v43  ;;  %v8043_v51 = vmax.f32 %v8032_v42, %v2742_v49 }
 0x195   :  { %v2745_v33 = vpop.xlane.xlu0 %2744 }
 0x196   :  { %v8046_v27 = vmax.f32 %v8034_v34, %v2745_v33  ;;  %6161 = vst [vmem:[#allocation2 + $0x26] sm:$0x3] %v8043_v51  ;;  %3004 = vperm.xlu0 %7145, %v8043_v51  }
 0x197   :  { %v2748_v49 = vpop.xlane.xlu1 %2747  ;;  %2979 = vperm.xlu1 %7146, %v7998_v17  }
 0x198   :  { %6162 = vst [vmem:[#allocation2 + $0x28] sm:$0x3] %v8046_v27  ;;  %v8059_v33 = vmax.f32 %v8048_v28, %v2748_v49 }
 0x199   :  { %v2751_v22 = vpop.xlane.xlu0 %2750 }
 0x19a   :  { %v8062_v15 = vmax.f32 %v8050_v21, %v2751_v22  ;;  %6163 = vst [vmem:[#allocation2 + $0x2a] sm:$0x3] %v8059_v33  ;;  %3014 = vperm.xlu0 %7145, %v8059_v33  }
 0x19b   :  { %v2754_v49 = vpop.xlane.xlu1 %2753  ;;  %2989 = vperm.xlu1 %7146, %v8014_v62  }
 0x19c   :  { %6164 = vst [vmem:[#allocation2 + $0x2c] sm:$0x3] %v8062_v15  ;;  %v8075_v22 = vmax.f32 %v8064_v16, %v2754_v49  ;;  %v2811_v49 = vsub.f32 %v7881_v24, %v7884_v26 }
 0x19d   :  { %v2757_v10 = vpop.xlane.xlu0 %2756 }
 0x19e   :  { %v8078_v3 = vmax.f32 %v8066_v9, %v2757_v10  ;;  %6165 = vst [vmem:[#allocation2 + $0x2e] sm:$0x3] %v8075_v22  ;;  %3024 = vperm.xlu0 %7145, %v8075_v22   ;;  %v2843_v26 = vmul.f32 1.442695, %v2811_v49  ;;  %v8134_v9 = vld [vmem:[#allocation2 + $0x3e] sm:$0x3] }
 0x19f   :  { %v2760_v10 = vpop.xlane.xlu1 %2759  ;;  %2999 = vperm.xlu1 %7146, %v8030_v43  }
 0x1a0   :  { %6166 = vst [vmem:[#allocation2 + $0x30] sm:$0x3] %v8078_v3  ;;  %v8093_v60 = vmax.f32 %v8080_v59, %v2760_v10  ;;  %7147 = vpow2.f32 %v2843_v26  ;;  %v2818_v26 = vsub.f32 %v7928_v8, %v7941_v20  ;;  %v2820_v20 = vsub.f32 %v7947_v25, %v7961_v1 }
 0x1a1   :  { %v2763_v54 = vpop.xlane.xlu0 %2762  ;;  %v9119_v25 = vsub.f32 %v7900_v40, %v7911_v55  ;;  %v2826_v55 = vsub.f32 %v8000_v14, %v8011_v0  ;;  %v9122_v0 = vsub.f32 %v7949_v31, %v7964_v13  ;;  %v2832_v13 = vsub.f32 %v8048_v28, %v8059_v33 }
 0x1a2   :  { %v8096_v53 = vmax.f32 %v8082_v4, %v2763_v54  ;;  %6167 = vst [vmem:[#allocation2 + $0x32] sm:$0x3] %v8093_v60  ;;  %3034 = vperm.xlu0 %7145, %v8093_v60   ;;  %v2814_v54 = vsub.f32 %v7898_v39, %v7908_v50  ;;  %v2812_v39 = vsub.f32 %v7886_v29, %v7893_v36  ;;  %v2857_v8 = vmul.f32 1.442695, %v2818_v26 }
 0x1a3   :  { %v2766_v10 = vpop.xlane.xlu1 %2765  ;;  %3009 = vperm.xlu1 %7146, %v8046_v27   ;;  %v2851_v1 = vmul.f32 1.442695, %v9119_v25  ;;  %v9125_v33 = vsub.f32 %v8002_v7, %v8014_v62 }
 0x1a4   :  { %6168 = vst [vmem:[#allocation2 + $0x34] sm:$0x3] %v8096_v53  ;;  %v8111_v44 = vmax.f32 %v8098_v48, %v2766_v10  ;;  %v2849_v50 = vmul.f32 1.442695, %v2814_v54  ;;  %v2845_v29 = vmul.f32 1.442695, %v2812_v39 }
 0x1a5   :  { %v2769_v46 = vpop.xlane.xlu0 %2768 }
 0x1a6   :  { %v8114_v41 = vmax.f32 %v8100_v47, %v2769_v46  ;;  %6169 = vst [vmem:[#allocation2 + $0x36] sm:$0x3] %v8111_v44  ;;  %3044 = vperm.xlu0 %7145, %v8111_v44   ;;  %v2816_v46 = vsub.f32 %v7913_v56, %v7923_v2  ;;  %7149 = vpow2.f32 %v2849_v50  ;;  %v9117_v50 = vmov 0.0  }
 0x1a7   :  { %v2772_v49 = vpop.xlane.xlu1 %2771  ;;  %3019 = vperm.xlu1 %7146, %v8062_v15   ;;  %89 = vst.msk [vmem:[#allocation4] sm:$0x3] %vm88_vm4, %v9117_v50  ;;  %90 = vst.msk [vmem:[#allocation4 + $0x2] sm:$0x3] %vm88_vm4, %v9117_v50  ;;  %v2838_v7 = vsub.f32 %v8098_v48, %v8111_v44  ;;  %v9128_v48 = vsub.f32 %v8050_v21, %v8062_v15 }
 0x1a8   :  { %6170 = vst [vmem:[#allocation2 + $0x38] sm:$0x3] %v8114_v41  ;;  %v8129_v24 = vmax.f32 %v8116_v38, %v2772_v49  ;;  %v2853_v2 = vmul.f32 1.442695, %v2816_v46  ;;  %91 = vst.msk [vmem:[#allocation4 + $0x4] sm:$0x3] %vm88_vm4, %v9117_v50  ;;  %v9118_v46 = vsub.f32 %v7888_v30, %v7896_v37  ;;  %v2824_v37 = vsub.f32 %v7984_v58, %v7995_v32 }
 0x1a9   :  { %v2775_v10 = vpop.xlane.xlu0 %2774  ;;  %92 = vst.msk [vmem:[#allocation4 + $0x6] sm:$0x3] %vm88_vm4, %v9117_v50  ;;  %93 = vst.msk [vmem:[#allocation4 + $0x8] sm:$0x3] %vm88_vm4, %v9117_v50  ;;  %v9121_v58 = vsub.f32 %v7930_v11, %v7944_v23  ;;  %v2830_v23 = vsub.f32 %v8032_v42, %v8043_v51  ;;  %v9124_v51 = vsub.f32 %v7986_v45, %v7998_v17 }
 0x1aa   :  { %v8132_v4 = vmax.f32 %v8118_v35, %v2775_v10  ;;  %6171 = vst [vmem:[#allocation2 + $0x3a] sm:$0x3] %v8129_v24  ;;  %3054 = vperm.xlu0 %7145, %v8129_v24   ;;  %94 = vst.msk [vmem:[#allocation4 + $0xa] sm:$0x3] %vm88_vm4, %v9117_v50  ;;  %7151 = vpow2.f32 %v2853_v2  ;;  %v8220_v39 = vpop.eup %7147  ;;  %v2847_v10 = vmul.f32 1.442695, %v9118_v46  ;;  %v2822_v2 = vsub.f32 %v7967_v18, %v7979_v63 }
 0x1ab   :  { %v2778_v54 = vpop.xlane.xlu1 %2777  ;;  %3029 = vperm.xlu1 %7146, %v8078_v3   ;;  %95 = vst.msk [vmem:[#allocation4 + $0xc] sm:$0x3] %vm88_vm4, %v9117_v50  ;;  %96 = vst.msk [vmem:[#allocation4 + $0xe] sm:$0x3] %vm88_vm4, %v9117_v50  ;;  %7153 = vpow2.f32 %v2845_v29  ;;  %v9120_v18 = vsub.f32 %v7915_v57, %v7926_v5  ;;  %v2869_v40 = vmul.f32 1.442695, %v2824_v37  ;;  %v2828_v5 = vsub.f32 %v8016_v61, %v8027_v6 }
 0x1ac   :  { %v2841_v56 = vsub.f32 %v8118_v35, %v8132_v4  ;;  %6172 = vst [vmem:[#allocation2 + $0x3c] sm:$0x3] %v8132_v4  ;;  %v8147_v49 = vmax.f32 %v8134_v9, %v2778_v54  ;;  %97 = vst.msk [vmem:[#allocation4 + $0x10] sm:$0x3] %vm88_vm4, %v9117_v50  ;;  %7155 = vpow2.f32 %v2857_v8  ;;  %v2861_v54 = vmul.f32 1.442695, %v2820_v20 }
 0x1ad   :  { %98 = vst.msk [vmem:[#allocation4 + $0x12] sm:$0x3] %vm88_vm4, %v9117_v50  ;;  %99 = vst.msk [vmem:[#allocation4 + $0x14] sm:$0x3] %vm88_vm4, %v9117_v50  ;;  %7157 = vpow2.f32 %v2847_v10  ;;  %v2865_v30 = vmul.f32 1.442695, %v2822_v2  ;;  %v9123_v6 = vsub.f32 %v7969_v19, %v7982_v12  ;;  %v2834_v19 = vsub.f32 %v8064_v16, %v8075_v22 }
 0x1ae   :  { %v2842_v36 = vsub.f32 %v8134_v9, %v8147_v49  ;;  %6173 = vst [vmem:[#allocation2 + $0x3e] sm:$0x3] %v8147_v49  ;;  %3064 = vperm.xlu0 %7145, %v8147_v49   ;;  %100 = vst.msk [vmem:[#allocation4 + $0x16] sm:$0x3] %vm88_vm4, %v9117_v50  ;;  %7159 = vpow2.f32 %v2861_v54  ;;  %v2855_v63 = vmul.f32 1.442695, %v9120_v18  ;;  %v2836_v45 = vsub.f32 %v8080_v59, %v8093_v60 }
 0x1af   :  { %101 = vst.msk [vmem:[#allocation4 + $0x18] sm:$0x3] %vm88_vm4, %v9117_v50  ;;  %102 = vst.msk [vmem:[#allocation4 + $0x1a] sm:$0x3] %vm88_vm4, %v9117_v50  ;;  %3039 = vperm.xlu1 %7146, %v8096_v53   ;;  %7161 = vpow2.f32 %v2851_v1  ;;  %v2859_v32 = vmul.f32 1.442695, %v9121_v58  ;;  %v9126_v22 = vsub.f32 %v8018_v52, %v8030_v43  ;;  %v9127_v60 = vsub.f32 %v8034_v34, %v8046_v27 }
 0x1b0   :  { %103 = vst.msk [vmem:[#allocation4 + $0x1c] sm:$0x3] %vm88_vm4, %v9117_v50  ;;  %104 = vst.msk [vmem:[#allocation4 + $0x1e] sm:$0x3] %vm88_vm4, %v9117_v50  ;;  %v8229_v26 = vpop.eup %7149  ;;  %7163 = vpow2.f32 %v2865_v30  ;;  %v2873_v57 = vmul.f32 1.442695, %v2826_v55  ;;  %v2840_v52 = vsub.f32 %v8116_v38, %v8129_v24 }
 0x1b1   :  { %105 = vst.msk [vmem:[#allocation4 + $0x20] sm:$0x3] %vm88_vm4, %v9117_v50  ;;  %106 = vst.msk [vmem:[#allocation4 + $0x22] sm:$0x3] %vm88_vm4, %v9117_v50  ;;  %7165 = vpow2.f32 %v2855_v63  ;;  %v2863_v10 = vmul.f32 1.442695, %v9122_v0 }
 0x1b2   :  { %107 = vst.msk [vmem:[#allocation4 + $0x24] sm:$0x3] %vm88_vm4, %v9117_v50  ;;  %108 = vst.msk [vmem:[#allocation4 + $0x26] sm:$0x3] %vm88_vm4, %v9117_v50  ;;  %3421 = vperm.xlu0 %7145, %v8220_v39   ;;  %7167 = vpow2.f32 %v2869_v40  ;;  %v2877_v11 = vmul.f32 1.442695, %v2828_v5 }
 0x1b3   :  { %109 = vst.msk [vmem:[#allocation4 + $0x28] sm:$0x3] %vm88_vm4, %v9117_v50  ;;  %110 = vst.msk [vmem:[#allocation4 + $0x2a] sm:$0x3] %vm88_vm4, %v9117_v50  ;;  %3049 = vperm.xlu1 %7146, %v8114_v41   ;;  %7169 = vpow2.f32 %v2859_v32  ;;  %v2867_v2 = vmul.f32 1.442695, %v9123_v6 }
 0x1b4   :  { %111 = vst.msk [vmem:[#allocation4 + $0x2c] sm:$0x3] %vm88_vm4, %v9117_v50  ;;  %112 = vst.msk [vmem:[#allocation4 + $0x2e] sm:$0x3] %vm88_vm4, %v9117_v50  ;;  %v8238_v29 = vpop.eup %7151  ;;  %7171 = vpow2.f32 %v2873_v57  ;;  %v2881_v31 = vmul.f32 1.442695, %v2830_v23 }
 0x1b5   :  { %113 = vst.msk [vmem:[#allocation4 + $0x30] sm:$0x3] %vm88_vm4, %v9117_v50  ;;  %114 = vst.msk [vmem:[#allocation4 + $0x32] sm:$0x3] %vm88_vm4, %v9117_v50  ;;  %v8247_v8 = vpop.eup %7153  ;;  %7173 = vpow2.f32 %v2863_v10  ;;  %v2871_v1 = vmul.f32 1.442695, %v9124_v51 }
 0x1b6   :  { %115 = vst.msk [vmem:[#allocation4 + $0x34] sm:$0x3] %vm88_vm4, %v9117_v50  ;;  %116 = vst.msk [vmem:[#allocation4 + $0x36] sm:$0x3] %vm88_vm4, %v9117_v50  ;;  %3436 = vperm.xlu0 %7145, %v8229_v26   ;;  %v8249_v20 = vpop.eup %7155  ;;  %7175 = vpow2.f32 %v2877_v11  ;;  %v2885_v12 = vmul.f32 1.442695, %v2832_v13 }
 0x1b7   :  { %117 = vst.msk [vmem:[#allocation4 + $0x38] sm:$0x3] %vm88_vm4, %v9117_v50  ;;  %118 = vst.msk [vmem:[#allocation4 + $0x3a] sm:$0x3] %vm88_vm4, %v9117_v50  ;;  %3059 = vperm.xlu1 %7146, %v8132_v4   ;;  %v8258_v46 = vpop.eup %7157  ;;  %7177 = vpow2.f32 %v2867_v2  ;;  %v2875_v37 = vmul.f32 1.442695, %v9125_v33 }
 0x1b8   :  { %119 = vst.msk [vmem:[#allocation4 + $0x3c] sm:$0x3] %vm88_vm4, %v9117_v50  ;;  %120 = vst.msk [vmem:[#allocation4 + $0x3e] sm:$0x3] %vm88_vm4, %v9117_v50  ;;  %v8260_v14 = vpop.eup %7159  ;;  %7179 = vpow2.f32 %v2881_v31  ;;  %v2889_v17 = vmul.f32 1.442695, %v2834_v19 }
 0x1b9   :  { %v8269_v54 = vpop.eup %7161  ;;  %7181 = vpow2.f32 %v2871_v1  ;;  %v2879_v63 = vmul.f32 1.442695, %v9126_v22  ;;  %v2893_v62 = vmul.f32 1.442695, %v2836_v45  ;;  %v2883_v55 = vmul.f32 1.442695, %v9127_v60 }
 0x1ba   :  { %3446 = vperm.xlu0 %7145, %v8238_v29   ;;  %v8271_v61 = vpop.eup %7163  ;;  %7183 = vpow2.f32 %v2885_v12  ;;  %v2897_v43 = vmul.f32 1.442695, %v2838_v7  ;;  %v2887_v32 = vmul.f32 1.442695, %v9128_v48  ;;  %v2901_v27 = vmul.f32 1.442695, %v2840_v52 }
 0x1bb   :  { %3426 = vperm.xlu1 %7146, %v8247_v8   ;;  %v8280_v25 = vpop.eup %7165  ;;  %7185 = vpow2.f32 %v2875_v37  ;;  %v9129_v38 = vld [vmem:[#allocation37_spill] sm:$0xff]  ;;  %v9131_v0 = vld [vmem:[#allocation38_spill] sm:$0xff]  ;;  %v9137_v60 = vld [vmem:[#allocation8_spill] sm:$0xff] }
 0x1bc   :  { %v8282_v42 = vpop.eup %7167  ;;  %7187 = vpow2.f32 %v2889_v17  ;;  %v9130_v15 = vsub.f32 %v9129_v38, %v8078_v3  ;;  %v9132_v10 = vsub.f32 %v9131_v0, %v8096_v53  ;;  %v9133_v3 = vsub.f32 %v8100_v47, %v8114_v41  ;;  %v9134_v12 = vld [vmem:[#allocation5_spill] sm:$0xff]  ;;  %v9135_v37 = vld [vmem:[#allocation6_spill] sm:$0xff] }
 0x1bd   :  { %v8291_v30 = vpop.eup %7169  ;;  %7189 = vpow2.f32 %v2879_v63  ;;  %v2903_v53 = vmul.f32 1.442695, %v2841_v56  ;;  %v9136_v56 = vld [vmem:[#allocation7_spill] sm:$0xff] }
 0x1be   :  { %3456 = vperm.xlu0 %7145, %v8249_v20   ;;  %v8293_v28 = vpop.eup %7171  ;;  %7191 = vpow2.f32 %v2893_v62  ;;  %v2891_v21 = vmul.f32 1.442695, %v9130_v15  ;;  %v2895_v11 = vmul.f32 1.442695, %v9132_v10  ;;  %v2899_v2 = vmul.f32 1.442695, %v9133_v3 }
 0x1bf   :  { %3431 = vperm.xlu1 %7146, %v8258_v46   ;;  %v8302_v18 = vpop.eup %7173  ;;  %7193 = vpow2.f32 %v2883_v55  ;;  %v6600_v15 = vld [vmem:[%s9045_s2 + $0x86] sm:$0x3]  ;;  %v9139_v3 = vld [vmem:[#allocation10_spill] sm:$0xff] }
 0x1c0   :  { %v8304_v16 = vpop.eup %7175  ;;  %7195 = vpow2.f32 %v2897_v43  ;;  %v6599_v43 = vld [vmem:[%s9045_s2 + $0x84] sm:$0x3] }
 0x1c1   :  { %v8313_v40 = vpop.eup %7177  ;;  %7197 = vpow2.f32 %v2887_v32 }
 0x1c2   :  { %3466 = vperm.xlu0 %7145, %v8260_v14   ;;  %v8315_v59 = vpop.eup %7179  ;;  %7199 = vpow2.f32 %v2901_v27  ;;  %v9138_v27 = vld [vmem:[#allocation9_spill] sm:$0xff] }
 0x1c3   :  { %3441 = vperm.xlu1 %7146, %v8269_v54   ;;  %v8324_v58 = vpop.eup %7181  ;;  %7201 = vpow2.f32 %v2891_v21 }
 0x1c4   :  { %v8326_v44 = vpop.eup %7183  ;;  %7203 = vpow2.f32 %v2895_v11 }
 0x1c5   :  { %v8333_v34 = vpop.eup %7185  ;;  %7205 = vpow2.f32 %v2899_v2 }
 0x1c6   :  { %3476 = vperm.xlu0 %7145, %v8271_v61   ;;  %v8335_v57 = vpop.eup %7187  ;;  %7207 = vpow2.f32 %v2903_v53  ;;  %v6601_v53 = vld [vmem:[%s9045_s2 + $0x88] sm:$0x3] }
 0x1c7   :  { %3451 = vperm.xlu1 %7146, %v8280_v25   ;;  %v8342_v24 = vpop.eup %7189 }
 0x1c8   :  { %v8344_v5 = vpop.eup %7191 }
 0x1c9   :  { %v8351_v23 = vpop.eup %7193 }
 0x1ca   :  { %3486 = vperm.xlu0 %7145, %v8282_v42   ;;  %v8353_v6 = vpop.eup %7195 }
 0x1cb   :  { %3461 = vperm.xlu1 %7146, %v8291_v30   ;;  %v8360_v31 = vpop.eup %7197 }
 0x1cc   :  { %v8362_v13 = vpop.eup %7199 }
 0x1cd   :  { %v8369_v51 = vpop.eup %7201 }
 0x1ce   :  { %3496 = vperm.xlu0 %7145, %v8293_v28   ;;  %v8373_v47 = vpop.eup %7203 }
 0x1cf   :  { %3471 = vperm.xlu1 %7146, %v8302_v18   ;;  %v8377_v35 = vpop.eup %7205 }
 0x1d0   :  { %v8381_v62 = vpop.eup %7207 }
 0x1d2   :  { %3506 = vperm.xlu0 %7145, %v8304_v16  }
 0x1d3   :  { %3481 = vperm.xlu1 %7146, %v8313_v40  }
 0x1d6   :  { %3516 = vperm.xlu0 %7145, %v8315_v59  }
 0x1d7   :  { %3491 = vperm.xlu1 %7146, %v8324_v58  }
 0x1da   :  { %3526 = vperm.xlu0 %7145, %v8326_v44  }
 0x1db   :  { %3501 = vperm.xlu1 %7146, %v8333_v34  }
 0x1de   :  { %3536 = vperm.xlu0 %7145, %v8335_v57  }
 0x1df   :  { %3511 = vperm.xlu1 %7146, %v8342_v24  }
 0x1e2   :  { %3546 = vperm.xlu0 %7145, %v8344_v5  }
 0x1e3   :  { %3521 = vperm.xlu1 %7146, %v8351_v23  }
 0x1e6   :  { %3556 = vperm.xlu0 %7145, %v8353_v6  }
 0x1e7   :  { %3531 = vperm.xlu1 %7146, %v8360_v31  }
 0x1ea   :  { %3566 = vperm.xlu0 %7145, %v8362_v13   ;;  %v2910_v1 = vpop.permute.xlu0 %2909 }
 0x1eb   :  { %v3067_v19 = vsub.f32 %v9134_v12, %v2910_v1  ;;  %3541 = vperm.xlu1 %7146, %v8369_v51  }
 0x1ed   :  { %v3099_v41 = vmul.f32 1.442695, %v3067_v19 }
 0x1ee   :  { %v2915_v33 = vpop.permute.xlu1 %2914 }
 0x1ef   :  { %7209 = vpow2.f32 %v3099_v41  ;;  %v3068_v17 = vsub.f32 %v9135_v37, %v2915_v33  ;;  %3551 = vperm.xlu1 %7146, %v8373_v47   ;;  %v9140_v33 = vld [vmem:[#allocation11_spill] sm:$0xff] }
 0x1f1   :  { %v3101_v45 = vmul.f32 1.442695, %v3068_v17  ;;  %v6602_v17 = vld [vmem:[%s9045_s2 + $0x8a] sm:$0x3] }
 0x1f2   :  { %v2920_v4 = vpop.permute.xlu1 %2919 }
 0x1f3   :  { %7211 = vpow2.f32 %v3101_v45  ;;  %v3069_v22 = vsub.f32 %v9136_v56, %v2920_v4  ;;  %3561 = vperm.xlu1 %7146, %v8377_v35  }
 0x1f5   :  { %v3103_v63 = vmul.f32 1.442695, %v3069_v22  ;;  %v9141_v22 = vld [vmem:[#allocation14_spill] sm:$0xff] }
 0x1f6   :  { %v2925_v7 = vpop.permute.xlu1 %2924 }
 0x1f7   :  { %7213 = vpow2.f32 %v3103_v63  ;;  %v3070_v55 = vsub.f32 %v9137_v60, %v2925_v7  ;;  %3571 = vperm.xlu1 %7146, %v8381_v62  }
 0x1f9   :  { %v8388_v52 = vpop.eup %7209  ;;  %v3105_v48 = vmul.f32 1.442695, %v3070_v55  ;;  %v9142_v55 = vld [vmem:[#allocation12_spill] sm:$0xff] }
 0x1fa   :  { %v2930_v32 = vpop.permute.xlu1 %2929  ;;  %6984 = vmatmul.mubr.msk.f32.vlgmr.msra.gmra.mrb[32].mxu0 %vm3643_vm5, %v8388_v52 }
 0x1fb   :  { %7215 = vpow2.f32 %v3105_v48  ;;  %v3071_v38 = vsub.f32 %v9138_v27, %v2930_v32  ;;  %6992 = vmatpush3.msk.msra.mxu0 %vm3647_vm3, %v6599_v43  ;;  %6993 = vmatprep.mubr.msk.f32.mxu0 %vm7340_vm1, %v9117_v50  ;;  %v6603_v48 = vld [vmem:[%s9045_s2 + $0x8c] sm:$0x3] }
 0x1fc   :  { %7001 = vmatprep.subr.mxu0 %v9117_v50 }
 0x1fd   :  { %v7212_v21 = vpop.eup %7211  ;;  %v3107_v0 = vmul.f32 1.442695, %v3071_v38 }
 0x1fe   :  { %6989 = vmatmul.mubr.msk.f32.vlgmr.msra.gmra.mrb[32].mxu1 %vm3643_vm5, %v7212_v21  ;;  %v2935_v10 = vpop.permute.xlu1 %2934  ;;  %v3230_v56 = vsel %vm2682_vm2, %v7212_v21, 0.0  ;;  %v9143_v21 = vld [vmem:[#allocation16_spill] sm:$0xff] }
 0x1ff   :  { %7217 = vpow2.f32 %v3107_v0  ;;  %v3072_v2 = vsub.f32 %v9139_v3, %v2935_v10  ;;  %6997 = vmatpush3.msk.msra.mxu1 %vm3647_vm3, %v6600_v15  ;;  %6998 = vmatprep.mubr.msk.f32.mxu1 %vm7340_vm1, %v9117_v50  ;;  %v9144_v3 = vld [vmem:[#allocation13_spill] sm:$0xff] }
 0x200   :  { %7006 = vmatprep.subr.mxu1 %v9117_v50 }
 0x201   :  { %v2955_v11 = vpop.permute.xlu0 %2954  ;;  %v7214_v1 = vpop.eup %7213  ;;  %v3109_v12 = vmul.f32 1.442695, %v3072_v2 }
 0x202   :  { %v2940_v19 = vpop.permute.xlu1 %2939  ;;  %6994 = vmatmul.mubr.msk.f32.vlgmr.msra.gmra.mrb[34].mxu0 %vm3643_vm5, %v7214_v1  ;;  %v3076_v63 = vsub.f32 %v9141_v22, %v2955_v11  ;;  %v3233_v38 = vsel %vm2682_vm2, %v7214_v1, 0.0 }
 0x203   :  { %7219 = vpow2.f32 %v3109_v12  ;;  %v3073_v37 = vsub.f32 %v9140_v33, %v2940_v19  ;;  %7002 = vmatpush3.msk.msra.mxu0 %vm3647_vm3, %v6601_v53  ;;  %7003 = vmatprep.mubr.msk.f32.mxu0 %vm7340_vm1, %v9117_v50  ;;  %v6604_v53 = vld [vmem:[%s9045_s2 + $0x8e] sm:$0x3] }
 0x204   :  { %7011 = vmatprep.subr.mxu0 %v9117_v50  ;;  %v3117_v15 = vmul.f32 1.442695, %v3076_v63  ;;  %v6605_v63 = vld [vmem:[%s9045_s2 + $0x90] sm:$0x3] }
 0x205   :  { %v2965_v41 = vpop.permute.xlu0 %2964  ;;  %v8418_v45 = vpop.eup %7215  ;;  %v3111_v4 = vmul.f32 1.442695, %v3073_v37 }
 0x206   :  { %6999 = vmatmul.mubr.msk.f32.vlgmr.msra.gmra.mrb[34].mxu1 %vm3643_vm5, %v8418_v45  ;;  %v2945_v7 = vpop.permute.xlu1 %2944  ;;  %v3078_v0 = vsub.f32 %v9143_v21, %v2965_v41 }
 0x207   :  { %7221 = vpow2.f32 %v3111_v4  ;;  %v3074_v43 = vsub.f32 %v9142_v55, %v2945_v7  ;;  %7007 = vmatpush3.msk.msra.mxu1 %vm3647_vm3, %v6602_v17  ;;  %7008 = vmatprep.mubr.msk.f32.mxu1 %vm7340_vm1, %v9117_v50  ;;  %v9145_v17 = vld [vmem:[#allocation15_spill] sm:$0xff] }
 0x208   :  { %7016 = vmatprep.subr.mxu1 %v9117_v50  ;;  %v3121_v41 = vmul.f32 1.442695, %v3078_v0  ;;  %v9148_v0 = vld [vmem:[#allocation20_spill] sm:$0xff] }
 0x209   :  { %3231 = vadd.xlane.f32.xlu0 %v3230_v56  ;;  %v2975_v60 = vpop.permute.xlu0 %2974  ;;  %v7218_v32 = vpop.eup %7217  ;;  %v3113_v27 = vmul.f32 1.442695, %v3074_v43  ;;  %v9146_v56 = vld [vmem:[#allocation18_spill] sm:$0xff] }
 0x20a   :  { %v2950_v10 = vpop.permute.xlu1 %2949  ;;  %7004 = vmatmul.mubr.msk.f32.vlgmr.msra.gmra.mrb[36].mxu0 %vm3643_vm5, %v7218_v32  ;;  %v3239_v19 = vsel %vm2682_vm2, %v7218_v32, 0.0  ;;  %v3080_v22 = vsub.f32 %v9146_v56, %v2975_v60  ;;  %v9150_v56 = vld [vmem:[#allocation22_spill] sm:$0xff] }
 0x20b   :  { %7223 = vpow2.f32 %v3113_v27  ;;  %v3075_v2 = vsub.f32 %v9144_v3, %v2950_v10  ;;  %7012 = vmatpush3.msk.msra.mxu0 %vm3647_vm3, %v6603_v48  ;;  %7013 = vmatprep.mubr.msk.f32.mxu0 %vm7340_vm1, %v9117_v50  ;;  %v9147_v27 = vld [vmem:[#allocation17_spill] sm:$0xff] }
 0x20c   :  { %7021 = vmatprep.subr.mxu0 %v9117_v50  ;;  %7225 = vpow2.f32 %v3117_v15  ;;  %v3125_v60 = vmul.f32 1.442695, %v3080_v22  ;;  %v6606_v15 = vld [vmem:[%s9045_s2 + $0x92] sm:$0x3] }
 0x20d   :  { %3234 = vadd.xlane.f32.xlu0 %v3233_v38  ;;  %v2985_v11 = vpop.permute.xlu0 %2984  ;;  %v8443_v1 = vpop.eup %7219  ;;  %v3115_v12 = vmul.f32 1.442695, %v3075_v2 }
 0x20e   :  { %7009 = vmatmul.mubr.msk.f32.vlgmr.msra.gmra.mrb[36].mxu1 %vm3643_vm5, %v8443_v1  ;;  %v2960_v33 = vpop.permute.xlu1 %2959  ;;  %v3082_v10 = vsub.f32 %v9148_v0, %v2985_v11 }
 0x20f   :  { %7227 = vpow2.f32 %v3115_v12  ;;  %v3077_v4 = vsub.f32 %v9145_v17, %v2960_v33  ;;  %7017 = vmatpush3.msk.msra.mxu1 %vm3647_vm3, %v6604_v53  ;;  %7018 = vmatprep.mubr.msk.f32.mxu1 %vm7340_vm1, %v9117_v50  ;;  %v9149_v53 = vld [vmem:[#allocation19_spill] sm:$0xff] }
 0x210   :  { %7026 = vmatprep.subr.mxu1 %v9117_v50  ;;  %7229 = vpow2.f32 %v3121_v41  ;;  %v3129_v33 = vmul.f32 1.442695, %v3082_v10 }
 0x211   :  { %3240 = vadd.xlane.f32.xlu0 %v3239_v19  ;;  %v2995_v37 = vpop.permute.xlu0 %2994  ;;  %v7222_v7 = vpop.eup %7221  ;;  %v3119_v55 = vmul.f32 1.442695, %v3077_v4  ;;  %v6607_v4 = vld [vmem:[%s9045_s2 + $0x94] sm:$0x3] }
 0x212   :  { %v2970_v43 = vpop.permute.xlu1 %2969  ;;  %7014 = vmatmul.mubr.msk.f32.vlgmr.msra.gmra.mrb[38].mxu0 %vm3643_vm5, %v7222_v7  ;;  %v3245_v32 = vsel %vm2682_vm2, %v7222_v7, 0.0  ;;  %v3084_v22 = vsub.f32 %v9150_v56, %v2995_v37 }
 0x213   :  { %7231 = vpow2.f32 %v3119_v55  ;;  %v3079_v38 = vsub.f32 %v9147_v27, %v2970_v43  ;;  %7022 = vmatpush3.msk.msra.mxu0 %vm3647_vm3, %v6605_v63  ;;  %7023 = vmatprep.mubr.msk.f32.mxu0 %vm7340_vm1, %v9117_v50  ;;  %v3227_v55 = vsel %vm2682_vm2, %v8388_v52, 0.0  ;;  %v6608_v43 = vld [vmem:[%s9045_s2 + $0x96] sm:$0x3] }
 0x214   :  { %7031 = vmatprep.subr.mxu0 %v9117_v50 }
 0x215   :  { %v8458_v48 = vpop.permute.xlu0 %3004  ;;  %3246 = vadd.xlane.f32.xlu0 %v3245_v32  ;;  %v8469_v21 = vpop.eup %7223  ;;  %v3123_v3 = vmul.f32 1.442695, %v3079_v38  ;;  %v9151_v32 = vld [vmem:[#allocation21_spill] sm:$0xff] }
 0x216   :  { %7019 = vmatmul.mubr.msk.f32.vlgmr.msra.gmra.mrb[38].mxu1 %vm3643_vm5, %v8469_v21  ;;  %v2980_v2 = vpop.permute.xlu1 %2979  ;;  %v8480_v41 = vpop.eup %7225 }
 0x217   :  { %7233 = vpow2.f32 %v3123_v3  ;;  %v3081_v12 = vsub.f32 %v9149_v53, %v2980_v2  ;;  %7027 = vmatpush3.msk.msra.mxu1 %vm3647_vm3, %v6606_v15  ;;  %7028 = vmatprep.mubr.msk.f32.mxu1 %vm7340_vm1, %v9117_v50  ;;  %v3133_v15 = vmul.f32 1.442695, %v3084_v22  ;;  %v3236_v3 = vsel %vm2682_vm2, %v8418_v45, 0.0  ;;  %v6609_v2 = vld [vmem:[%s9045_s2 + $0x98] sm:$0x3] }
 0x218   :  { %7235 = vpow2.f32 %v3125_v60  ;;  %7036 = vmatprep.subr.mxu1 %v9117_v50  ;;  %v9152_v53 = vld [vmem:[#allocation24_spill] sm:$0xff] }
 0x219   :  { %v8475_v19 = vpop.permute.xlu0 %3014  ;;  %v7228_v11 = vpop.eup %7227  ;;  %v3127_v17 = vmul.f32 1.442695, %v3081_v12  ;;  %v3086_v12 = vsub.f32 %v9152_v53, %v8458_v48 }
 0x21a   :  { %v2990_v63 = vpop.permute.xlu1 %2989  ;;  %7024 = vmatmul.mubr.msk.f32.vlgmr.msra.gmra.mrb[40].mxu0 %vm3643_vm5, %v7228_v11  ;;  %7029 = vmatmul.mubr.msk.f32.vlgmr.msra.gmra.mrb[40].mxu1 %vm3643_vm5, %v8480_v41  ;;  %v3251_v7 = vsel %vm2682_vm2, %v7228_v11, 0.0  ;;  %v8497_v37 = vpop.eup %7229  ;;  %v9153_v11 = vld [vmem:[#allocation23_spill] sm:$0xff] }
 0x21b   :  { %7237 = vpow2.f32 %v3127_v17  ;;  %v3083_v27 = vsub.f32 %v9151_v32, %v2990_v63  ;;  %3252 = vadd.xlane.f32.xlu0 %v3251_v7  ;;  %3228 = vadd.xlane.f32.xlu1 %v3227_v55  ;;  %v6610_v17 = vld [vmem:[%s9045_s2 + $0x9a] sm:$0x3]  ;;  %v3137_v63 = vmul.f32 1.442695, %v3086_v12  ;;  %v9154_v55 = vld [vmem:[#allocation25_spill] sm:$0xff]  ;;  %v3242_v32 = vsel %vm2682_vm2, %v8443_v1, 0.0 }
 0x21c   :  { %7032 = vmatpush3.msk.msra.mxu0 %vm3647_vm3, %v6607_v4  ;;  %7033 = vmatprep.mubr.msk.f32.mxu0 %vm7340_vm1, %v9117_v50  ;;  %7239 = vpow2.f32 %v3129_v33 }
 0x21d   :  { %v7232_v38 = vpop.eup %7231  ;;  %v3131_v60 = vmul.f32 1.442695, %v3083_v27  ;;  %v8502_v52 = vpop.permute.xlu0 %3024  ;;  %7037 = vmatpush3.msk.msra.mxu1 %vm3647_vm3, %v6608_v43  ;;  %7038 = vmatprep.mubr.msk.f32.mxu1 %vm7340_vm1, %v9117_v50  ;;  %v6611_v27 = vld [vmem:[%s9045_s2 + $0x9c] sm:$0x3] }
 0x21e   :  { %v3000_v0 = vpop.permute.xlu1 %2999  ;;  %7034 = vmatmul.mubr.msk.f32.vlgmr.msra.gmra.mrb[42].mxu0 %vm3643_vm5, %v7232_v38  ;;  %7039 = vmatmul.mubr.msk.f32.vlgmr.msra.gmra.mrb[42].mxu1 %vm3643_vm5, %v8497_v37  ;;  %v3257_v10 = vsel %vm2682_vm2, %v7232_v38, 0.0  ;;  %v9155_v38 = vld [vmem:[#allocation26_spill] sm:$0xff] }
 0x21f   :  { %7241 = vpow2.f32 %v3131_v60  ;;  %v3085_v33 = vsub.f32 %v9153_v11, %v3000_v0  ;;  %3258 = vadd.xlane.f32.xlu0 %v3257_v10  ;;  %3237 = vadd.xlane.f32.xlu1 %v3236_v3  ;;  %v3088_v60 = vsub.f32 %v9155_v38, %v8475_v19  ;;  %v3248_v11 = vsel %vm2682_vm2, %v8469_v21, 0.0 }
 0x220   :  { %7041 = vmatprep.subr.mxu0 %v9117_v50  ;;  %7046 = vmatprep.subr.mxu1 %v9117_v50  ;;  %7243 = vpow2.f32 %v3133_v15  ;;  %v6612_v15 = vld [vmem:[%s9045_s2 + $0x9e] sm:$0x3] }
 0x221   :  { %v7234_v45 = vpop.eup %7233  ;;  %v3135_v4 = vmul.f32 1.442695, %v3085_v33  ;;  %7042 = vmatpush3.msk.msra.mxu0 %vm3647_vm3, %v6609_v2  ;;  %7043 = vmatprep.mubr.msk.f32.mxu0 %vm7340_vm1, %v9117_v50  ;;  %v8533_v7 = vpop.permute.xlu0 %3034  ;;  %v9156_v2 = vld [vmem:[#allocation27_spill] sm:$0xff]  ;;  %v3141_v12 = vmul.f32 1.442695, %v3088_v60  ;;  %v3254_v60 = vsel %vm2682_vm2, %v8480_v41, 0.0 }
 0x222   :  { %v8527_v48 = vpop.eup %7235  ;;  %7047 = vmatpush3.msk.msra.mxu1 %vm3647_vm3, %v6610_v17  ;;  %7048 = vmatprep.mubr.msk.f32.mxu1 %vm7340_vm1, %v9117_v50  ;;  %v3010_v56 = vpop.permute.xlu1 %3009  ;;  %v3263_v22 = vsel %vm2682_vm2, %v7234_v45, 0.0  ;;  %v6613_v33 = vld [vmem:[%s9045_s2 + $0xa0] sm:$0x3]  ;;  %v9160_v41 = vld [vmem:[#allocation31_spill] sm:$0xff] }
 0x223   :  { %7245 = vpow2.f32 %v3135_v4  ;;  %v3087_v43 = vsub.f32 %v9154_v55, %v3010_v56  ;;  %7044 = vmatmul.mubr.msk.f32.vlgmr.msra.gmra.mrb[44].mxu0 %vm3643_vm5, %v7234_v45  ;;  %7049 = vmatmul.mubr.msk.f32.vlgmr.msra.gmra.mrb[44].mxu1 %vm3643_vm5, %v8527_v48  ;;  %v9157_v45 = vld [vmem:[#allocation28_spill] sm:$0xff] }
 0x224   :  { %3264 = vadd.xlane.f32.xlu0 %v3263_v22  ;;  %3243 = vadd.xlane.f32.xlu1 %v3242_v32  ;;  %7247 = vpow2.f32 %v3137_v63  ;;  %v3090_v4 = vsub.f32 %v9157_v45, %v8502_v52  ;;  %v6614_v63 = vld [vmem:[%s9045_s2 + $0xa2] sm:$0x3]  ;;  %v3260_v45 = vsel %vm2682_vm2, %v8497_v37, 0.0 }
 0x225   :  { %v7238_v0 = vpop.eup %7237  ;;  %v3139_v10 = vmul.f32 1.442695, %v3087_v43  ;;  %7051 = vmatprep.subr.mxu0 %v9117_v50  ;;  %7056 = vmatprep.subr.mxu1 %v9117_v50  ;;  %v8571_v56 = vpop.permute.xlu0 %3044  ;;  %v9158_v52 = vld [vmem:[#allocation29_spill] sm:$0xff] }
 0x226   :  { %7052 = vmatpush3.msk.msra.mxu0 %vm3647_vm3, %v6611_v27  ;;  %7053 = vmatprep.mubr.msk.f32.mxu0 %vm7340_vm1, %v9117_v50  ;;  %v3020_v1 = vpop.permute.xlu1 %3019  ;;  %v3269_v19 = vsel %vm2682_vm2, %v7238_v0, 0.0  ;;  %v8555_v3 = vpop.eup %7239  ;;  %v3145_v38 = vmul.f32 1.442695, %v3090_v4  ;;  %v6617_v4 = vld [vmem:[%s9045_s2 + $0xa8] sm:$0x3]  ;;  %v9162_v37 = vld [vmem:[#allocation33_spill] sm:$0xff] }
 0x227   :  { %7057 = vmatpush3.msk.msra.mxu1 %vm3647_vm3, %v6612_v15  ;;  %7058 = vmatprep.mubr.msk.f32.mxu1 %vm7340_vm1, %v9117_v50  ;;  %v3089_v53 = vsub.f32 %v9156_v2, %v3020_v1  ;;  %7249 = vpow2.f32 %v3139_v10  ;;  %v6615_v15 = vld [vmem:[%s9045_s2 + $0xa4] sm:$0x3] }
 0x228   :  { %7054 = vmatmul.mubr.msk.f32.vlgmr.msra.gmra.mrb[46].mxu0 %vm3643_vm5, %v7238_v0  ;;  %7059 = vmatmul.mubr.msk.f32.vlgmr.msra.gmra.mrb[46].mxu1 %vm3643_vm5, %v8555_v3  ;;  %7251 = vpow2.f32 %v3141_v12  ;;  %v9159_v0 = vld [vmem:[#allocation30_spill] sm:$0xff] }
 0x229   :  { %v7242_v17 = vpop.eup %7241  ;;  %v3143_v22 = vmul.f32 1.442695, %v3089_v53  ;;  %3270 = vadd.xlane.f32.xlu0 %v3269_v19  ;;  %3249 = vadd.xlane.f32.xlu1 %v3248_v11  ;;  %v3092_v10 = vsub.f32 %v9159_v0, %v8533_v7  ;;  %v6616_v19 = vld [vmem:[%s9045_s2 + $0xa6] sm:$0x3]  ;;  %v3055_v53 = vpop.permute.xlu0 %3054 }
 0x22a   :  { %7061 = vmatprep.subr.mxu0 %v9117_v50  ;;  %7066 = vmatprep.subr.mxu1 %v9117_v50  ;;  %v3030_v21 = vpop.permute.xlu1 %3029  ;;  %v3275_v43 = vsel %vm2682_vm2, %v7242_v17, 0.0  ;;  %v8583_v32 = vpop.eup %7243 }
 0x22b   :  { %7062 = vmatpush3.msk.msra.mxu0 %vm3647_vm3, %v6613_v33  ;;  %7063 = vmatprep.mubr.msk.f32.mxu0 %vm7340_vm1, %v9117_v50  ;;  %v3091_v55 = vsub.f32 %v9158_v52, %v3030_v21  ;;  %7253 = vpow2.f32 %v3143_v22 }
 0x22c   :  { %7067 = vmatpush3.msk.msra.mxu1 %vm3647_vm3, %v6614_v63  ;;  %7068 = vmatprep.mubr.msk.f32.mxu1 %vm7340_vm1, %v9117_v50  ;;  %7255 = vpow2.f32 %v3145_v38  ;;  %v9161_v63 = vld [vmem:[#allocation32_spill] sm:$0xff] }
 0x22d   :  { %v7246_v27 = vpop.eup %7245  ;;  %7064 = vmatmul.mubr.msk.f32.vlgmr.msra.gmra.mrb[48].mxu0 %vm3643_vm5, %v7242_v17  ;;  %7069 = vmatmul.mubr.msk.f32.vlgmr.msra.gmra.mrb[48].mxu1 %vm3643_vm5, %v8583_v32  ;;  %v3147_v1 = vmul.f32 1.442695, %v3091_v55  ;;  %v3149_v17 = vmul.f32 1.442695, %v3092_v10  ;;  %v3094_v21 = vsub.f32 %v9161_v63, %v8571_v56  ;;  %v6618_v55 = vld [vmem:[%s9045_s2 + $0xaa] sm:$0x3] }
 0x22e   :  { %3276 = vadd.xlane.f32.xlu0 %v3275_v43  ;;  %3255 = vadd.xlane.f32.xlu1 %v3254_v60  ;;  %v3040_v2 = vpop.permute.xlu1 %3039  ;;  %v3281_v7 = vsel %vm2682_vm2, %v7246_v27, 0.0  ;;  %v8608_v11 = vpop.eup %7247  ;;  %v3266_v10 = vsel %vm2682_vm2, %v8527_v48, 0.0  ;;  %v6621_v63 = vld [vmem:[%s9045_s2 + $0xb0] sm:$0x3] }
 0x22f   :  { %7071 = vmatprep.subr.mxu0 %v9117_v50  ;;  %7076 = vmatprep.subr.mxu1 %v9117_v50  ;;  %v3093_v12 = vsub.f32 %v9160_v41, %v3040_v2  ;;  %7257 = vpow2.f32 %v3147_v1  ;;  %v3153_v0 = vmul.f32 1.442695, %v3094_v21  ;;  %v6619_v1 = vld [vmem:[%s9045_s2 + $0xac] sm:$0x3]  ;;  %v9165_v21 = vld [vmem:[#allocation36_spill] sm:$0xff] }
 0x230   :  { %7072 = vmatpush3.msk.msra.mxu0 %vm3647_vm3, %v6615_v15  ;;  %7073 = vmatprep.mubr.msk.f32.mxu0 %vm7340_vm1, %v9117_v50  ;;  %7259 = vpow2.f32 %v3149_v17 }
 0x231   :  { %7077 = vmatpush3.msk.msra.mxu1 %vm3647_vm3, %v6616_v19  ;;  %7078 = vmatprep.mubr.msk.f32.mxu1 %vm7340_vm1, %v9117_v50  ;;  %v7250_v33 = vpop.eup %7249  ;;  %v3151_v52 = vmul.f32 1.442695, %v3093_v12  ;;  %v9163_v19 = vld [vmem:[#allocation34_spill] sm:$0xff] }
 0x232   :  { %7074 = vmatmul.mubr.msk.f32.vlgmr.msra.gmra.mrb[50].mxu0 %vm3643_vm5, %v7246_v27  ;;  %7079 = vmatmul.mubr.msk.f32.vlgmr.msra.gmra.mrb[50].mxu1 %vm3643_vm5, %v8608_v11  ;;  %v3050_v22 = vpop.permute.xlu1 %3049  ;;  %v3065_v27 = vpop.permute.xlu0 %3064  ;;  %v3287_v56 = vsel %vm2682_vm2, %v7250_v33, 0.0  ;;  %v3096_v2 = vsub.f32 %v9163_v19, %v3055_v53  ;;  %v6620_v12 = vld [vmem:[%s9045_s2 + $0xae] sm:$0x3] }
 0x233   :  { %3282 = vadd.xlane.f32.xlu0 %v3281_v7  ;;  %3261 = vadd.xlane.f32.xlu1 %v3260_v45  ;;  %v3095_v43 = vsub.f32 %v9162_v37, %v3050_v22  ;;  %v8633_v38 = vpop.eup %7251  ;;  %7261 = vpow2.f32 %v3151_v52  ;;  %v9164_v7 = vld [vmem:[#allocation35_spill] sm:$0xff]  ;;  %v3272_v22 = vsel %vm2682_vm2, %v8555_v3, 0.0  ;;  %v3098_v52 = vsub.f32 %v9165_v21, %v3065_v27 }
 0x234   :  { %7081 = vmatprep.subr.mxu0 %v9117_v50  ;;  %7086 = vmatprep.subr.mxu1 %v9117_v50  ;;  %7263 = vpow2.f32 %v3153_v0  ;;  %v6622_v37 = vld [vmem:[%s9045_s2 + $0xb2] sm:$0x3]  ;;  %v6623_v0 = vld [vmem:[%s9045_s2 + $0xb4] sm:$0x3] }
 0x235   :  { %7082 = vmatpush3.msk.msra.mxu0 %vm3647_vm3, %v6617_v4  ;;  %7083 = vmatprep.mubr.msk.f32.mxu0 %vm7340_vm1, %v9117_v50  ;;  %v7254_v15 = vpop.eup %7253  ;;  %v3155_v41 = vmul.f32 1.442695, %v3095_v43  ;;  %v3157_v4 = vmul.f32 1.442695, %v3096_v2  ;;  %v3284_v2 = vsel %vm2682_vm2, %v8608_v11, 0.0 }
 0x236   :  { %7087 = vmatpush3.msk.msra.mxu1 %vm3647_vm3, %v6618_v55  ;;  %7088 = vmatprep.mubr.msk.f32.mxu1 %vm7340_vm1, %v9117_v50  ;;  %v3060_v60 = vpop.permute.xlu1 %3059  ;;  %v3293_v48 = vsel %vm2682_vm2, %v7254_v15, 0.0  ;;  %v8657_v53 = vpop.eup %7255 }
 0x237   :  { %7084 = vmatmul.mubr.msk.f32.vlgmr.msra.gmra.mrb[52].mxu0 %vm3643_vm5, %v7250_v33  ;;  %7089 = vmatmul.mubr.msk.f32.vlgmr.msra.gmra.mrb[52].mxu1 %vm3643_vm5, %v8633_v38  ;;  %v3097_v33 = vsub.f32 %v9164_v7, %v3060_v60  ;;  %v8659_v17 = vpop.permute.xlu0 %3421  ;;  %7265 = vpow2.f32 %v3155_v41  ;;  %v6625_v41 = vld [vmem:[%s9045_s2 + $0xb8] sm:$0x3]  ;;  %v6626_v7 = vld [vmem:[%s9045_s2 + $0xba] sm:$0x3] }
 0x238   :  { %3288 = vadd.xlane.f32.xlu0 %v3287_v56  ;;  %3267 = vadd.xlane.f32.xlu1 %v3266_v10  ;;  %7267 = vpow2.f32 %v3157_v4  ;;  %v3161_v56 = vmul.f32 1.442695, %v3098_v52  ;;  %v6624_v10 = vld [vmem:[%s9045_s2 + $0xb6] sm:$0x3]  ;;  %v3290_v4 = vsel %vm2682_vm2, %v8633_v38, 0.0 }
 0x239   :  { %7091 = vmatprep.subr.mxu0 %v9117_v50  ;;  %7096 = vmatprep.subr.mxu1 %v9117_v50  ;;  %v7258_v45 = vpop.eup %7257  ;;  %v3159_v55 = vmul.f32 1.442695, %v3097_v33 }
 0x23a   :  { %7092 = vmatpush3.msk.msra.mxu0 %vm3647_vm3, %v6619_v1  ;;  %7093 = vmatprep.mubr.msk.f32.mxu0 %vm7340_vm1, %v9117_v50  ;;  %v3299_v3 = vsel %vm2682_vm2, %v7258_v45, 0.0  ;;  %v8682_v43 = vpop.eup %7259 }
 0x23b   :  { %7097 = vmatpush3.msk.msra.mxu1 %vm3647_vm3, %v6620_v12  ;;  %7098 = vmatprep.mubr.msk.f32.mxu1 %vm7340_vm1, %v9117_v50  ;;  %v8687_v60 = vpop.permute.xlu0 %3436  ;;  %7269 = vpow2.f32 %v3159_v55 }
 0x23c   :  { %7094 = vmatmul.mubr.msk.f32.vlgmr.msra.gmra.mrb[54].mxu0 %vm3643_vm5, %v7254_v15  ;;  %7099 = vmatmul.mubr.msk.f32.vlgmr.msra.gmra.mrb[54].mxu1 %vm3643_vm5, %v8657_v53  ;;  %v3278_v15 = vsel %vm2682_vm2, %v8583_v32, 0.0  ;;  %7271 = vpow2.f32 %v3161_v56 }
 0x23d   :  { %3294 = vadd.xlane.f32.xlu0 %v3293_v48  ;;  %3273 = vadd.xlane.f32.xlu1 %v3272_v22  ;;  %v7262_v27 = vpop.eup %7261  ;;  %v8727_v48 = vpop.permute.xlu1 %3426  ;;  %v6627_v22 = vld [vmem:[%s9045_s2 + $0xbc] sm:$0x3] }
 0x23e   :  { %7101 = vmatprep.subr.mxu0 %v9117_v50  ;;  %7106 = vmatprep.subr.mxu1 %v9117_v50  ;;  %v3305_v32 = vsel %vm2682_vm2, %v7262_v27, 0.0  ;;  %v7264_v1 = vpop.eup %7263 }
 0x23f   :  { %7102 = vmatpush3.msk.msra.mxu0 %vm3647_vm3, %v6621_v63  ;;  %7103 = vmatprep.mubr.msk.f32.mxu0 %vm7340_vm1, %v9117_v50  ;;  %v8716_v12 = vpop.permute.xlu0 %3446  ;;  %v6628_v63 = vld [vmem:[%s9045_s2 + $0xbe] sm:$0x3] }
 0x240   :  { %7107 = vmatpush3.msk.msra.mxu1 %vm3647_vm3, %v6622_v37  ;;  %7108 = vmatprep.mubr.msk.f32.mxu1 %vm7340_vm1, %v9117_v50  ;;  %v3296_v37 = vsel %vm2682_vm2, %v8657_v53, 0.0 }
 0x241   :  { %7104 = vmatmul.mubr.msk.f32.vlgmr.msra.gmra.mrb[56].mxu0 %vm3643_vm5, %v7258_v45  ;;  %7109 = vmatmul.mubr.msk.f32.vlgmr.msra.gmra.mrb[56].mxu1 %vm3643_vm5, %v8682_v43  ;;  %v7266_v19 = vpop.eup %7265  ;;  %v8753_v55 = vpop.permute.xlu1 %3431 }
 0x242   :  { %3300 = vadd.xlane.f32.xlu0 %v3299_v3  ;;  %3279 = vadd.xlane.f32.xlu1 %v3278_v15  ;;  %v3311_v11 = vsel %vm2682_vm2, %v7266_v19, 0.0  ;;  %v7268_v33 = vpop.eup %7267  ;;  %v3308_v15 = vsel %vm2682_vm2, %v7264_v1, 0.0 }
 0x243   :  { %7111 = vmatprep.subr.mxu0 %v9117_v50  ;;  %7116 = vmatprep.subr.mxu1 %v9117_v50  ;;  %v8742_v21 = vpop.permute.xlu0 %3456 }
 0x244   :  { %7112 = vmatpush3.msk.msra.mxu0 %vm3647_vm3, %v6623_v0  ;;  %7113 = vmatprep.mubr.msk.f32.mxu0 %vm7340_vm1, %v9117_v50 }
 0x245   :  { %7117 = vmatpush3.msk.msra.mxu1 %vm3647_vm3, %v6624_v10  ;;  %7118 = vmatprep.mubr.msk.f32.mxu1 %vm7340_vm1, %v9117_v50  ;;  %v7270_v45 = vpop.eup %7269  ;;  %v8763_v56 = vpop.permute.xlu1 %3441  ;;  %v3314_v10 = vsel %vm2682_vm2, %v7268_v33, 0.0 }
 0x246   :  { %7114 = vmatmul.mubr.msk.f32.vlgmr.msra.gmra.mrb[58].mxu0 %vm3643_vm5, %v7262_v27  ;;  %7119 = vmatmul.mubr.msk.f32.vlgmr.msra.gmra.mrb[58].mxu1 %vm3643_vm5, %v7264_v1  ;;  %v3317_v38 = vsel %vm2682_vm2, %v7270_v45, 0.0  ;;  %v7272_v52 = vpop.eup %7271  ;;  %v3302_v27 = vsel %vm2682_vm2, %v8682_v43, 0.0 }
 0x247   :  { %3306 = vadd.xlane.f32.xlu0 %v3305_v32  ;;  %3285 = vadd.xlane.f32.xlu1 %v3284_v2  ;;  %v8759_v3 = vpop.permute.xlu0 %3466  ;;  %v3320_v43 = vsel %vm2682_vm2, %v7272_v52, 0.0 }
 0x248   :  { %7121 = vmatprep.subr.mxu0 %v9117_v50  ;;  %7126 = vmatprep.subr.mxu1 %v9117_v50 }
 0x249   :  { %7122 = vmatpush3.msk.msra.mxu0 %vm3647_vm3, %v6625_v41  ;;  %7123 = vmatprep.mubr.msk.f32.mxu0 %vm7340_vm1, %v9117_v50  ;;  %v8771_v53 = vpop.permute.xlu1 %3451 }
 0x24a   :  { %7127 = vmatpush3.msk.msra.mxu1 %vm3647_vm3, %v6626_v7  ;;  %7128 = vmatprep.mubr.msk.f32.mxu1 %vm7340_vm1, %v9117_v50 }
 0x24b   :  { %7124 = vmatmul.mubr.msk.f32.vlgmr.msra.gmra.mrb[60].mxu0 %vm3643_vm5, %v7266_v19  ;;  %7129 = vmatmul.mubr.msk.f32.vlgmr.msra.gmra.mrb[60].mxu1 %vm3643_vm5, %v7268_v33  ;;  %v8769_v0 = vpop.permute.xlu0 %3476 }
 0x24c   :  { %3312 = vadd.xlane.f32.xlu0 %v3311_v11  ;;  %3291 = vadd.xlane.f32.xlu1 %v3290_v4 }
 0x24d   :  { %7131 = vmatprep.subr.mxu0 %v9117_v50  ;;  %7136 = vmatprep.subr.mxu1 %v9117_v50  ;;  %v8777_v19 = vpop.permute.xlu1 %3461 }
 0x24e   :  { %7132 = vmatpush3.msk.msra.mxu0 %vm3647_vm3, %v6627_v22  ;;  %7133 = vmatprep.mubr.msk.f32.mxu0 %vm7340_vm1, %v9117_v50 }
 0x24f   :  { %7137 = vmatpush3.msk.msra.mxu1 %vm3647_vm3, %v6628_v63  ;;  %7138 = vmatprep.mubr.msk.f32.mxu1 %vm7340_vm1, %v9117_v50  ;;  %v2905_v50 = vmul.f32 1.442695, %v2842_v36  ;;  %v8774_v32 = vpop.permute.xlu0 %3486 }
 0x250   :  { %7134 = vmatmul.mubr.msk.f32.vlgmr.msra.gmra.mrb[62].mxu0 %vm3643_vm5, %v7270_v45  ;;  %7139 = vmatmul.mubr.msk.f32.vlgmr.msra.gmra.mrb[62].mxu1 %vm3643_vm5, %v7272_v52 }
 0x251   :  { %3318 = vadd.xlane.f32.xlu0 %v3317_v38  ;;  %3297 = vadd.xlane.f32.xlu1 %v3296_v37  ;;  %7273 = vpow2.f32 %v2905_v50  ;;  %v8784_v36 = vpop.permute.xlu1 %3471 }
 0x253   :  { %v8779_v9 = vpop.permute.xlu0 %3496 }
 0x255   :  { %3303 = vadd.xlane.f32.xlu1 %v3302_v27  ;;  %v8788_v2 = vpop.permute.xlu1 %3481  ;;  %v3164_v27 = vld [vmem:[#allocation3 + $0x2] sm:$0x3] }
 0x257   :  { %v8786_v1 = vpop.permute.xlu0 %3506 }
 0x258   :  { %9166 = vst [vmem:[#allocation37_spill] sm:$0xff] %v8786_v1 }
 0x259   :  { %3309 = vadd.xlane.f32.xlu1 %v3308_v15  ;;  %v8792_v7 = vpop.permute.xlu1 %3491  ;;  %v3196_v15 = vmul.f32 %v8247_v8, %v3164_v27 }
 0x25b   :  { %v8781_v49 = vpop.eup %7273  ;;  %v8790_v41 = vpop.permute.xlu0 %3516 }
 0x25c   :  { %9167 = vst [vmem:[#allocation38_spill] sm:$0xff] %v8790_v41 }
 0x25d   :  { %3315 = vadd.xlane.f32.xlu1 %v3314_v10  ;;  %v8796_v33 = vpop.permute.xlu1 %3501 }
 0x25e   :  { %9169 = vst [vmem:[#allocation6_spill] sm:$0xff] %v8796_v33  ;;  %v3169_v33 = vld [vmem:[#allocation3 + $0xc] sm:$0x3] }
 0x25f   :  { %v8794_v11 = vpop.permute.xlu0 %3526  ;;  %v3201_v8 = vmul.f32 %v8280_v25, %v3169_v33 }
 0x260   :  { %9168 = vst [vmem:[#allocation5_spill] sm:$0xff] %v8794_v11 }
 0x261   :  { %3321 = vadd.xlane.f32.xlu1 %v3320_v43  ;;  %v8800_v4 = vpop.permute.xlu1 %3511  ;;  %v3165_v43 = vld [vmem:[#allocation3 + $0x4] sm:$0x3] }
 0x262   :  { %9171 = vst [vmem:[#allocation8_spill] sm:$0xff] %v8800_v4  ;;  %v3197_v11 = vmul.f32 %v8258_v46, %v3165_v43  ;;  %v3167_v4 = vld [vmem:[#allocation3 + $0x8] sm:$0x3] }
 0x263   :  { %v8798_v45 = vpop.permute.xlu0 %3536 }
 0x264   :  { %9170 = vst [vmem:[#allocation7_spill] sm:$0xff] %v8798_v45 }
 0x265   :  { %v8804_v63 = vpop.permute.xlu1 %3521 }
 0x266   :  { %9173 = vst [vmem:[#allocation10_spill] sm:$0xff] %v8804_v63 }
 0x267   :  { %3576 = vperm.xlu0 %7145, %v8781_v49   ;;  %v8802_v22 = vpop.permute.xlu0 %3546 }
 0x268   :  { %9172 = vst [vmem:[#allocation9_spill] sm:$0xff] %v8802_v22 }
 0x269   :  { %v8808_v52 = vpop.permute.xlu1 %3531 }
 0x26a   :  { %9175 = vst [vmem:[#allocation14_spill] sm:$0xff] %v8808_v52  ;;  %v3199_v52 = vmul.f32 %v8269_v54, %v3167_v4 }
 0x26b   :  { %v8806_v38 = vpop.permute.xlu0 %3556 }
 0x26c   :  { %9174 = vst [vmem:[#allocation11_spill] sm:$0xff] %v8806_v38 }
 0x26d   :  { %v8812_v50 = vpop.permute.xlu1 %3541 }
 0x26e   :  { %9177 = vst [vmem:[#allocation16_spill] sm:$0xff] %v8812_v50 }
 0x26f   :  { %v8810_v37 = vpop.permute.xlu0 %3566 }
 0x270   :  { %9176 = vst [vmem:[#allocation12_spill] sm:$0xff] %v8810_v37 }
 0x271   :  { %v8816_v63 = vpop.permute.xlu1 %3551 }
 0x275   :  { %v8819_v1 = vpop.permute.xlu1 %3561 }
 0x279   :  { %v8822_v27 = vpop.permute.xlu1 %3571 }
 0x296   :  { %v3232_v10 = vpop.xlane.xlu0 %3231 }
 0x297   :  { %v3324_v45 = vadd.f32 %v3232_v10, %v3196_v15  ;;  %v3163_v15 = vld [vmem:[#allocation3] sm:$0x3]  ;;  %v3173_v10 = vld [vmem:[#allocation3 + $0x14] sm:$0x3] }
 0x298   :  { %v3205_v33 = vmul.f32 %v8302_v18, %v3173_v10 }
 0x299   :  { %3356 = vst [vmem:[#allocation3 + $0x2] sm:$0x3] %v3324_v45 }
 0x29a   :  { %v3235_v22 = vpop.xlane.xlu0 %3234 }
 0x29b   :  { %v3325_v38 = vadd.f32 %v3235_v22, %v3197_v11  ;;  %v3171_v11 = vld [vmem:[#allocation3 + $0x10] sm:$0x3]  ;;  %v3195_v22 = vmul.f32 %v8220_v39, %v3163_v15 }
 0x29c   :  { %v3203_v54 = vmul.f32 %v8291_v30, %v3171_v11  ;;  %v3175_v30 = vld [vmem:[#allocation3 + $0x18] sm:$0x3] }
 0x29d   :  { %3357 = vst [vmem:[#allocation3 + $0x4] sm:$0x3] %v3325_v38  ;;  %v3207_v11 = vmul.f32 %v8313_v40, %v3175_v30 }
 0x29e   :  { %v3241_v37 = vpop.xlane.xlu0 %3240 }
 0x29f   :  { %v3327_v41 = vadd.f32 %v3241_v37, %v3199_v52  ;;  %v3166_v37 = vld [vmem:[#allocation3 + $0x6] sm:$0x3] }
 0x2a0   :  { %v6178_v50 = vld [vmem:[#allocation3 + $0x2] sm:$0x3]  ;;  %v3198_v25 = vmul.f32 %v8229_v26, %v3166_v37  ;;  %v3170_v26 = vld [vmem:[#allocation3 + $0xe] sm:$0x3]  ;;  %v3177_v37 = vld [vmem:[#allocation3 + $0x1c] sm:$0x3] }
 0x2a1   :  { %7275 = vrcp.f32 %v6178_v50  ;;  %3359 = vst [vmem:[#allocation3 + $0x8] sm:$0x3] %v3327_v41  ;;  %v3202_v10 = vmul.f32 %v8249_v20, %v3170_v26 }
 0x2a2   :  { %v3247_v45 = vpop.xlane.xlu0 %3246 }
 0x2a3   :  { %v3329_v46 = vadd.f32 %v3247_v45, %v3201_v8 }
 0x2a4   :  { %v6179_v18 = vld [vmem:[#allocation3 + $0x4] sm:$0x3] }
 0x2a5   :  { %3361 = vst [vmem:[#allocation3 + $0xc] sm:$0x3] %v3329_v46  ;;  %v3168_v46 = vld [vmem:[#allocation3 + $0xa] sm:$0x3] }
 0x2a6   :  { %v3200_v15 = vmul.f32 %v8238_v29, %v3168_v46 }
 0x2a8   :  { %v3229_v38 = vpop.xlane.xlu1 %3228  ;;  %v3253_v52 = vpop.xlane.xlu0 %3252 }
 0x2a9   :  { %v3323_v50 = vadd.f32 %v3229_v38, %v3195_v22  ;;  %v3331_v41 = vadd.f32 %v3253_v52, %v3203_v54 }
 0x2ab   :  { %v7276_v4 = vpop.eup %7275  ;;  %3355 = vst [vmem:[#allocation3] sm:$0x3] %v3323_v50  ;;  %3363 = vst [vmem:[#allocation3 + $0x10] sm:$0x3] %v3331_v41  ;;  %v3209_v50 = vmul.f32 %v8324_v58, %v3177_v37 }
 0x2ac   :  { %6280 = vperm.xlu0 %7145, %v7276_v4   ;;  %v3238_v43 = vpop.xlane.xlu1 %3237  ;;  %v3259_v8 = vpop.xlane.xlu0 %3258 }
 0x2ad   :  { %v3326_v45 = vadd.f32 %v3238_v43, %v3198_v25  ;;  %v3333_v39 = vadd.f32 %v3259_v8, %v3205_v33  ;;  %v3172_v43 = vld [vmem:[#allocation3 + $0x12] sm:$0x3]  ;;  %v3179_v8 = vld [vmem:[#allocation3 + $0x20] sm:$0x3] }
 0x2ae   :  { %v3211_v46 = vmul.f32 %v8333_v34, %v3179_v8 }
 0x2af   :  { %3358 = vst [vmem:[#allocation3 + $0x6] sm:$0x3] %v3326_v45  ;;  %3365 = vst [vmem:[#allocation3 + $0x14] sm:$0x3] %v3333_v39  ;;  %v6181_v45 = vld [vmem:[#allocation3 + $0x8] sm:$0x3]  ;;  %v3204_v39 = vmul.f32 %v8260_v14, %v3172_v43 }
 0x2b1   :  { %v3244_v22 = vpop.xlane.xlu1 %3243  ;;  %v3265_v54 = vpop.xlane.xlu0 %3264 }
 0x2b2   :  { %v6177_v4 = vld [vmem:[#allocation3] sm:$0x3]  ;;  %v3328_v38 = vadd.f32 %v3244_v22, %v3200_v15  ;;  %v3335_v52 = vadd.f32 %v3265_v54, %v3207_v11  ;;  %v6183_v15 = vld [vmem:[#allocation3 + $0xc] sm:$0x3]  ;;  %v3174_v54 = vld [vmem:[#allocation3 + $0x16] sm:$0x3] }
 0x2b3   :  { %7277 = vrcp.f32 %v6177_v4  ;;  %v3181_v4 = vld [vmem:[#allocation3 + $0x24] sm:$0x3]  ;;  %v6185_v26 = vld [vmem:[#allocation3 + $0x10] sm:$0x3] }
 0x2b4   :  { %3360 = vst [vmem:[#allocation3 + $0xa] sm:$0x3] %v3328_v38  ;;  %3367 = vst [vmem:[#allocation3 + $0x18] sm:$0x3] %v3335_v52  ;;  %7279 = vrcp.f32 %v6179_v18  ;;  %v3206_v52 = vmul.f32 %v8271_v61, %v3174_v54  ;;  %v3213_v14 = vmul.f32 %v8342_v24, %v3181_v4 }
 0x2b6   :  { %v6180_v41 = vld [vmem:[#allocation3 + $0x6] sm:$0x3]  ;;  %v3250_v29 = vpop.xlane.xlu1 %3249  ;;  %v3271_v25 = vpop.xlane.xlu0 %3270 }
 0x2b7   :  { %7281 = vrcp.f32 %v6180_v41  ;;  %v3330_v40 = vadd.f32 %v3250_v29, %v3202_v10  ;;  %v3337_v33 = vadd.f32 %v3271_v25, %v3209_v50  ;;  %v3176_v25 = vld [vmem:[#allocation3 + $0x1a] sm:$0x3] }
 0x2b8   :  { %7283 = vrcp.f32 %v6181_v45  ;;  %v3208_v61 = vmul.f32 %v8282_v42, %v3176_v25  ;;  %v3387_v42 = vld [vmem:[#allocation4] sm:$0x3] }
 0x2b9   :  { %3362 = vst [vmem:[#allocation3 + $0xe] sm:$0x3] %v3330_v40  ;;  %3369 = vst [vmem:[#allocation3 + $0x1c] sm:$0x3] %v3337_v33  ;;  %v3183_v40 = vld [vmem:[#allocation3 + $0x28] sm:$0x3] }
 0x2ba   :  { %v6187_v33 = vld [vmem:[#allocation3 + $0x14] sm:$0x3]  ;;  %v3215_v24 = vmul.f32 %v8351_v23, %v3183_v40 }
 0x2bb   :  { %v6182_v20 = vld [vmem:[#allocation3 + $0xa] sm:$0x3]  ;;  %v3256_v30 = vpop.xlane.xlu1 %3255  ;;  %v3277_v58 = vpop.xlane.xlu0 %3276 }
 0x2bc   :  { %7285 = vrcp.f32 %v6182_v20  ;;  %v3332_v11 = vadd.f32 %v3256_v30, %v3204_v39  ;;  %v3339_v22 = vadd.f32 %v3277_v58, %v3211_v46  ;;  %v3178_v58 = vld [vmem:[#allocation3 + $0x1e] sm:$0x3] }
 0x2bd   :  { %v7278_v38 = vpop.eup %7277  ;;  %7287 = vrcp.f32 %v6183_v15  ;;  %v3185_v15 = vld [vmem:[#allocation3 + $0x2c] sm:$0x3]  ;;  %v3210_v23 = vmul.f32 %v8293_v28, %v3178_v58 }
 0x2be   :  { %3364 = vst [vmem:[#allocation3 + $0x12] sm:$0x3] %v3332_v11  ;;  %3371 = vst [vmem:[#allocation3 + $0x20] sm:$0x3] %v3339_v22  ;;  %6275 = vperm.xlu1 %7146, %v7278_v38   ;;  %v7280_v34 = vpop.eup %7279  ;;  %v6189_v11 = vld [vmem:[#allocation3 + $0x18] sm:$0x3]  ;;  %v3217_v54 = vmul.f32 %v8360_v31, %v3185_v15 }
 0x2c0   :  { %v6184_v37 = vld [vmem:[#allocation3 + $0xe] sm:$0x3]  ;;  %v3262_v18 = vpop.xlane.xlu1 %3261  ;;  %v3283_v10 = vpop.xlane.xlu0 %3282 }
 0x2c1   :  { %v7282_v50 = vpop.eup %7281  ;;  %7289 = vrcp.f32 %v6184_v37  ;;  %v3334_v41 = vadd.f32 %v3262_v18, %v3206_v52  ;;  %v3341_v29 = vadd.f32 %v3283_v10, %v3213_v14  ;;  %v3180_v37 = vld [vmem:[#allocation3 + $0x22] sm:$0x3]  ;;  %v3187_v18 = vld [vmem:[#allocation3 + $0x30] sm:$0x3]  ;;  %v3579_v10 = vmul.f32 %v8659_v17, %v3387_v42 }
 0x2c2   :  { %6290 = vperm.xlu0 %7145, %v7282_v50   ;;  %6285 = vperm.xlu1 %7146, %v7280_v34   ;;  %7291 = vrcp.f32 %v6185_v26  ;;  %v7284_v43 = vpop.eup %7283  ;;  %v6191_v50 = vld [vmem:[#allocation3 + $0x1c] sm:$0x3]  ;;  %v3212_v31 = vmul.f32 %v8304_v16, %v3180_v37  ;;  %v3219_v25 = vmul.f32 %v8369_v51, %v3187_v18  ;;  %v3389_v51 = vld [vmem:[#allocation4 + $0x4] sm:$0x3]  ;;  %v3184_v37 = vld [vmem:[#allocation3 + $0x2a] sm:$0x3] }
 0x2c3   :  { %3366 = vst [vmem:[#allocation3 + $0x16] sm:$0x3] %v3334_v41  ;;  %3373 = vst [vmem:[#allocation3 + $0x24] sm:$0x3] %v3341_v29  ;;  %v3388_v29 = vld [vmem:[#allocation4 + $0x2] sm:$0x3] }
 0x2c4   :  { %v3580_v17 = vmul.f32 %v8727_v48, %v3388_v29  ;;  %v3191_v18 = vld [vmem:[#allocation3 + $0x38] sm:$0x3] }
 0x2c5   :  { %v6186_v8 = vld [vmem:[#allocation3 + $0x12] sm:$0x3]  ;;  %v3268_v45 = vpop.xlane.xlu1 %3267  ;;  %v3289_v39 = vpop.xlane.xlu0 %3288  ;;  %v3223_v29 = vmul.f32 %v8377_v35, %v3191_v18 }
 0x2c6   :  { %v7286_v46 = vpop.eup %7285  ;;  %7293 = vrcp.f32 %v6186_v8  ;;  %v3336_v20 = vadd.f32 %v3268_v45, %v3208_v61  ;;  %v3343_v30 = vadd.f32 %v3289_v39, %v3215_v24  ;;  %6295 = vperm.xlu1 %7146, %v7284_v43   ;;  %v6193_v45 = vld [vmem:[#allocation3 + $0x20] sm:$0x3] }
 0x2c7   :  { %7295 = vrcp.f32 %v6187_v33  ;;  %6300 = vperm.xlu0 %7145, %v7286_v46   ;;  %v7288_v22 = vpop.eup %7287 }
 0x2c8   :  { %3368 = vst [vmem:[#allocation3 + $0x1a] sm:$0x3] %v3336_v20  ;;  %3375 = vst [vmem:[#allocation3 + $0x28] sm:$0x3] %v3343_v30  ;;  %7297 = vrcp.f32 %v6189_v11  ;;  %v3182_v20 = vld [vmem:[#allocation3 + $0x26] sm:$0x3] }
 0x2c9   :  { %v3189_v30 = vld [vmem:[#allocation3 + $0x34] sm:$0x3]  ;;  %v3214_v48 = vmul.f32 %v8315_v59, %v3182_v20 }
 0x2ca   :  { %v6188_v4 = vld [vmem:[#allocation3 + $0x16] sm:$0x3]  ;;  %v3274_v38 = vpop.xlane.xlu1 %3273  ;;  %v3295_v52 = vpop.xlane.xlu0 %3294  ;;  %6305 = vperm.xlu1 %7146, %v7288_v22   ;;  %v3221_v22 = vmul.f32 %v8373_v47, %v3189_v30  ;;  %v3392_v30 = vld [vmem:[#allocation4 + $0xa] sm:$0x3] }
 0x2cb   :  { %v7290_v14 = vpop.eup %7289  ;;  %7299 = vrcp.f32 %v6188_v4  ;;  %v3338_v34 = vadd.f32 %v3274_v38, %v3210_v23  ;;  %v3345_v26 = vadd.f32 %v3295_v52, %v3217_v54  ;;  %v3581_v23 = vmul.f32 %v8753_v55, %v3389_v51  ;;  %v6195_v54 = vld [vmem:[#allocation3 + $0x24] sm:$0x3] }
 0x2cc   :  { %6310 = vperm.xlu0 %7145, %v7290_v14   ;;  %v7292_v41 = vpop.eup %7291  ;;  %7301 = vrcp.f32 %v6191_v50  ;;  %v3390_v50 = vld [vmem:[#allocation4 + $0x6] sm:$0x3] }
 0x2cd   :  { %3370 = vst [vmem:[#allocation3 + $0x1e] sm:$0x3] %v3338_v34  ;;  %3377 = vst [vmem:[#allocation3 + $0x2c] sm:$0x3] %v3345_v26  ;;  %v3717_v28 = vpop.f32.mrb[32].mxu0 }
 0x2ce   :  { %v6077_v40 = vadd.f32 %v3717_v28, %v3579_v10  ;;  %6315 = vperm.xlu1 %7146, %v7292_v41   ;;  %v6985_v33 = vpop.f32.mrb[33].mxu0  ;;  %v3216_v41 = vmul.f32 %v8326_v44, %v3184_v37  ;;  %v3190_v37 = vld [vmem:[#allocation3 + $0x36] sm:$0x3] }
 0x2cf   :  { %v6190_v61 = vld [vmem:[#allocation3 + $0x1a] sm:$0x3]  ;;  %v3280_v24 = vpop.xlane.xlu1 %3279  ;;  %v3301_v43 = vpop.xlane.xlu0 %3300  ;;  %v6197_v55 = vld [vmem:[#allocation3 + $0x28] sm:$0x3] }
 0x2d0   :  { %v7294_v8 = vpop.eup %7293  ;;  %7303 = vrcp.f32 %v6190_v61  ;;  %v3340_v39 = vadd.f32 %v3280_v24, %v3212_v31  ;;  %v3347_v46 = vadd.f32 %v3301_v43, %v3219_v25  ;;  %6110 = vst.msk [vmem:[#allocation4] sm:$0x3] %vm88_vm4, %v6077_v40  ;;  %v3582_v31 = vmul.f32 %v8687_v60, %v3390_v50  ;;  %v3391_v25 = vld [vmem:[#allocation4 + $0x8] sm:$0x3] }
 0x2d1   :  { %v7296_v16 = vpop.eup %7295  ;;  %6320 = vperm.xlu0 %7145, %v7294_v8   ;;  %v3793_v58 = vpop.f32.mrb[32].mxu1  ;;  %7305 = vrcp.f32 %v6193_v45  ;;  %v3193_v45 = vld [vmem:[#allocation3 + $0x3c] sm:$0x3]  ;;  %v3583_v20 = vmul.f32 %v8763_v56, %v3391_v25  ;;  %v3192_v25 = vld [vmem:[#allocation3 + $0x3a] sm:$0x3] }
 0x2d2   :  { %3372 = vst [vmem:[#allocation3 + $0x22] sm:$0x3] %v3340_v39  ;;  %3379 = vst [vmem:[#allocation3 + $0x30] sm:$0x3] %v3347_v46  ;;  %v6078_v15 = vadd.f32 %v3793_v58, %v3580_v17  ;;  %v6990_v11 = vpop.f32.mrb[33].mxu1  ;;  %6325 = vperm.xlu1 %7146, %v7296_v16   ;;  %v7298_v42 = vpop.eup %7297  ;;  %v3225_v51 = vmul.f32 %v8381_v62, %v3193_v45 }
 0x2d3   :  { %v3186_v17 = vld [vmem:[#allocation3 + $0x2e] sm:$0x3]  ;;  %v3396_v45 = vld [vmem:[#allocation4 + $0x12] sm:$0x3] }
 0x2d4   :  { %v6192_v4 = vld [vmem:[#allocation3 + $0x1e] sm:$0x3]  ;;  %v3286_v38 = vpop.xlane.xlu1 %3285  ;;  %v3307_v52 = vpop.xlane.xlu0 %3306  ;;  %6111 = vst.msk [vmem:[#allocation4 + $0x2] sm:$0x3] %vm88_vm4, %v6078_v15  ;;  %v6199_v44 = vld [vmem:[#allocation3 + $0x2c] sm:$0x3]  ;;  %v3218_v16 = vmul.f32 %v8335_v57, %v3186_v17 }
 0x2d5   :  { %v7300_v14 = vpop.eup %7299  ;;  %7307 = vrcp.f32 %v6192_v4  ;;  %v3342_v34 = vadd.f32 %v3286_v38, %v3214_v48  ;;  %v3349_v26 = vadd.f32 %v3307_v52, %v3221_v22  ;;  %v3869_v10 = vpop.f32.mrb[34].mxu0  ;;  %v3188_v22 = vld [vmem:[#allocation3 + $0x32] sm:$0x3]  ;;  %v3584_v38 = vmul.f32 %v8716_v12, %v3392_v30  ;;  %v3393_v52 = vld [vmem:[#allocation4 + $0xc] sm:$0x3] }
 0x2d6   :  { %6330 = vperm.xlu0 %7145, %v7300_v14   ;;  %v6079_v59 = vadd.f32 %v3869_v10, %v3581_v23  ;;  %6335 = vperm.xlu1 %7146, %v7298_v42   ;;  %v6995_v47 = vpop.f32.mrb[35].mxu0  ;;  %7309 = vrcp.f32 %v6195_v54  ;;  %v7302_v28 = vpop.eup %7301  ;;  %v3220_v14 = vmul.f32 %v8344_v5, %v3188_v22  ;;  %v3222_v5 = vmul.f32 %v8353_v6, %v3190_v37  ;;  %v3399_v37 = vld [vmem:[#allocation4 + $0x18] sm:$0x3] }
 0x2d7   :  { %3374 = vst [vmem:[#allocation3 + $0x26] sm:$0x3] %v3342_v34  ;;  %3381 = vst [vmem:[#allocation3 + $0x34] sm:$0x3] %v3349_v26  ;;  %v3585_v47 = vmul.f32 %v8771_v53, %v3393_v52  ;;  %v3224_v6 = vmul.f32 %v8362_v13, %v3192_v25  ;;  %v3588_v30 = vmul.f32 %v8759_v3, %v3396_v45  ;;  %v3397_v13 = vld [vmem:[#allocation4 + $0x14] sm:$0x3] }
 0x2d8   :  { %6112 = vst.msk [vmem:[#allocation4 + $0x4] sm:$0x3] %vm88_vm4, %v6079_v59  ;;  %v3404_v45 = vld [vmem:[#allocation4 + $0x22] sm:$0x3] }
 0x2d9   :  { %v6194_v40 = vld [vmem:[#allocation3 + $0x22] sm:$0x3]  ;;  %v3292_v33 = vpop.xlane.xlu1 %3291  ;;  %v3313_v61 = vpop.xlane.xlu0 %3312  ;;  %v6201_v57 = vld [vmem:[#allocation3 + $0x30] sm:$0x3] }
 0x2da   :  { %v7304_v24 = vpop.eup %7303  ;;  %7311 = vrcp.f32 %v6194_v40  ;;  %v3344_v43 = vadd.f32 %v3292_v33, %v3216_v41  ;;  %v3351_v8 = vadd.f32 %v3313_v61, %v3223_v29  ;;  %v3945_v39 = vpop.f32.mrb[34].mxu1  ;;  %6345 = vperm.xlu1 %7146, %v7302_v28   ;;  %v3394_v29 = vld [vmem:[#allocation4 + $0xe] sm:$0x3] }
 0x2db   :  { %7313 = vrcp.f32 %v6197_v55  ;;  %6340 = vperm.xlu0 %7145, %v7304_v24   ;;  %v6080_v35 = vadd.f32 %v3945_v39, %v3582_v31  ;;  %v7000_v46 = vpop.f32.mrb[35].mxu1  ;;  %v7306_v60 = vpop.eup %7305  ;;  %v3586_v53 = vmul.f32 %v8742_v21, %v3394_v29  ;;  %v3395_v39 = vld [vmem:[#allocation4 + $0x10] sm:$0x3] }
 0x2dc   :  { %3376 = vst [vmem:[#allocation3 + $0x2a] sm:$0x3] %v3344_v43  ;;  %3383 = vst [vmem:[#allocation3 + $0x38] sm:$0x3] %v3351_v8  ;;  %7315 = vrcp.f32 %v6199_v44  ;;  %v3194_v46 = vld [vmem:[#allocation3 + $0x3e] sm:$0x3] }
 0x2dd   :  { %6113 = vst.msk [vmem:[#allocation4 + $0x6] sm:$0x3] %vm88_vm4, %v6080_v35  ;;  %v4021_v58 = vpop.f32.mrb[36].mxu0 }
 0x2de   :  { %v6196_v15 = vld [vmem:[#allocation3 + $0x26] sm:$0x3]  ;;  %v3298_v11 = vpop.xlane.xlu1 %3297  ;;  %v3319_v48 = vpop.xlane.xlu0 %3318  ;;  %v6081_v42 = vadd.f32 %v4021_v58, %v3583_v20  ;;  %6355 = vperm.xlu1 %7146, %v7306_v60   ;;  %v6203_v55 = vld [vmem:[#allocation3 + $0x34] sm:$0x3] }
 0x2df   :  { %v7308_v23 = vpop.eup %7307  ;;  %7317 = vrcp.f32 %v6196_v15  ;;  %v3346_v56 = vadd.f32 %v3298_v11, %v3218_v16  ;;  %v3353_v54 = vadd.f32 %v3319_v48, %v3225_v51  ;;  %v7005_v4 = vpop.f32.mrb[37].mxu0  ;;  %v3587_v16 = vmul.f32 %v8777_v19, %v3395_v39  ;;  %v3398_v11 = vld [vmem:[#allocation4 + $0x16] sm:$0x3]  ;;  %v3403_v39 = vld [vmem:[#allocation4 + $0x20] sm:$0x3] }
 0x2e0   :  { %6350 = vperm.xlu0 %7145, %v7308_v23   ;;  %6114 = vst.msk [vmem:[#allocation4 + $0x8] sm:$0x3] %vm88_vm4, %v6081_v42  ;;  %v7310_v62 = vpop.eup %7309  ;;  %7319 = vrcp.f32 %v6201_v57  ;;  %v3226_v48 = vmul.f32 %v8781_v49, %v3194_v46  ;;  %v3590_v57 = vmul.f32 %v8769_v0, %v3398_v11 }
 0x2e1   :  { %3378 = vst [vmem:[#allocation3 + $0x2e] sm:$0x3] %v3346_v56  ;;  %3385 = vst [vmem:[#allocation3 + $0x3c] sm:$0x3] %v3353_v54  ;;  %v4097_v34 = vpop.f32.mrb[36].mxu1 }
 0x2e2   :  { %v3304_v26 = vpop.xlane.xlu1 %3303  ;;  %v6082_v18 = vadd.f32 %v4097_v34, %v3584_v38  ;;  %v7010_v10 = vpop.f32.mrb[37].mxu1  ;;  %6365 = vperm.xlu1 %7146, %v7310_v62   ;;  %v3589_v62 = vmul.f32 %v8784_v36, %v3397_v13 }
 0x2e3   :  { %v6198_v50 = vld [vmem:[#allocation3 + $0x2a] sm:$0x3]  ;;  %v3348_v59 = vadd.f32 %v3304_v26, %v3220_v14  ;;  %v6205_v43 = vld [vmem:[#allocation3 + $0x38] sm:$0x3]  ;;  %v3400_v26 = vld [vmem:[#allocation4 + $0x1a] sm:$0x3] }
 0x2e4   :  { %v7312_v12 = vpop.eup %7311  ;;  %7321 = vrcp.f32 %v6198_v50  ;;  %6115 = vst.msk [vmem:[#allocation4 + $0xa] sm:$0x3] %vm88_vm4, %v6082_v18 }
 0x2e5   :  { %v7314_v41 = vpop.eup %7313  ;;  %3380 = vst [vmem:[#allocation3 + $0x32] sm:$0x3] %v3348_v59  ;;  %6360 = vperm.xlu0 %7145, %v7312_v12   ;;  %v4173_v28 = vpop.f32.mrb[38].mxu0  ;;  %7323 = vrcp.f32 %v6203_v55  ;;  %v3591_v55 = vmul.f32 %v8788_v2, %v3399_v37 }
 0x2e6   :  { %v3310_v31 = vpop.xlane.xlu1 %3309  ;;  %v6083_v40 = vadd.f32 %v4173_v28, %v3585_v47  ;;  %6375 = vperm.xlu1 %7146, %v7314_v41   ;;  %v7015_v61 = vpop.f32.mrb[39].mxu0  ;;  %v3592_v47 = vmul.f32 %v8774_v32, %v3400_v26  ;;  %v3402_v28 = vld [vmem:[#allocation4 + $0x1e] sm:$0x3]  ;;  %v9183_v26 = vld [vmem:[#allocation10_spill] sm:$0xff] }
 0x2e7   :  { %v3350_v33 = vadd.f32 %v3310_v31, %v3222_v5  ;;  %v7316_v24 = vpop.eup %7315  ;;  %v3401_v31 = vld [vmem:[#allocation4 + $0x1c] sm:$0x3]  ;;  %v3594_v32 = vmul.f32 %v8779_v9, %v3402_v28 }
 0x2e8   :  { %v6200_v8 = vld [vmem:[#allocation3 + $0x2e] sm:$0x3]  ;;  %6116 = vst.msk [vmem:[#allocation4 + $0xc] sm:$0x3] %vm88_vm4, %v6083_v40  ;;  %v6207_v51 = vld [vmem:[#allocation3 + $0x3c] sm:$0x3]  ;;  %v3593_v2 = vmul.f32 %v8792_v7, %v3401_v31 }
 0x2e9   :  { %v7318_v17 = vpop.eup %7317  ;;  %7325 = vrcp.f32 %v6200_v8  ;;  %3382 = vst [vmem:[#allocation3 + $0x36] sm:$0x3] %v3350_v33  ;;  %v4249_v44 = vpop.f32.mrb[38].mxu1 }
 0x2ea   :  { %v3316_v35 = vpop.xlane.xlu1 %3315  ;;  %6370 = vperm.xlu0 %7145, %v7318_v17   ;;  %v6084_v20 = vadd.f32 %v4249_v44, %v3586_v53  ;;  %v7020_v60 = vpop.f32.mrb[39].mxu1  ;;  %6385 = vperm.xlu1 %7146, %v7316_v24   ;;  %7327 = vrcp.f32 %v6205_v43 }
 0x2eb   :  { %v3352_v21 = vadd.f32 %v3316_v35, %v3224_v6  ;;  %v7320_v15 = vpop.eup %7319  ;;  %v9178_v60 = vld [vmem:[#allocation37_spill] sm:$0xff] }
 0x2ec   :  { %v6202_v58 = vld [vmem:[#allocation3 + $0x32] sm:$0x3]  ;;  %6117 = vst.msk [vmem:[#allocation4 + $0xe] sm:$0x3] %vm88_vm4, %v6084_v20  ;;  %v3596_v9 = vmul.f32 %v9178_v60, %v3404_v45 }
 0x2ed   :  { %7329 = vrcp.f32 %v6202_v58  ;;  %3384 = vst [vmem:[#allocation3 + $0x3a] sm:$0x3] %v3352_v21  ;;  %v4325_v22 = vpop.f32.mrb[40].mxu0  ;;  %v4401_v42 = vpop.f32.mrb[40].mxu1  ;;  %v9179_v21 = vld [vmem:[#allocation6_spill] sm:$0xff]  ;;  %v9188_v60 = vld [vmem:[#allocation11_spill] sm:$0xff] }
 0x2ee   :  { %v7322_v23 = vpop.eup %7321  ;;  %v3322_v56 = vpop.xlane.xlu1 %3321  ;;  %v6085_v54 = vadd.f32 %v4325_v22, %v3587_v16  ;;  %v6086_v4 = vadd.f32 %v4401_v42, %v3588_v30  ;;  %6395 = vperm.xlu1 %7146, %v7320_v15   ;;  %7331 = vrcp.f32 %v6207_v51  ;;  %v3595_v7 = vmul.f32 %v9179_v21, %v3403_v39  ;;  %v3406_v51 = vld [vmem:[#allocation4 + $0x26] sm:$0x3]  ;;  %v3405_v58 = vld [vmem:[#allocation4 + $0x24] sm:$0x3]  ;;  %v9180_v42 = vld [vmem:[#allocation38_spill] sm:$0xff] }
 0x2ef   :  { %v7030_v3 = vpop.f32.mrb[41].mxu1  ;;  %v3354_v19 = vadd.f32 %v3322_v56, %v3226_v48  ;;  %6380 = vperm.xlu0 %7145, %v7322_v23   ;;  %v7025_v38 = vpop.f32.mrb[41].mxu0  ;;  %v3598_v23 = vmul.f32 %v9180_v42, %v3406_v51  ;;  %v9181_v56 = vld [vmem:[#allocation8_spill] sm:$0xff]  ;;  %v3414_v39 = vld [vmem:[#allocation4 + $0x36] sm:$0x3] }
 0x2f0   :  { %v6204_v52 = vld [vmem:[#allocation3 + $0x36] sm:$0x3]  ;;  %6118 = vst.msk [vmem:[#allocation4 + $0x10] sm:$0x3] %vm88_vm4, %v6085_v54  ;;  %6119 = vst.msk [vmem:[#allocation4 + $0x12] sm:$0x3] %vm88_vm4, %v6086_v4  ;;  %v7324_v49 = vpop.eup %7323  ;;  %v3597_v54 = vmul.f32 %v9181_v56, %v3405_v58 }
 0x2f1   :  { %7333 = vrcp.f32 %v6204_v52  ;;  %3386 = vst [vmem:[#allocation3 + $0x3e] sm:$0x3] %v3354_v19  ;;  %v4477_v14 = vpop.f32.mrb[42].mxu0  ;;  %v4553_v34 = vpop.f32.mrb[42].mxu1  ;;  %v3408_v19 = vld [vmem:[#allocation4 + $0x2a] sm:$0x3] }
 0x2f2   :  { %v6087_v18 = vadd.f32 %v4477_v14, %v3589_v62  ;;  %v6088_v10 = vadd.f32 %v4553_v34, %v3590_v57  ;;  %v7040_v50 = vpop.f32.mrb[43].mxu1  ;;  %6405 = vperm.xlu1 %7146, %v7324_v49   ;;  %v7035_v59 = vpop.f32.mrb[43].mxu0  ;;  %v3407_v38 = vld [vmem:[#allocation4 + $0x28] sm:$0x3]  ;;  %v9182_v14 = vld [vmem:[#allocation5_spill] sm:$0xff] }
 0x2f3   :  { %v7326_v0 = vpop.eup %7325  ;;  %v3600_v34 = vmul.f32 %v9182_v14, %v3408_v19  ;;  %v3599_v37 = vmul.f32 %v9183_v26, %v3407_v38  ;;  %v3410_v50 = vld [vmem:[#allocation4 + $0x2e] sm:$0x3]  ;;  %v3409_v59 = vld [vmem:[#allocation4 + $0x2c] sm:$0x3]  ;;  %v3415_v51 = vld [vmem:[#allocation4 + $0x38] sm:$0x3] }
 0x2f4   :  { %v6206_v12 = vld [vmem:[#allocation3 + $0x3a] sm:$0x3]  ;;  %6390 = vperm.xlu0 %7145, %v7326_v0   ;;  %6120 = vst.msk [vmem:[#allocation4 + $0x14] sm:$0x3] %vm88_vm4, %v6087_v18  ;;  %6121 = vst.msk [vmem:[#allocation4 + $0x16] sm:$0x3] %vm88_vm4, %v6088_v10  ;;  %v7328_v36 = vpop.eup %7327  ;;  %v3607_v42 = vmul.f32 %v8819_v1, %v3415_v51 }
 0x2f5   :  { %7335 = vrcp.f32 %v6206_v12 }
 0x2f6   :  { %v4629_v41 = vpop.f32.mrb[44].mxu0  ;;  %v4705_v29 = vpop.f32.mrb[44].mxu1  ;;  %6415 = vperm.xlu1 %7146, %v7328_v36  }
 0x2f7   :  { %v7330_v5 = vpop.eup %7329  ;;  %v6089_v25 = vadd.f32 %v4629_v41, %v3591_v55  ;;  %v6090_v40 = vadd.f32 %v4705_v29, %v3592_v47  ;;  %v7050_v33 = vpop.f32.mrb[45].mxu1  ;;  %v9184_v55 = vld [vmem:[#allocation7_spill] sm:$0xff]  ;;  %v9185_v29 = vld [vmem:[#allocation14_spill] sm:$0xff] }
 0x2f8   :  { %v7045_v61 = vpop.f32.mrb[45].mxu0  ;;  %v6208_v24 = vld [vmem:[#allocation3 + $0x3e] sm:$0x3]  ;;  %6400 = vperm.xlu0 %7145, %v7330_v5   ;;  %v7332_v53 = vpop.eup %7331  ;;  %v3602_v41 = vmul.f32 %v9184_v55, %v3410_v50  ;;  %v3601_v5 = vmul.f32 %v9185_v29, %v3409_v59  ;;  %v6241_v59 = vld [vmem:[#allocation4] sm:$0x3] }
 0x2f9   :  { %7337 = vrcp.f32 %v6208_v24  ;;  %6122 = vst.msk [vmem:[#allocation4 + $0x18] sm:$0x3] %vm88_vm4, %v6089_v25  ;;  %6123 = vst.msk [vmem:[#allocation4 + $0x1a] sm:$0x3] %vm88_vm4, %v6090_v40  ;;  %v3412_v25 = vld [vmem:[#allocation4 + $0x32] sm:$0x3] }
 0x2fa   :  { %6425 = vperm.xlu1 %7146, %v7332_v53   ;;  %v3411_v40 = vld [vmem:[#allocation4 + $0x30] sm:$0x3] }
 0x2fb   :  { %v7334_v43 = vpop.eup %7333  ;;  %v4781_v8 = vpop.f32.mrb[46].mxu0 }
 0x2fc   :  { %v4857_v17 = vpop.f32.mrb[46].mxu1  ;;  %6410 = vperm.xlu0 %7145, %v7334_v43   ;;  %v6091_v6 = vadd.f32 %v4781_v8, %v3593_v2  ;;  %v7055_v46 = vpop.f32.mrb[47].mxu0  ;;  %v9187_v43 = vld [vmem:[#allocation16_spill] sm:$0xff] }
 0x2fd   :  { %v6092_v44 = vadd.f32 %v4857_v17, %v3594_v32  ;;  %v7060_v35 = vpop.f32.mrb[47].mxu1  ;;  %v9186_v32 = vld [vmem:[#allocation9_spill] sm:$0xff]  ;;  %v3603_v8 = vmul.f32 %v9187_v43, %v3411_v40 }
 0x2fe   :  { %6124 = vst.msk [vmem:[#allocation4 + $0x1c] sm:$0x3] %vm88_vm4, %v6091_v6  ;;  %v3604_v2 = vmul.f32 %v9186_v32, %v3412_v25  ;;  %v3413_v6 = vld [vmem:[#allocation4 + $0x34] sm:$0x3]  ;;  %v6246_v25 = vld [vmem:[#allocation4 + $0xa] sm:$0x3] }
 0x2ff   :  { %6125 = vst.msk [vmem:[#allocation4 + $0x1e] sm:$0x3] %vm88_vm4, %v6092_v44  ;;  %v7336_v20 = vpop.eup %7335  ;;  %v3605_v21 = vmul.f32 %v8816_v63, %v3413_v6  ;;  %v3417_v63 = vld [vmem:[#allocation4 + $0x3c] sm:$0x3]  ;;  %v6248_v32 = vld [vmem:[#allocation4 + $0xe] sm:$0x3] }
 0x300   :  { %6420 = vperm.xlu0 %7145, %v7336_v20   ;;  %v4933_v30 = vpop.f32.mrb[48].mxu0  ;;  %v5009_v16 = vpop.f32.mrb[48].mxu1 }
 0x301   :  { %v6093_v15 = vadd.f32 %v4933_v30, %v3595_v7  ;;  %v6094_v11 = vadd.f32 %v5009_v16, %v3596_v9  ;;  %v7065_v13 = vpop.f32.mrb[49].mxu0  ;;  %v7070_v48 = vpop.f32.mrb[49].mxu1  ;;  %v3606_v9 = vmul.f32 %v9188_v60, %v3414_v39  ;;  %v3416_v16 = vld [vmem:[#allocation4 + $0x3a] sm:$0x3]  ;;  %v6250_v39 = vld [vmem:[#allocation4 + $0x12] sm:$0x3] }
 0x302   :  { %v9189_v48 = vld [vmem:[#allocation12_spill] sm:$0xff]  ;;  %v6252_v60 = vld [vmem:[#allocation4 + $0x16] sm:$0x3] }
 0x303   :  { %v7338_v22 = vpop.eup %7337  ;;  %6126 = vst.msk [vmem:[#allocation4 + $0x20] sm:$0x3] %vm88_vm4, %v6093_v15  ;;  %6127 = vst.msk [vmem:[#allocation4 + $0x22] sm:$0x3] %vm88_vm4, %v6094_v11 }
 0x304   :  { %6430 = vperm.xlu0 %7145, %v7338_v22   ;;  %v3608_v22 = vmul.f32 %v9189_v48, %v3416_v16 }
 0x305   :  { %v5085_v4 = vpop.f32.mrb[50].mxu0  ;;  %v5161_v3 = vpop.f32.mrb[50].mxu1 }
 0x306   :  { %v6095_v57 = vadd.f32 %v5085_v4, %v3597_v54  ;;  %v6096_v62 = vadd.f32 %v5161_v3, %v3598_v23  ;;  %v7075_v52 = vpop.f32.mrb[51].mxu0  ;;  %v7080_v49 = vpop.f32.mrb[51].mxu1  ;;  %v3418_v4 = vld [vmem:[#allocation4 + $0x3e] sm:$0x3] }
 0x307   :  { %v3577_v23 = vpop.permute.xlu0 %3576 }
 0x308   :  { %6128 = vst.msk [vmem:[#allocation4 + $0x24] sm:$0x3] %vm88_vm4, %v6095_v57  ;;  %6129 = vst.msk [vmem:[#allocation4 + $0x26] sm:$0x3] %vm88_vm4, %v6096_v62  ;;  %v3609_v62 = vmul.f32 %v8822_v27, %v3417_v63  ;;  %v3610_v52 = vmul.f32 %v3577_v23, %v3418_v4 }
 0x30a   :  { %v5237_v18 = vpop.f32.mrb[52].mxu0  ;;  %v5313_v10 = vpop.f32.mrb[52].mxu1 }
 0x30b   :  { %v6097_v0 = vadd.f32 %v5237_v18, %v3599_v37  ;;  %v6098_v12 = vadd.f32 %v5313_v10, %v3600_v34  ;;  %v7085_v36 = vpop.f32.mrb[53].mxu0  ;;  %v7090_v47 = vpop.f32.mrb[53].mxu1  ;;  %v6242_v18 = vld [vmem:[#allocation4 + $0x2] sm:$0x3] }
 0x30c   :  { %v6243_v36 = vld [vmem:[#allocation4 + $0x4] sm:$0x3]  ;;  %v6244_v47 = vld [vmem:[#allocation4 + $0x6] sm:$0x3] }
 0x30d   :  { %6130 = vst.msk [vmem:[#allocation4 + $0x28] sm:$0x3] %vm88_vm4, %v6097_v0  ;;  %6131 = vst.msk [vmem:[#allocation4 + $0x2a] sm:$0x3] %vm88_vm4, %v6098_v12 }
 0x30f   :  { %v5389_v28 = vpop.f32.mrb[54].mxu0  ;;  %v5465_v31 = vpop.f32.mrb[54].mxu1 }
 0x310   :  { %v6099_v33 = vadd.f32 %v5389_v28, %v3601_v5  ;;  %v6100_v61 = vadd.f32 %v5465_v31, %v3602_v41  ;;  %v7095_v24 = vpop.f32.mrb[55].mxu0  ;;  %v7100_v53 = vpop.f32.mrb[55].mxu1  ;;  %v6245_v28 = vld [vmem:[#allocation4 + $0x8] sm:$0x3] }
 0x311   :  { %v6247_v24 = vld [vmem:[#allocation4 + $0xc] sm:$0x3] }
 0x312   :  { %6132 = vst.msk [vmem:[#allocation4 + $0x2c] sm:$0x3] %vm88_vm4, %v6099_v33  ;;  %6133 = vst.msk [vmem:[#allocation4 + $0x2e] sm:$0x3] %vm88_vm4, %v6100_v61 }
 0x314   :  { %v5541_v17 = vpop.f32.mrb[56].mxu0  ;;  %v5617_v45 = vpop.f32.mrb[56].mxu1 }
 0x315   :  { %v6101_v44 = vadd.f32 %v5541_v17, %v3603_v8  ;;  %v6102_v35 = vadd.f32 %v5617_v45, %v3604_v2  ;;  %v7105_v46 = vpop.f32.mrb[57].mxu0  ;;  %v7110_v20 = vpop.f32.mrb[57].mxu1  ;;  %v6249_v17 = vld [vmem:[#allocation4 + $0x10] sm:$0x3] }
 0x316   :  { %v6251_v46 = vld [vmem:[#allocation4 + $0x14] sm:$0x3] }
 0x317   :  { %6134 = vst.msk [vmem:[#allocation4 + $0x30] sm:$0x3] %vm88_vm4, %v6101_v44  ;;  %6135 = vst.msk [vmem:[#allocation4 + $0x32] sm:$0x3] %vm88_vm4, %v6102_v35 }
 0x319   :  { %v5693_v7 = vpop.f32.mrb[58].mxu0  ;;  %v5769_v30 = vpop.f32.mrb[58].mxu1 }
 0x31a   :  { %v6103_v58 = vadd.f32 %v5693_v7, %v3605_v21  ;;  %v6104_v15 = vadd.f32 %v5769_v30, %v3606_v9  ;;  %v7115_v11 = vpop.f32.mrb[59].mxu0  ;;  %v7120_v13 = vpop.f32.mrb[59].mxu1  ;;  %v6253_v7 = vld [vmem:[#allocation4 + $0x18] sm:$0x3] }
 0x31c   :  { %6136 = vst.msk [vmem:[#allocation4 + $0x34] sm:$0x3] %vm88_vm4, %v6103_v58  ;;  %6137 = vst.msk [vmem:[#allocation4 + $0x36] sm:$0x3] %vm88_vm4, %v6104_v15  ;;  %v6255_v58 = vld [vmem:[#allocation4 + $0x1c] sm:$0x3] }
 0x31d   :  { %v6254_v15 = vld [vmem:[#allocation4 + $0x1a] sm:$0x3] }
 0x31e   :  { %v5845_v56 = vpop.f32.mrb[60].mxu0  ;;  %v5921_v54 = vpop.f32.mrb[60].mxu1 }
 0x31f   :  { %v6105_v3 = vadd.f32 %v5845_v56, %v3607_v42  ;;  %v6106_v19 = vadd.f32 %v5921_v54, %v3608_v22  ;;  %v7125_v38 = vpop.f32.mrb[61].mxu0  ;;  %v7130_v57 = vpop.f32.mrb[61].mxu1  ;;  %v6257_v42 = vld [vmem:[#allocation4 + $0x20] sm:$0x3]  ;;  %v6256_v56 = vld [vmem:[#allocation4 + $0x1e] sm:$0x3] }
 0x320   :  { %v6258_v38 = vld [vmem:[#allocation4 + $0x22] sm:$0x3] }
 0x321   :  { %6138 = vst.msk [vmem:[#allocation4 + $0x38] sm:$0x3] %vm88_vm4, %v6105_v3  ;;  %6139 = vst.msk [vmem:[#allocation4 + $0x3a] sm:$0x3] %vm88_vm4, %v6106_v19  ;;  %v6259_v3 = vld [vmem:[#allocation4 + $0x24] sm:$0x3] }
 0x323   :  { %v5997_v49 = vpop.f32.mrb[62].mxu0  ;;  %v6073_v14 = vpop.f32.mrb[62].mxu1 }
 0x324   :  { %v6107_v34 = vadd.f32 %v5997_v49, %v3609_v62  ;;  %v6108_v1 = vadd.f32 %v6073_v14, %v3610_v52  ;;  %v7135_v26 = vpop.f32.mrb[63].mxu0  ;;  %v7140_v37 = vpop.f32.mrb[63].mxu1  ;;  %v6261_v49 = vld [vmem:[#allocation4 + $0x28] sm:$0x3] }
 0x325   :  { %v6263_v37 = vld [vmem:[#allocation4 + $0x2c] sm:$0x3] }
 0x326   :  { %6140 = vst.msk [vmem:[#allocation4 + $0x3c] sm:$0x3] %vm88_vm4, %v6107_v34  ;;  %6141 = vst.msk [vmem:[#allocation4 + $0x3e] sm:$0x3] %vm88_vm4, %v6108_v1  ;;  %v6260_v34 = vld [vmem:[#allocation4 + $0x26] sm:$0x3] }
 0x32b   :  { %v6281_v10 = vpop.permute.xlu0 %6280 }
 0x32c   :  { %v6434_v50 = vmul.f32 %v6281_v10, %v6242_v18 }
 0x32e   :  { %6466 = vst.msk [vmem:[%s9046_s3 + $0x2] sm:$0x3] %vm88_vm4, %v6434_v50 }
 0x33d   :  { %v6276_v27 = vpop.permute.xlu1 %6275 }
 0x33e   :  { %v6433_v0 = vmul.f32 %v6276_v27, %v6241_v59  ;;  %v6265_v27 = vld [vmem:[#allocation4 + $0x30] sm:$0x3]  ;;  %v6262_v59 = vld [vmem:[#allocation4 + $0x2a] sm:$0x3] }
 0x340   :  { %6465 = vst.msk [vmem:[%s9046_s3] sm:$0x3] %vm88_vm4, %v6433_v0 }
 0x341   :  { %v6286_v12 = vpop.permute.xlu1 %6285  ;;  %v6291_v55 = vpop.permute.xlu0 %6290 }
 0x342   :  { %v6435_v41 = vmul.f32 %v6286_v12, %v6243_v36  ;;  %v6436_v29 = vmul.f32 %v6291_v55, %v6244_v47  ;;  %v6267_v55 = vld [vmem:[#allocation4 + $0x34] sm:$0x3] }
 0x344   :  { %6467 = vst.msk [vmem:[%s9046_s3 + $0x4] sm:$0x3] %vm88_vm4, %v6435_v41  ;;  %6468 = vst.msk [vmem:[%s9046_s3 + $0x6] sm:$0x3] %vm88_vm4, %v6436_v29  ;;  %v6264_v29 = vld [vmem:[#allocation4 + $0x2e] sm:$0x3] }
 0x345   :  { %v6296_v5 = vpop.permute.xlu1 %6295 }
 0x346   :  { %v6437_v31 = vmul.f32 %v6296_v5, %v6245_v28  ;;  %v6301_v40 = vpop.permute.xlu0 %6300 }
 0x347   :  { %v6438_v33 = vmul.f32 %v6301_v40, %v6246_v25  ;;  %v6269_v25 = vld [vmem:[#allocation4 + $0x38] sm:$0x3] }
 0x348   :  { %6469 = vst.msk [vmem:[%s9046_s3 + $0x8] sm:$0x3] %vm88_vm4, %v6437_v31 }
 0x349   :  { %6470 = vst.msk [vmem:[%s9046_s3 + $0xa] sm:$0x3] %vm88_vm4, %v6438_v33  ;;  %v6306_v61 = vpop.permute.xlu1 %6305  ;;  %v6266_v33 = vld [vmem:[#allocation4 + $0x32] sm:$0x3] }
 0x34a   :  { %v6439_v53 = vmul.f32 %v6306_v61, %v6247_v24 }
 0x34b   :  { %v6311_v2 = vpop.permute.xlu0 %6310 }
 0x34c   :  { %6471 = vst.msk [vmem:[%s9046_s3 + $0xc] sm:$0x3] %vm88_vm4, %v6439_v53  ;;  %v6440_v43 = vmul.f32 %v6311_v2, %v6248_v32  ;;  %v6271_v32 = vld [vmem:[#allocation4 + $0x3c] sm:$0x3] }
 0x34d   :  { %v6316_v8 = vpop.permute.xlu1 %6315 }
 0x34e   :  { %6472 = vst.msk [vmem:[%s9046_s3 + $0xe] sm:$0x3] %vm88_vm4, %v6440_v43  ;;  %v6441_v45 = vmul.f32 %v6316_v8, %v6249_v17  ;;  %v6268_v43 = vld [vmem:[#allocation4 + $0x36] sm:$0x3] }
 0x350   :  { %6473 = vst.msk [vmem:[%s9046_s3 + $0x10] sm:$0x3] %vm88_vm4, %v6441_v45  ;;  %v6321_v6 = vpop.permute.xlu0 %6320  ;;  %v6270_v45 = vld [vmem:[#allocation4 + $0x3a] sm:$0x3] }
 0x351   :  { %v6442_v44 = vmul.f32 %v6321_v6, %v6250_v39  ;;  %v6326_v35 = vpop.permute.xlu1 %6325 }
 0x352   :  { %v6443_v20 = vmul.f32 %v6326_v35, %v6251_v46 }
 0x353   :  { %6474 = vst.msk [vmem:[%s9046_s3 + $0x12] sm:$0x3] %vm88_vm4, %v6442_v44  ;;  %v6272_v44 = vld [vmem:[#allocation4 + $0x3e] sm:$0x3] }
 0x354   :  { %6475 = vst.msk [vmem:[%s9046_s3 + $0x14] sm:$0x3] %vm88_vm4, %v6443_v20 }
 0x355   :  { %v6331_v9 = vpop.permute.xlu0 %6330  ;;  %v6336_v21 = vpop.permute.xlu1 %6335 }
 0x356   :  { %v6444_v30 = vmul.f32 %v6331_v9, %v6252_v60  ;;  %v6445_v16 = vmul.f32 %v6336_v21, %v6253_v7 }
 0x358   :  { %6476 = vst.msk [vmem:[%s9046_s3 + $0x16] sm:$0x3] %vm88_vm4, %v6444_v30  ;;  %6477 = vst.msk [vmem:[%s9046_s3 + $0x18] sm:$0x3] %vm88_vm4, %v6445_v16 }
 0x359   :  { %v6346_v51 = vpop.permute.xlu1 %6345 }
 0x35a   :  { %v6341_v11 = vpop.permute.xlu0 %6340  ;;  %v6447_v13 = vmul.f32 %v6346_v51, %v6255_v58 }
 0x35b   :  { %v6446_v48 = vmul.f32 %v6341_v11, %v6254_v15 }
 0x35c   :  { %6479 = vst.msk [vmem:[%s9046_s3 + $0x1c] sm:$0x3] %vm88_vm4, %v6447_v13 }
 0x35d   :  { %6478 = vst.msk [vmem:[%s9046_s3 + $0x1a] sm:$0x3] %vm88_vm4, %v6446_v48  ;;  %v6356_v22 = vpop.permute.xlu1 %6355 }
 0x35e   :  { %v6449_v23 = vmul.f32 %v6356_v22, %v6257_v42 }
 0x35f   :  { %v6351_v54 = vpop.permute.xlu0 %6350 }
 0x360   :  { %v6448_v63 = vmul.f32 %v6351_v54, %v6256_v56  ;;  %6481 = vst.msk [vmem:[%s9046_s3 + $0x20] sm:$0x3] %vm88_vm4, %v6449_v23 }
 0x361   :  { %v6366_v4 = vpop.permute.xlu1 %6365 }
 0x362   :  { %6480 = vst.msk [vmem:[%s9046_s3 + $0x1e] sm:$0x3] %vm88_vm4, %v6448_v63  ;;  %v6451_v19 = vmul.f32 %v6366_v4, %v6259_v3 }
 0x364   :  { %v6361_v57 = vpop.permute.xlu0 %6360  ;;  %6483 = vst.msk [vmem:[%s9046_s3 + $0x24] sm:$0x3] %vm88_vm4, %v6451_v19 }
 0x365   :  { %v6450_v62 = vmul.f32 %v6361_v57, %v6258_v38  ;;  %v6376_v52 = vpop.permute.xlu1 %6375 }
 0x366   :  { %v6453_v14 = vmul.f32 %v6376_v52, %v6261_v49 }
 0x367   :  { %6482 = vst.msk [vmem:[%s9046_s3 + $0x22] sm:$0x3] %vm88_vm4, %v6450_v62 }
 0x368   :  { %6485 = vst.msk [vmem:[%s9046_s3 + $0x28] sm:$0x3] %vm88_vm4, %v6453_v14 }
 0x369   :  { %v6371_v1 = vpop.permute.xlu0 %6370  ;;  %v6386_v26 = vpop.permute.xlu1 %6385 }
 0x36a   :  { %v6452_v18 = vmul.f32 %v6371_v1, %v6260_v34  ;;  %v6455_v10 = vmul.f32 %v6386_v26, %v6263_v37 }
 0x36c   :  { %6484 = vst.msk [vmem:[%s9046_s3 + $0x26] sm:$0x3] %vm88_vm4, %v6452_v18  ;;  %6487 = vst.msk [vmem:[%s9046_s3 + $0x2c] sm:$0x3] %vm88_vm4, %v6455_v10 }
 0x36d   :  { %v6396_v50 = vpop.permute.xlu1 %6395 }
 0x36e   :  { %v6381_v0 = vpop.permute.xlu0 %6380  ;;  %v6457_v12 = vmul.f32 %v6396_v50, %v6265_v27 }
 0x36f   :  { %v6454_v36 = vmul.f32 %v6381_v0, %v6262_v59 }
 0x370   :  { %6489 = vst.msk [vmem:[%s9046_s3 + $0x30] sm:$0x3] %vm88_vm4, %v6457_v12 }
 0x371   :  { %6486 = vst.msk [vmem:[%s9046_s3 + $0x2a] sm:$0x3] %vm88_vm4, %v6454_v36  ;;  %v6406_v47 = vpop.permute.xlu1 %6405 }
 0x372   :  { %v6459_v41 = vmul.f32 %v6406_v47, %v6267_v55 }
 0x373   :  { %v6391_v5 = vpop.permute.xlu0 %6390 }
 0x374   :  { %v6456_v28 = vmul.f32 %v6391_v5, %v6264_v29  ;;  %6491 = vst.msk [vmem:[%s9046_s3 + $0x34] sm:$0x3] %vm88_vm4, %v6459_v41 }
 0x375   :  { %v6416_v31 = vpop.permute.xlu1 %6415 }
 0x376   :  { %6488 = vst.msk [vmem:[%s9046_s3 + $0x2e] sm:$0x3] %vm88_vm4, %v6456_v28  ;;  %v6461_v40 = vmul.f32 %v6416_v31, %v6269_v25 }
 0x377   :  { %v6401_v61 = vpop.permute.xlu0 %6400 }
 0x378   :  { %v6458_v24 = vmul.f32 %v6401_v61, %v6266_v33  ;;  %6493 = vst.msk [vmem:[%s9046_s3 + $0x38] sm:$0x3] %vm88_vm4, %v6461_v40 }
 0x379   :  { %v6426_v53 = vpop.permute.xlu1 %6425 }
 0x37a   :  { %6490 = vst.msk [vmem:[%s9046_s3 + $0x32] sm:$0x3] %vm88_vm4, %v6458_v24  ;;  %v6463_v2 = vmul.f32 %v6426_v53, %v6271_v32 }
 0x37b   :  { %v6411_v8 = vpop.permute.xlu0 %6410 }
 0x37c   :  { %v6460_v17 = vmul.f32 %v6411_v8, %v6268_v43  ;;  %6495 = vst.msk [vmem:[%s9046_s3 + $0x3c] sm:$0x3] %vm88_vm4, %v6463_v2 }
 0x37e   :  { %6492 = vst.msk [vmem:[%s9046_s3 + $0x36] sm:$0x3] %vm88_vm4, %v6460_v17 }
 0x37f   :  { %v6421_v39 = vpop.permute.xlu0 %6420 }
 0x380   :  { %v6462_v6 = vmul.f32 %v6421_v39, %v6270_v45 }
 0x382   :  { %6494 = vst.msk [vmem:[%s9046_s3 + $0x3a] sm:$0x3] %vm88_vm4, %v6462_v6 }
 0x383   :  { %v6431_v35 = vpop.permute.xlu0 %6430 }
 0x384   :  { %v6464_v46 = vmul.f32 %v6431_v35, %v6272_v44 }
 0x386   :  { %6496 = vst.msk [vmem:[%s9046_s3 + $0x3e] sm:$0x3] %vm88_vm4, %v6464_v46 }

</bundles_post_ra>
